<compile_context>
chip_gen: v7x
topology: tpu7x:2x2x1
jax: 0.10.0
libtpu: 0.0.40
codegen_flags: <defaults>
</compile_context>

<pallas_src>
import jax
import jax.numpy as jnp
from jax.experimental import pallas as pl
from jax.experimental.pallas import tpu as pltpu


def _elu(v):
    # ELU(alpha=1): v if v > 0 else exp(v) - 1.  exp(min(v, 0)) keeps the unselected branch
    # finite.  (jnp.expm1 would track PyTorch a few ULPs tighter, but exp-1 is guaranteed to
    # lower in Mosaic and differs by <= ~1.2e-7 absolute -- far inside the test tolerance.)
    return jnp.where(v > 0, v, jnp.exp(jnp.minimum(v, 0.0)) - 1.0)


def conv_mixer_kernel(x_ref, dww_ref, dwb_ref, pww_ref, pwb_ref, o_ref):
    # x_ref   : (Bb, C, L)         block of Bb independent samples
    # dww_ref : (depth, K, C, L)   depthwise weights, pre-broadcast along the lane dim
    # dwb_ref : (depth, C, L)      depthwise bias,    pre-broadcast along the lane dim
    # pww_ref : (depth, C, C)      pointwise (1x1) weights, (out, in)
    # pwb_ref : (depth, C, L)      pointwise bias,    pre-broadcast along the lane dim
    # o_ref   : (Bb, C, L)
    depth, K, C, L = dww_ref.shape
    Bb = x_ref.shape[0]
    # PyTorch padding='same' with even K: floor((K-1)/2) on the left, the rest on the right;
    # padding_mode='replicate' -> edge values.
    left = (K - 1) // 2
    right = (K - 1) - left

    x = x_ref[...].astype(jnp.float32)                       # (Bb, C, L)
    for d in range(depth):                                   # static depth -> fully unrolled
        # Replicated edge columns, hoisted once per layer (2 lane broadcasts per layer).
        x_first = jnp.broadcast_to(x[:, :, :1], (Bb, C, left)) if left > 0 else None
        x_last = jnp.broadcast_to(x[:, :, L - 1:], (Bb, C, right)) if right > 0 else None

        # ---- depthwise conv (groups=C), 'same' replicate padding, all in registers -------
        acc = jnp.zeros((Bb, C, L), jnp.float32)
        for k in range(K):                                   # K shifted FMAs on the VPU
            s = k - left                                     # tap offset in [-left, right]
            if s == 0:
                shifted = x
            elif s > 0:                                      # window hangs off the right edge
                shifted = jnp.concatenate([x[:, :, s:], x_last[:, :, :s]], axis=2)
            else:                                            # window hangs off the left edge
                shifted = jnp.concatenate([x_first[:, :, :(-s)], x[:, :, :L + s]], axis=2)
            acc = acc + dww_ref[d, k][None] * shifted        # weight broadcast only over Bb (free)
        y = _elu(acc + dwb_ref[d][None]) + x                 # bias, ELU, residual

        # ---- pointwise (1x1) conv: channel mixing on the MXU, one matmul per sample -------
        w = pww_ref[d]                                       # (C, C)
        z = jnp.stack(
            [jnp.dot(w, y[b], preferred_element_type=jnp.float32) for b in range(Bb)],
            axis=0)                                          # (Bb, C, L)
        x = _elu(z + pwb_ref[d][None])

    o_ref[...] = x.astype(o_ref.dtype)                       # lane-dense (L = 128) full store


def conv_mixer_batched(x, dw_w, dw_b, pw_w, pw_b, *, block_b=None):
    """x: (B, C, L) batch of independent samples; dw_w: (depth, C, K); dw_b: (depth, C);
    pw_w: (depth, C, C) as (out, in); pw_b: (depth, C)."""
    B, C, L = x.shape
    depth, _, K = dw_w.shape
    if block_b is None:
        block_b = min(B, 4)
    assert B % block_b == 0, "batch must be divisible by the batch block"

    # Pre-expand depthwise weights / biases along the lane dim so the kernel's tap loop has
    # zero in-kernel lane broadcasts.  Their block index is constant across the grid, so
    # Pallas DMAs them exactly once (~200 KiB total).
    dww_exp = jnp.broadcast_to(
        jnp.transpose(dw_w, (0, 2, 1))[..., None], (depth, K, C, L)).astype(jnp.float32)
    dwb_exp = jnp.broadcast_to(dw_b[..., None], (depth, C, L)).astype(jnp.float32)
    pwb_exp = jnp.broadcast_to(pw_b[..., None], (depth, C, L)).astype(jnp.float32)

    return pl.pallas_call(
        conv_mixer_kernel,
        out_shape=jax.ShapeDtypeStruct((B, C, L), x.dtype),
        grid=(B // block_b,),                                # batch blocks
        in_specs=[
            pl.BlockSpec((block_b, C, L), lambda i: (i, 0, 0)),
            pl.BlockSpec((depth, K, C, L), lambda i: (0, 0, 0, 0)),
            pl.BlockSpec((depth, C, L), lambda i: (0, 0, 0)),
            pl.BlockSpec((depth, C, C), lambda i: (0, 0, 0)),
            pl.BlockSpec((depth, C, L), lambda i: (0, 0, 0)),
        ],
        out_specs=pl.BlockSpec((block_b, C, L), lambda i: (i, 0, 0)),
        input_output_aliases={0: 0},                         # reuse x's HBM slab if donated
        compiler_params=pltpu.CompilerParams(
            dimension_semantics=("parallel",)),              # split batch across TCs on v7x
    )(x, dww_exp, dwb_exp, pw_w.astype(jnp.float32), pwb_exp)


def conv_mixer(x, dw_w, dw_b, pw_w, pw_b):
    """Exact module signature: (n_channels, L) -> (n_channels, L) for a single sample."""
    return conv_mixer_batched(x[None], dw_w, dw_b, pw_w, pw_b, block_b=1)[0]


def conv_mixer_reference(x, dw_w, dw_b, pw_w, pw_b):
    """Pure-JAX reference with the exact PyTorch forward semantics (f32 throughout).
    x: (B, C, L); each batch element is an independent ConvMixer forward."""
    depth, C, K = dw_w.shape
    left = (K - 1) // 2
    right = (K - 1) - left
    hi = jax.lax.Precision.HIGHEST

    def elu(v):
        return jnp.where(v > 0, v, jnp.expm1(v))

    for d in range(depth):
        xp = jnp.pad(x, ((0, 0), (0, 0), (left, right)), mode="edge")     # (B, C, L+K-1)
        y = jax.lax.conv_general_dilated(
            xp, dw_w[d][:, None, :],                  # weight (O=C, I/groups=1, K)
            window_strides=(1,), padding="VALID",
            dimension_numbers=("NCW", "OIW", "NCW"),
            feature_group_count=C, precision=hi,
        ) + dw_b[d][None, :, None]
        y = elu(y) + x
        z = jnp.einsum("oc,bcl->bol", pw_w[d], y, precision=hi) + pw_b[d][None, :, None]
        x = elu(z)
    return x


if __name__ == "__main__":
    # Small shapes consistent with the module: n_channels=8, depth=2, kernel_size=24 (the
    # module default).  L=128 keeps the layout lane-dense; B=8 independent samples are
    # batched through one pallas_call (2 grid steps of 4 samples each).
    B, C, L, DEPTH, K = 8, 8, 128, 2, 24

    key = jax.random.PRNGKey(0)
    k_x, k_dw, k_db, k_pw, k_pb = jax.random.split(key, 5)

    x = jax.random.normal(k_x, (B, C, L), dtype=jnp.float32)

    # Deterministic Conv1d-style params (uniform(-1/sqrt(fan_in), 1/sqrt(fan_in))).
    bnd_dw = 1.0 / (K ** 0.5)                 # depthwise fan_in = (C/groups) * K = K
    dw_w = jax.random.uniform(k_dw, (DEPTH, C, K), minval=-bnd_dw, maxval=bnd_dw,
                              dtype=jnp.float32)
    dw_b = jax.random.uniform(k_db, (DEPTH, C), minval=-bnd_dw, maxval=bnd_dw,
                              dtype=jnp.float32)
    bnd_pw = 1.0 / (C ** 0.5)                 # pointwise fan_in = C * 1
    pw_w = jax.random.uniform(k_pw, (DEPTH, C, C), minval=-bnd_pw, maxval=bnd_pw,
                              dtype=jnp.float32)
    pw_b = jax.random.uniform(k_pb, (DEPTH, C), minval=-bnd_pw, maxval=bnd_pw,
                              dtype=jnp.float32)

    out = jax.block_until_ready(conv_mixer_batched(x, dw_w, dw_b, pw_w, pw_b))

    ref = conv_mixer_reference(x, dw_w, dw_b, pw_w, pw_b)
    assert out.shape == (B, C, L)
    # Semantic bugs (wrong pad split / flipped taps / missing residual) give O(0.1+) errors;
    # 1e-3 comfortably absorbs f32 accumulation-order / exp-vs-expm1 differences.
    assert jnp.allclose(out, ref, atol=1e-3, rtol=1e-3), (
        f"mismatch vs reference: max abs err {jnp.max(jnp.abs(out - ref))}")

    print("KERNEL_OK")
</pallas_src>

<mosaic_0001>
module attributes {stable_mosaic.version = 11 : i64} {
  func.func @conv_mixer_kernel(%arg0: i32, %arg1: memref<4x8x128xf32, #tpu.memory_space<vmem>>, %arg2: memref<2x24x8x128xf32, #tpu.memory_space<vmem>>, %arg3: memref<2x8x128xf32, #tpu.memory_space<vmem>>, %arg4: memref<2x8x8xf32, #tpu.memory_space<vmem>>, %arg5: memref<2x8x128xf32, #tpu.memory_space<vmem>>, %arg6: memref<4x8x128xf32, #tpu.memory_space<vmem>>) attributes {dimension_semantics = [#tpu.dimension_semantics<parallel>], iteration_bounds = array<i64: 2>, scalar_prefetch = 0 : i64, scratch_operands = 0 : i64, tpu.core_type = #tpu.core_type<tc>, window_params = [{transform_indices = @transform_0, window_bounds = array<i64: 4, 8, 128>}, {pipeline_mode = #tpu.pipeline_mode<synchronous>, transform_indices = @transform_1, window_bounds = array<i64: 2, 24, 8, 128>}, {pipeline_mode = #tpu.pipeline_mode<synchronous>, transform_indices = @transform_2, window_bounds = array<i64: 2, 8, 128>}, {pipeline_mode = #tpu.pipeline_mode<synchronous>, transform_indices = @transform_3, window_bounds = array<i64: 2, 8, 8>}, {pipeline_mode = #tpu.pipeline_mode<synchronous>, transform_indices = @transform_4, window_bounds = array<i64: 2, 8, 128>}, {transform_indices = @transform_5, window_bounds = array<i64: 4, 8, 128>}]} {
    %c0 = arith.constant 0 : index
    %c0_0 = arith.constant 0 : index
    %c0_1 = arith.constant 0 : index
    %0 = vector.load %arg1[%c0, %c0_0, %c0_1] : memref<4x8x128xf32, #tpu.memory_space<vmem>>, vector<4x8x128xf32>
    %1 = vector.extract_strided_slice %0 {offsets = [0, 0, 0], sizes = [4, 8, 1], strides = [1, 1, 1]} : vector<4x8x128xf32> to vector<4x8x1xf32>
    %2 = vector.shape_cast %1 : vector<4x8x1xf32> to vector<4x8x1xf32>
    %3 = vector.broadcast %2 : vector<4x8x1xf32> to vector<4x8x11xf32>
    %4 = vector.extract_strided_slice %0 {offsets = [0, 0, 127], sizes = [4, 8, 1], strides = [1, 1, 1]} : vector<4x8x128xf32> to vector<4x8x1xf32>
    %5 = vector.shape_cast %4 : vector<4x8x1xf32> to vector<4x8x1xf32>
    %6 = vector.broadcast %5 : vector<4x8x1xf32> to vector<4x8x12xf32>
    %cst = arith.constant 0.000000e+00 : f32
    %7 = vector.broadcast %cst : f32 to vector<4x8x128xf32>
    %8 = vector.extract_strided_slice %0 {offsets = [0, 0, 0], sizes = [4, 8, 117], strides = [1, 1, 1]} : vector<4x8x128xf32> to vector<4x8x117xf32>
    %9 = tpu.concatenate %3, %8 in 2 : vector<4x8x11xf32>, vector<4x8x117xf32> -> vector<4x8x128xf32>
    %c0_2 = arith.constant 0 : index
    %c0_3 = arith.constant 0 : index
    %c0_4 = arith.constant 0 : index
    %c0_5 = arith.constant 0 : index
    %10 = vector.load %arg2[%c0_2, %c0_3, %c0_4, %c0_5] : memref<2x24x8x128xf32, #tpu.memory_space<vmem>>, vector<1x1x8x128xf32>
    %11 = vector.shape_cast %10 : vector<1x1x8x128xf32> to vector<8x128xf32>
    %12 = vector.shape_cast %11 : vector<8x128xf32> to vector<1x8x128xf32>
    %13 = vector.broadcast %12 : vector<1x8x128xf32> to vector<4x8x128xf32>
    %14 = arith.mulf %13, %9 : vector<4x8x128xf32>
    %15 = arith.addf %7, %14 : vector<4x8x128xf32>
    %16 = vector.extract_strided_slice %3 {offsets = [0, 0, 0], sizes = [4, 8, 10], strides = [1, 1, 1]} : vector<4x8x11xf32> to vector<4x8x10xf32>
    %17 = vector.extract_strided_slice %0 {offsets = [0, 0, 0], sizes = [4, 8, 118], strides = [1, 1, 1]} : vector<4x8x128xf32> to vector<4x8x118xf32>
    %18 = tpu.concatenate %16, %17 in 2 : vector<4x8x10xf32>, vector<4x8x118xf32> -> vector<4x8x128xf32>
    %c0_6 = arith.constant 0 : index
    %c1 = arith.constant 1 : index
    %c0_7 = arith.constant 0 : index
    %c0_8 = arith.constant 0 : index
    %19 = vector.load %arg2[%c0_6, %c1, %c0_7, %c0_8] : memref<2x24x8x128xf32, #tpu.memory_space<vmem>>, vector<1x1x8x128xf32>
    %20 = vector.shape_cast %19 : vector<1x1x8x128xf32> to vector<8x128xf32>
    %21 = vector.shape_cast %20 : vector<8x128xf32> to vector<1x8x128xf32>
    %22 = vector.broadcast %21 : vector<1x8x128xf32> to vector<4x8x128xf32>
    %23 = arith.mulf %22, %18 : vector<4x8x128xf32>
    %24 = arith.addf %15, %23 : vector<4x8x128xf32>
    %25 = vector.extract_strided_slice %3 {offsets = [0, 0, 0], sizes = [4, 8, 9], strides = [1, 1, 1]} : vector<4x8x11xf32> to vector<4x8x9xf32>
    %26 = vector.extract_strided_slice %0 {offsets = [0, 0, 0], sizes = [4, 8, 119], strides = [1, 1, 1]} : vector<4x8x128xf32> to vector<4x8x119xf32>
    %27 = tpu.concatenate %25, %26 in 2 : vector<4x8x9xf32>, vector<4x8x119xf32> -> vector<4x8x128xf32>
    %c0_9 = arith.constant 0 : index
    %c2 = arith.constant 2 : index
    %c0_10 = arith.constant 0 : index
    %c0_11 = arith.constant 0 : index
    %28 = vector.load %arg2[%c0_9, %c2, %c0_10, %c0_11] : memref<2x24x8x128xf32, #tpu.memory_space<vmem>>, vector<1x1x8x128xf32>
    %29 = vector.shape_cast %28 : vector<1x1x8x128xf32> to vector<8x128xf32>
    %30 = vector.shape_cast %29 : vector<8x128xf32> to vector<1x8x128xf32>
    %31 = vector.broadcast %30 : vector<1x8x128xf32> to vector<4x8x128xf32>
    %32 = arith.mulf %31, %27 : vector<4x8x128xf32>
    %33 = arith.addf %24, %32 : vector<4x8x128xf32>
    %34 = vector.extract_strided_slice %3 {offsets = [0, 0, 0], sizes = [4, 8, 8], strides = [1, 1, 1]} : vector<4x8x11xf32> to vector<4x8x8xf32>
    %35 = vector.extract_strided_slice %0 {offsets = [0, 0, 0], sizes = [4, 8, 120], strides = [1, 1, 1]} : vector<4x8x128xf32> to vector<4x8x120xf32>
    %36 = tpu.concatenate %34, %35 in 2 : vector<4x8x8xf32>, vector<4x8x120xf32> -> vector<4x8x128xf32>
    %c0_12 = arith.constant 0 : index
    %c3 = arith.constant 3 : index
    %c0_13 = arith.constant 0 : index
    %c0_14 = arith.constant 0 : index
    %37 = vector.load %arg2[%c0_12, %c3, %c0_13, %c0_14] : memref<2x24x8x128xf32, #tpu.memory_space<vmem>>, vector<1x1x8x128xf32>
    %38 = vector.shape_cast %37 : vector<1x1x8x128xf32> to vector<8x128xf32>
    %39 = vector.shape_cast %38 : vector<8x128xf32> to vector<1x8x128xf32>
    %40 = vector.broadcast %39 : vector<1x8x128xf32> to vector<4x8x128xf32>
    %41 = arith.mulf %40, %36 : vector<4x8x128xf32>
    %42 = arith.addf %33, %41 : vector<4x8x128xf32>
    %43 = vector.extract_strided_slice %3 {offsets = [0, 0, 0], sizes = [4, 8, 7], strides = [1, 1, 1]} : vector<4x8x11xf32> to vector<4x8x7xf32>
    %44 = vector.extract_strided_slice %0 {offsets = [0, 0, 0], sizes = [4, 8, 121], strides = [1, 1, 1]} : vector<4x8x128xf32> to vector<4x8x121xf32>
    %45 = tpu.concatenate %43, %44 in 2 : vector<4x8x7xf32>, vector<4x8x121xf32> -> vector<4x8x128xf32>
    %c0_15 = arith.constant 0 : index
    %c4 = arith.constant 4 : index
    %c0_16 = arith.constant 0 : index
    %c0_17 = arith.constant 0 : index
    %46 = vector.load %arg2[%c0_15, %c4, %c0_16, %c0_17] : memref<2x24x8x128xf32, #tpu.memory_space<vmem>>, vector<1x1x8x128xf32>
    %47 = vector.shape_cast %46 : vector<1x1x8x128xf32> to vector<8x128xf32>
    %48 = vector.shape_cast %47 : vector<8x128xf32> to vector<1x8x128xf32>
    %49 = vector.broadcast %48 : vector<1x8x128xf32> to vector<4x8x128xf32>
    %50 = arith.mulf %49, %45 : vector<4x8x128xf32>
    %51 = arith.addf %42, %50 : vector<4x8x128xf32>
    %52 = vector.extract_strided_slice %3 {offsets = [0, 0, 0], sizes = [4, 8, 6], strides = [1, 1, 1]} : vector<4x8x11xf32> to vector<4x8x6xf32>
    %53 = vector.extract_strided_slice %0 {offsets = [0, 0, 0], sizes = [4, 8, 122], strides = [1, 1, 1]} : vector<4x8x128xf32> to vector<4x8x122xf32>
    %54 = tpu.concatenate %52, %53 in 2 : vector<4x8x6xf32>, vector<4x8x122xf32> -> vector<4x8x128xf32>
    %c0_18 = arith.constant 0 : index
    %c5 = arith.constant 5 : index
    %c0_19 = arith.constant 0 : index
    %c0_20 = arith.constant 0 : index
    %55 = vector.load %arg2[%c0_18, %c5, %c0_19, %c0_20] : memref<2x24x8x128xf32, #tpu.memory_space<vmem>>, vector<1x1x8x128xf32>
    %56 = vector.shape_cast %55 : vector<1x1x8x128xf32> to vector<8x128xf32>
    %57 = vector.shape_cast %56 : vector<8x128xf32> to vector<1x8x128xf32>
    %58 = vector.broadcast %57 : vector<1x8x128xf32> to vector<4x8x128xf32>
    %59 = arith.mulf %58, %54 : vector<4x8x128xf32>
    %60 = arith.addf %51, %59 : vector<4x8x128xf32>
    %61 = vector.extract_strided_slice %3 {offsets = [0, 0, 0], sizes = [4, 8, 5], strides = [1, 1, 1]} : vector<4x8x11xf32> to vector<4x8x5xf32>
    %62 = vector.extract_strided_slice %0 {offsets = [0, 0, 0], sizes = [4, 8, 123], strides = [1, 1, 1]} : vector<4x8x128xf32> to vector<4x8x123xf32>
    %63 = tpu.concatenate %61, %62 in 2 : vector<4x8x5xf32>, vector<4x8x123xf32> -> vector<4x8x128xf32>
    %c0_21 = arith.constant 0 : index
    %c6 = arith.constant 6 : index
    %c0_22 = arith.constant 0 : index
    %c0_23 = arith.constant 0 : index
    %64 = vector.load %arg2[%c0_21, %c6, %c0_22, %c0_23] : memref<2x24x8x128xf32, #tpu.memory_space<vmem>>, vector<1x1x8x128xf32>
    %65 = vector.shape_cast %64 : vector<1x1x8x128xf32> to vector<8x128xf32>
    %66 = vector.shape_cast %65 : vector<8x128xf32> to vector<1x8x128xf32>
    %67 = vector.broadcast %66 : vector<1x8x128xf32> to vector<4x8x128xf32>
    %68 = arith.mulf %67, %63 : vector<4x8x128xf32>
    %69 = arith.addf %60, %68 : vector<4x8x128xf32>
    %70 = vector.extract_strided_slice %3 {offsets = [0, 0, 0], sizes = [4, 8, 4], strides = [1, 1, 1]} : vector<4x8x11xf32> to vector<4x8x4xf32>
    %71 = vector.extract_strided_slice %0 {offsets = [0, 0, 0], sizes = [4, 8, 124], strides = [1, 1, 1]} : vector<4x8x128xf32> to vector<4x8x124xf32>
    %72 = tpu.concatenate %70, %71 in 2 : vector<4x8x4xf32>, vector<4x8x124xf32> -> vector<4x8x128xf32>
    %c0_24 = arith.constant 0 : index
    %c7 = arith.constant 7 : index
    %c0_25 = arith.constant 0 : index
    %c0_26 = arith.constant 0 : index
    %73 = vector.load %arg2[%c0_24, %c7, %c0_25, %c0_26] : memref<2x24x8x128xf32, #tpu.memory_space<vmem>>, vector<1x1x8x128xf32>
    %74 = vector.shape_cast %73 : vector<1x1x8x128xf32> to vector<8x128xf32>
    %75 = vector.shape_cast %74 : vector<8x128xf32> to vector<1x8x128xf32>
    %76 = vector.broadcast %75 : vector<1x8x128xf32> to vector<4x8x128xf32>
    %77 = arith.mulf %76, %72 : vector<4x8x128xf32>
    %78 = arith.addf %69, %77 : vector<4x8x128xf32>
    %79 = vector.extract_strided_slice %3 {offsets = [0, 0, 0], sizes = [4, 8, 3], strides = [1, 1, 1]} : vector<4x8x11xf32> to vector<4x8x3xf32>
    %80 = vector.extract_strided_slice %0 {offsets = [0, 0, 0], sizes = [4, 8, 125], strides = [1, 1, 1]} : vector<4x8x128xf32> to vector<4x8x125xf32>
    %81 = tpu.concatenate %79, %80 in 2 : vector<4x8x3xf32>, vector<4x8x125xf32> -> vector<4x8x128xf32>
    %c0_27 = arith.constant 0 : index
    %c8 = arith.constant 8 : index
    %c0_28 = arith.constant 0 : index
    %c0_29 = arith.constant 0 : index
    %82 = vector.load %arg2[%c0_27, %c8, %c0_28, %c0_29] : memref<2x24x8x128xf32, #tpu.memory_space<vmem>>, vector<1x1x8x128xf32>
    %83 = vector.shape_cast %82 : vector<1x1x8x128xf32> to vector<8x128xf32>
    %84 = vector.shape_cast %83 : vector<8x128xf32> to vector<1x8x128xf32>
    %85 = vector.broadcast %84 : vector<1x8x128xf32> to vector<4x8x128xf32>
    %86 = arith.mulf %85, %81 : vector<4x8x128xf32>
    %87 = arith.addf %78, %86 : vector<4x8x128xf32>
    %88 = vector.extract_strided_slice %3 {offsets = [0, 0, 0], sizes = [4, 8, 2], strides = [1, 1, 1]} : vector<4x8x11xf32> to vector<4x8x2xf32>
    %89 = vector.extract_strided_slice %0 {offsets = [0, 0, 0], sizes = [4, 8, 126], strides = [1, 1, 1]} : vector<4x8x128xf32> to vector<4x8x126xf32>
    %90 = tpu.concatenate %88, %89 in 2 : vector<4x8x2xf32>, vector<4x8x126xf32> -> vector<4x8x128xf32>
    %c0_30 = arith.constant 0 : index
    %c9 = arith.constant 9 : index
    %c0_31 = arith.constant 0 : index
    %c0_32 = arith.constant 0 : index
    %91 = vector.load %arg2[%c0_30, %c9, %c0_31, %c0_32] : memref<2x24x8x128xf32, #tpu.memory_space<vmem>>, vector<1x1x8x128xf32>
    %92 = vector.shape_cast %91 : vector<1x1x8x128xf32> to vector<8x128xf32>
    %93 = vector.shape_cast %92 : vector<8x128xf32> to vector<1x8x128xf32>
    %94 = vector.broadcast %93 : vector<1x8x128xf32> to vector<4x8x128xf32>
    %95 = arith.mulf %94, %90 : vector<4x8x128xf32>
    %96 = arith.addf %87, %95 : vector<4x8x128xf32>
    %97 = vector.extract_strided_slice %3 {offsets = [0, 0, 0], sizes = [4, 8, 1], strides = [1, 1, 1]} : vector<4x8x11xf32> to vector<4x8x1xf32>
    %98 = vector.extract_strided_slice %0 {offsets = [0, 0, 0], sizes = [4, 8, 127], strides = [1, 1, 1]} : vector<4x8x128xf32> to vector<4x8x127xf32>
    %99 = tpu.concatenate %97, %98 in 2 : vector<4x8x1xf32>, vector<4x8x127xf32> -> vector<4x8x128xf32>
    %c0_33 = arith.constant 0 : index
    %c10 = arith.constant 10 : index
    %c0_34 = arith.constant 0 : index
    %c0_35 = arith.constant 0 : index
    %100 = vector.load %arg2[%c0_33, %c10, %c0_34, %c0_35] : memref<2x24x8x128xf32, #tpu.memory_space<vmem>>, vector<1x1x8x128xf32>
    %101 = vector.shape_cast %100 : vector<1x1x8x128xf32> to vector<8x128xf32>
    %102 = vector.shape_cast %101 : vector<8x128xf32> to vector<1x8x128xf32>
    %103 = vector.broadcast %102 : vector<1x8x128xf32> to vector<4x8x128xf32>
    %104 = arith.mulf %103, %99 : vector<4x8x128xf32>
    %105 = arith.addf %96, %104 : vector<4x8x128xf32>
    %c0_36 = arith.constant 0 : index
    %c11 = arith.constant 11 : index
    %c0_37 = arith.constant 0 : index
    %c0_38 = arith.constant 0 : index
    %106 = vector.load %arg2[%c0_36, %c11, %c0_37, %c0_38] : memref<2x24x8x128xf32, #tpu.memory_space<vmem>>, vector<1x1x8x128xf32>
    %107 = vector.shape_cast %106 : vector<1x1x8x128xf32> to vector<8x128xf32>
    %108 = vector.shape_cast %107 : vector<8x128xf32> to vector<1x8x128xf32>
    %109 = vector.broadcast %108 : vector<1x8x128xf32> to vector<4x8x128xf32>
    %110 = arith.mulf %109, %0 : vector<4x8x128xf32>
    %111 = arith.addf %105, %110 : vector<4x8x128xf32>
    %112 = vector.extract_strided_slice %0 {offsets = [0, 0, 1], sizes = [4, 8, 127], strides = [1, 1, 1]} : vector<4x8x128xf32> to vector<4x8x127xf32>
    %113 = vector.extract_strided_slice %6 {offsets = [0, 0, 0], sizes = [4, 8, 1], strides = [1, 1, 1]} : vector<4x8x12xf32> to vector<4x8x1xf32>
    %114 = tpu.concatenate %112, %113 in 2 : vector<4x8x127xf32>, vector<4x8x1xf32> -> vector<4x8x128xf32>
    %c0_39 = arith.constant 0 : index
    %c12 = arith.constant 12 : index
    %c0_40 = arith.constant 0 : index
    %c0_41 = arith.constant 0 : index
    %115 = vector.load %arg2[%c0_39, %c12, %c0_40, %c0_41] : memref<2x24x8x128xf32, #tpu.memory_space<vmem>>, vector<1x1x8x128xf32>
    %116 = vector.shape_cast %115 : vector<1x1x8x128xf32> to vector<8x128xf32>
    %117 = vector.shape_cast %116 : vector<8x128xf32> to vector<1x8x128xf32>
    %118 = vector.broadcast %117 : vector<1x8x128xf32> to vector<4x8x128xf32>
    %119 = arith.mulf %118, %114 : vector<4x8x128xf32>
    %120 = arith.addf %111, %119 : vector<4x8x128xf32>
    %121 = vector.extract_strided_slice %0 {offsets = [0, 0, 2], sizes = [4, 8, 126], strides = [1, 1, 1]} : vector<4x8x128xf32> to vector<4x8x126xf32>
    %122 = vector.extract_strided_slice %6 {offsets = [0, 0, 0], sizes = [4, 8, 2], strides = [1, 1, 1]} : vector<4x8x12xf32> to vector<4x8x2xf32>
    %123 = tpu.concatenate %121, %122 in 2 : vector<4x8x126xf32>, vector<4x8x2xf32> -> vector<4x8x128xf32>
    %c0_42 = arith.constant 0 : index
    %c13 = arith.constant 13 : index
    %c0_43 = arith.constant 0 : index
    %c0_44 = arith.constant 0 : index
    %124 = vector.load %arg2[%c0_42, %c13, %c0_43, %c0_44] : memref<2x24x8x128xf32, #tpu.memory_space<vmem>>, vector<1x1x8x128xf32>
    %125 = vector.shape_cast %124 : vector<1x1x8x128xf32> to vector<8x128xf32>
    %126 = vector.shape_cast %125 : vector<8x128xf32> to vector<1x8x128xf32>
    %127 = vector.broadcast %126 : vector<1x8x128xf32> to vector<4x8x128xf32>
    %128 = arith.mulf %127, %123 : vector<4x8x128xf32>
    %129 = arith.addf %120, %128 : vector<4x8x128xf32>
    %130 = vector.extract_strided_slice %0 {offsets = [0, 0, 3], sizes = [4, 8, 125], strides = [1, 1, 1]} : vector<4x8x128xf32> to vector<4x8x125xf32>
    %131 = vector.extract_strided_slice %6 {offsets = [0, 0, 0], sizes = [4, 8, 3], strides = [1, 1, 1]} : vector<4x8x12xf32> to vector<4x8x3xf32>
    %132 = tpu.concatenate %130, %131 in 2 : vector<4x8x125xf32>, vector<4x8x3xf32> -> vector<4x8x128xf32>
    %c0_45 = arith.constant 0 : index
    %c14 = arith.constant 14 : index
    %c0_46 = arith.constant 0 : index
    %c0_47 = arith.constant 0 : index
    %133 = vector.load %arg2[%c0_45, %c14, %c0_46, %c0_47] : memref<2x24x8x128xf32, #tpu.memory_space<vmem>>, vector<1x1x8x128xf32>
    %134 = vector.shape_cast %133 : vector<1x1x8x128xf32> to vector<8x128xf32>
    %135 = vector.shape_cast %134 : vector<8x128xf32> to vector<1x8x128xf32>
    %136 = vector.broadcast %135 : vector<1x8x128xf32> to vector<4x8x128xf32>
    %137 = arith.mulf %136, %132 : vector<4x8x128xf32>
    %138 = arith.addf %129, %137 : vector<4x8x128xf32>
    %139 = vector.extract_strided_slice %0 {offsets = [0, 0, 4], sizes = [4, 8, 124], strides = [1, 1, 1]} : vector<4x8x128xf32> to vector<4x8x124xf32>
    %140 = vector.extract_strided_slice %6 {offsets = [0, 0, 0], sizes = [4, 8, 4], strides = [1, 1, 1]} : vector<4x8x12xf32> to vector<4x8x4xf32>
    %141 = tpu.concatenate %139, %140 in 2 : vector<4x8x124xf32>, vector<4x8x4xf32> -> vector<4x8x128xf32>
    %c0_48 = arith.constant 0 : index
    %c15 = arith.constant 15 : index
    %c0_49 = arith.constant 0 : index
    %c0_50 = arith.constant 0 : index
    %142 = vector.load %arg2[%c0_48, %c15, %c0_49, %c0_50] : memref<2x24x8x128xf32, #tpu.memory_space<vmem>>, vector<1x1x8x128xf32>
    %143 = vector.shape_cast %142 : vector<1x1x8x128xf32> to vector<8x128xf32>
    %144 = vector.shape_cast %143 : vector<8x128xf32> to vector<1x8x128xf32>
    %145 = vector.broadcast %144 : vector<1x8x128xf32> to vector<4x8x128xf32>
    %146 = arith.mulf %145, %141 : vector<4x8x128xf32>
    %147 = arith.addf %138, %146 : vector<4x8x128xf32>
    %148 = vector.extract_strided_slice %0 {offsets = [0, 0, 5], sizes = [4, 8, 123], strides = [1, 1, 1]} : vector<4x8x128xf32> to vector<4x8x123xf32>
    %149 = vector.extract_strided_slice %6 {offsets = [0, 0, 0], sizes = [4, 8, 5], strides = [1, 1, 1]} : vector<4x8x12xf32> to vector<4x8x5xf32>
    %150 = tpu.concatenate %148, %149 in 2 : vector<4x8x123xf32>, vector<4x8x5xf32> -> vector<4x8x128xf32>
    %c0_51 = arith.constant 0 : index
    %c16 = arith.constant 16 : index
    %c0_52 = arith.constant 0 : index
    %c0_53 = arith.constant 0 : index
    %151 = vector.load %arg2[%c0_51, %c16, %c0_52, %c0_53] : memref<2x24x8x128xf32, #tpu.memory_space<vmem>>, vector<1x1x8x128xf32>
    %152 = vector.shape_cast %151 : vector<1x1x8x128xf32> to vector<8x128xf32>
    %153 = vector.shape_cast %152 : vector<8x128xf32> to vector<1x8x128xf32>
    %154 = vector.broadcast %153 : vector<1x8x128xf32> to vector<4x8x128xf32>
    %155 = arith.mulf %154, %150 : vector<4x8x128xf32>
    %156 = arith.addf %147, %155 : vector<4x8x128xf32>
    %157 = vector.extract_strided_slice %0 {offsets = [0, 0, 6], sizes = [4, 8, 122], strides = [1, 1, 1]} : vector<4x8x128xf32> to vector<4x8x122xf32>
    %158 = vector.extract_strided_slice %6 {offsets = [0, 0, 0], sizes = [4, 8, 6], strides = [1, 1, 1]} : vector<4x8x12xf32> to vector<4x8x6xf32>
    %159 = tpu.concatenate %157, %158 in 2 : vector<4x8x122xf32>, vector<4x8x6xf32> -> vector<4x8x128xf32>
    %c0_54 = arith.constant 0 : index
    %c17 = arith.constant 17 : index
    %c0_55 = arith.constant 0 : index
    %c0_56 = arith.constant 0 : index
    %160 = vector.load %arg2[%c0_54, %c17, %c0_55, %c0_56] : memref<2x24x8x128xf32, #tpu.memory_space<vmem>>, vector<1x1x8x128xf32>
    %161 = vector.shape_cast %160 : vector<1x1x8x128xf32> to vector<8x128xf32>
    %162 = vector.shape_cast %161 : vector<8x128xf32> to vector<1x8x128xf32>
    %163 = vector.broadcast %162 : vector<1x8x128xf32> to vector<4x8x128xf32>
    %164 = arith.mulf %163, %159 : vector<4x8x128xf32>
    %165 = arith.addf %156, %164 : vector<4x8x128xf32>
    %166 = vector.extract_strided_slice %0 {offsets = [0, 0, 7], sizes = [4, 8, 121], strides = [1, 1, 1]} : vector<4x8x128xf32> to vector<4x8x121xf32>
    %167 = vector.extract_strided_slice %6 {offsets = [0, 0, 0], sizes = [4, 8, 7], strides = [1, 1, 1]} : vector<4x8x12xf32> to vector<4x8x7xf32>
    %168 = tpu.concatenate %166, %167 in 2 : vector<4x8x121xf32>, vector<4x8x7xf32> -> vector<4x8x128xf32>
    %c0_57 = arith.constant 0 : index
    %c18 = arith.constant 18 : index
    %c0_58 = arith.constant 0 : index
    %c0_59 = arith.constant 0 : index
    %169 = vector.load %arg2[%c0_57, %c18, %c0_58, %c0_59] : memref<2x24x8x128xf32, #tpu.memory_space<vmem>>, vector<1x1x8x128xf32>
    %170 = vector.shape_cast %169 : vector<1x1x8x128xf32> to vector<8x128xf32>
    %171 = vector.shape_cast %170 : vector<8x128xf32> to vector<1x8x128xf32>
    %172 = vector.broadcast %171 : vector<1x8x128xf32> to vector<4x8x128xf32>
    %173 = arith.mulf %172, %168 : vector<4x8x128xf32>
    %174 = arith.addf %165, %173 : vector<4x8x128xf32>
    %175 = vector.extract_strided_slice %0 {offsets = [0, 0, 8], sizes = [4, 8, 120], strides = [1, 1, 1]} : vector<4x8x128xf32> to vector<4x8x120xf32>
    %176 = vector.extract_strided_slice %6 {offsets = [0, 0, 0], sizes = [4, 8, 8], strides = [1, 1, 1]} : vector<4x8x12xf32> to vector<4x8x8xf32>
    %177 = tpu.concatenate %175, %176 in 2 : vector<4x8x120xf32>, vector<4x8x8xf32> -> vector<4x8x128xf32>
    %c0_60 = arith.constant 0 : index
    %c19 = arith.constant 19 : index
    %c0_61 = arith.constant 0 : index
    %c0_62 = arith.constant 0 : index
    %178 = vector.load %arg2[%c0_60, %c19, %c0_61, %c0_62] : memref<2x24x8x128xf32, #tpu.memory_space<vmem>>, vector<1x1x8x128xf32>
    %179 = vector.shape_cast %178 : vector<1x1x8x128xf32> to vector<8x128xf32>
    %180 = vector.shape_cast %179 : vector<8x128xf32> to vector<1x8x128xf32>
    %181 = vector.broadcast %180 : vector<1x8x128xf32> to vector<4x8x128xf32>
    %182 = arith.mulf %181, %177 : vector<4x8x128xf32>
    %183 = arith.addf %174, %182 : vector<4x8x128xf32>
    %184 = vector.extract_strided_slice %0 {offsets = [0, 0, 9], sizes = [4, 8, 119], strides = [1, 1, 1]} : vector<4x8x128xf32> to vector<4x8x119xf32>
    %185 = vector.extract_strided_slice %6 {offsets = [0, 0, 0], sizes = [4, 8, 9], strides = [1, 1, 1]} : vector<4x8x12xf32> to vector<4x8x9xf32>
    %186 = tpu.concatenate %184, %185 in 2 : vector<4x8x119xf32>, vector<4x8x9xf32> -> vector<4x8x128xf32>
    %c0_63 = arith.constant 0 : index
    %c20 = arith.constant 20 : index
    %c0_64 = arith.constant 0 : index
    %c0_65 = arith.constant 0 : index
    %187 = vector.load %arg2[%c0_63, %c20, %c0_64, %c0_65] : memref<2x24x8x128xf32, #tpu.memory_space<vmem>>, vector<1x1x8x128xf32>
    %188 = vector.shape_cast %187 : vector<1x1x8x128xf32> to vector<8x128xf32>
    %189 = vector.shape_cast %188 : vector<8x128xf32> to vector<1x8x128xf32>
    %190 = vector.broadcast %189 : vector<1x8x128xf32> to vector<4x8x128xf32>
    %191 = arith.mulf %190, %186 : vector<4x8x128xf32>
    %192 = arith.addf %183, %191 : vector<4x8x128xf32>
    %193 = vector.extract_strided_slice %0 {offsets = [0, 0, 10], sizes = [4, 8, 118], strides = [1, 1, 1]} : vector<4x8x128xf32> to vector<4x8x118xf32>
    %194 = vector.extract_strided_slice %6 {offsets = [0, 0, 0], sizes = [4, 8, 10], strides = [1, 1, 1]} : vector<4x8x12xf32> to vector<4x8x10xf32>
    %195 = tpu.concatenate %193, %194 in 2 : vector<4x8x118xf32>, vector<4x8x10xf32> -> vector<4x8x128xf32>
    %c0_66 = arith.constant 0 : index
    %c21 = arith.constant 21 : index
    %c0_67 = arith.constant 0 : index
    %c0_68 = arith.constant 0 : index
    %196 = vector.load %arg2[%c0_66, %c21, %c0_67, %c0_68] : memref<2x24x8x128xf32, #tpu.memory_space<vmem>>, vector<1x1x8x128xf32>
    %197 = vector.shape_cast %196 : vector<1x1x8x128xf32> to vector<8x128xf32>
    %198 = vector.shape_cast %197 : vector<8x128xf32> to vector<1x8x128xf32>
    %199 = vector.broadcast %198 : vector<1x8x128xf32> to vector<4x8x128xf32>
    %200 = arith.mulf %199, %195 : vector<4x8x128xf32>
    %201 = arith.addf %192, %200 : vector<4x8x128xf32>
    %202 = vector.extract_strided_slice %0 {offsets = [0, 0, 11], sizes = [4, 8, 117], strides = [1, 1, 1]} : vector<4x8x128xf32> to vector<4x8x117xf32>
    %203 = vector.extract_strided_slice %6 {offsets = [0, 0, 0], sizes = [4, 8, 11], strides = [1, 1, 1]} : vector<4x8x12xf32> to vector<4x8x11xf32>
    %204 = tpu.concatenate %202, %203 in 2 : vector<4x8x117xf32>, vector<4x8x11xf32> -> vector<4x8x128xf32>
    %c0_69 = arith.constant 0 : index
    %c22 = arith.constant 22 : index
    %c0_70 = arith.constant 0 : index
    %c0_71 = arith.constant 0 : index
    %205 = vector.load %arg2[%c0_69, %c22, %c0_70, %c0_71] : memref<2x24x8x128xf32, #tpu.memory_space<vmem>>, vector<1x1x8x128xf32>
    %206 = vector.shape_cast %205 : vector<1x1x8x128xf32> to vector<8x128xf32>
    %207 = vector.shape_cast %206 : vector<8x128xf32> to vector<1x8x128xf32>
    %208 = vector.broadcast %207 : vector<1x8x128xf32> to vector<4x8x128xf32>
    %209 = arith.mulf %208, %204 : vector<4x8x128xf32>
    %210 = arith.addf %201, %209 : vector<4x8x128xf32>
    %211 = vector.extract_strided_slice %0 {offsets = [0, 0, 12], sizes = [4, 8, 116], strides = [1, 1, 1]} : vector<4x8x128xf32> to vector<4x8x116xf32>
    %212 = tpu.concatenate %211, %6 in 2 : vector<4x8x116xf32>, vector<4x8x12xf32> -> vector<4x8x128xf32>
    %c0_72 = arith.constant 0 : index
    %c23 = arith.constant 23 : index
    %c0_73 = arith.constant 0 : index
    %c0_74 = arith.constant 0 : index
    %213 = vector.load %arg2[%c0_72, %c23, %c0_73, %c0_74] : memref<2x24x8x128xf32, #tpu.memory_space<vmem>>, vector<1x1x8x128xf32>
    %214 = vector.shape_cast %213 : vector<1x1x8x128xf32> to vector<8x128xf32>
    %215 = vector.shape_cast %214 : vector<8x128xf32> to vector<1x8x128xf32>
    %216 = vector.broadcast %215 : vector<1x8x128xf32> to vector<4x8x128xf32>
    %217 = arith.mulf %216, %212 : vector<4x8x128xf32>
    %218 = arith.addf %210, %217 : vector<4x8x128xf32>
    %c0_75 = arith.constant 0 : index
    %c0_76 = arith.constant 0 : index
    %c0_77 = arith.constant 0 : index
    %219 = vector.load %arg3[%c0_75, %c0_76, %c0_77] : memref<2x8x128xf32, #tpu.memory_space<vmem>>, vector<1x8x128xf32>
    %220 = vector.shape_cast %219 : vector<1x8x128xf32> to vector<8x128xf32>
    %221 = vector.shape_cast %220 : vector<8x128xf32> to vector<1x8x128xf32>
    %222 = vector.broadcast %221 : vector<1x8x128xf32> to vector<4x8x128xf32>
    %223 = arith.addf %218, %222 : vector<4x8x128xf32>
    %cst_78 = arith.constant 0.000000e+00 : f32
    %224 = vector.broadcast %cst_78 : f32 to vector<4x8x128xf32>
    %225 = arith.cmpf ogt, %223, %224 : vector<4x8x128xf32>
    %cst_79 = arith.constant 0.000000e+00 : f32
    %226 = vector.broadcast %cst_79 : f32 to vector<4x8x128xf32>
    %227 = arith.minimumf %223, %226 : vector<4x8x128xf32>
    %228 = math.exp %227 : vector<4x8x128xf32>
    %cst_80 = arith.constant 1.000000e+00 : f32
    %229 = vector.broadcast %cst_80 : f32 to vector<4x8x128xf32>
    %230 = arith.subf %228, %229 : vector<4x8x128xf32>
    %231 = arith.select %225, %223, %230 : vector<4x8x128xi1>, vector<4x8x128xf32>
    %232 = arith.addf %231, %0 : vector<4x8x128xf32>
    %c0_81 = arith.constant 0 : index
    %c0_82 = arith.constant 0 : index
    %c0_83 = arith.constant 0 : index
    %233 = vector.load %arg4[%c0_81, %c0_82, %c0_83] : memref<2x8x8xf32, #tpu.memory_space<vmem>>, vector<1x8x8xf32>
    %234 = vector.shape_cast %233 : vector<1x8x8xf32> to vector<8x8xf32>
    %235 = vector.extract_strided_slice %232 {offsets = [0, 0, 0], sizes = [1, 8, 128], strides = [1, 1, 1]} : vector<4x8x128xf32> to vector<1x8x128xf32>
    %236 = vector.shape_cast %235 : vector<1x8x128xf32> to vector<8x128xf32>
    %cst_84 = arith.constant dense<0.000000e+00> : vector<8x128xf32>
    %237 = tpu.matmul %234, %236, %cst_84 {dimension_numbers = #tpu.dot_dimension_numbers<[1], [0], [0], [1], [0, 0, 1, 1], [], []>} : vector<8x8xf32>, vector<8x128xf32>, vector<8x128xf32> -> vector<8x128xf32>
    %238 = vector.extract_strided_slice %232 {offsets = [1, 0, 0], sizes = [1, 8, 128], strides = [1, 1, 1]} : vector<4x8x128xf32> to vector<1x8x128xf32>
    %239 = vector.shape_cast %238 : vector<1x8x128xf32> to vector<8x128xf32>
    %cst_85 = arith.constant dense<0.000000e+00> : vector<8x128xf32>
    %240 = tpu.matmul %234, %239, %cst_85 {dimension_numbers = #tpu.dot_dimension_numbers<[1], [0], [0], [1], [0, 0, 1, 1], [], []>} : vector<8x8xf32>, vector<8x128xf32>, vector<8x128xf32> -> vector<8x128xf32>
    %241 = vector.extract_strided_slice %232 {offsets = [2, 0, 0], sizes = [1, 8, 128], strides = [1, 1, 1]} : vector<4x8x128xf32> to vector<1x8x128xf32>
    %242 = vector.shape_cast %241 : vector<1x8x128xf32> to vector<8x128xf32>
    %cst_86 = arith.constant dense<0.000000e+00> : vector<8x128xf32>
    %243 = tpu.matmul %234, %242, %cst_86 {dimension_numbers = #tpu.dot_dimension_numbers<[1], [0], [0], [1], [0, 0, 1, 1], [], []>} : vector<8x8xf32>, vector<8x128xf32>, vector<8x128xf32> -> vector<8x128xf32>
    %244 = vector.extract_strided_slice %232 {offsets = [3, 0, 0], sizes = [1, 8, 128], strides = [1, 1, 1]} : vector<4x8x128xf32> to vector<1x8x128xf32>
    %245 = vector.shape_cast %244 : vector<1x8x128xf32> to vector<8x128xf32>
    %cst_87 = arith.constant dense<0.000000e+00> : vector<8x128xf32>
    %246 = tpu.matmul %234, %245, %cst_87 {dimension_numbers = #tpu.dot_dimension_numbers<[1], [0], [0], [1], [0, 0, 1, 1], [], []>} : vector<8x8xf32>, vector<8x128xf32>, vector<8x128xf32> -> vector<8x128xf32>
    %247 = vector.shape_cast %237 : vector<8x128xf32> to vector<1x8x128xf32>
    %248 = vector.shape_cast %240 : vector<8x128xf32> to vector<1x8x128xf32>
    %249 = vector.shape_cast %243 : vector<8x128xf32> to vector<1x8x128xf32>
    %250 = vector.shape_cast %246 : vector<8x128xf32> to vector<1x8x128xf32>
    %251 = tpu.concatenate %247, %248, %249, %250 in 0 : vector<1x8x128xf32>, vector<1x8x128xf32>, vector<1x8x128xf32>, vector<1x8x128xf32> -> vector<4x8x128xf32>
    %c0_88 = arith.constant 0 : index
    %c0_89 = arith.constant 0 : index
    %c0_90 = arith.constant 0 : index
    %252 = vector.load %arg5[%c0_88, %c0_89, %c0_90] : memref<2x8x128xf32, #tpu.memory_space<vmem>>, vector<1x8x128xf32>
    %253 = vector.shape_cast %252 : vector<1x8x128xf32> to vector<8x128xf32>
    %254 = vector.shape_cast %253 : vector<8x128xf32> to vector<1x8x128xf32>
    %255 = vector.broadcast %254 : vector<1x8x128xf32> to vector<4x8x128xf32>
    %256 = arith.addf %251, %255 : vector<4x8x128xf32>
    %cst_91 = arith.constant 0.000000e+00 : f32
    %257 = vector.broadcast %cst_91 : f32 to vector<4x8x128xf32>
    %258 = arith.cmpf ogt, %256, %257 : vector<4x8x128xf32>
    %cst_92 = arith.constant 0.000000e+00 : f32
    %259 = vector.broadcast %cst_92 : f32 to vector<4x8x128xf32>
    %260 = arith.minimumf %256, %259 : vector<4x8x128xf32>
    %261 = math.exp %260 : vector<4x8x128xf32>
    %cst_93 = arith.constant 1.000000e+00 : f32
    %262 = vector.broadcast %cst_93 : f32 to vector<4x8x128xf32>
    %263 = arith.subf %261, %262 : vector<4x8x128xf32>
    %264 = arith.select %258, %256, %263 : vector<4x8x128xi1>, vector<4x8x128xf32>
    %265 = vector.extract_strided_slice %264 {offsets = [0, 0, 0], sizes = [4, 8, 1], strides = [1, 1, 1]} : vector<4x8x128xf32> to vector<4x8x1xf32>
    %266 = vector.shape_cast %265 : vector<4x8x1xf32> to vector<4x8x1xf32>
    %267 = vector.broadcast %266 : vector<4x8x1xf32> to vector<4x8x11xf32>
    %268 = vector.extract_strided_slice %264 {offsets = [0, 0, 127], sizes = [4, 8, 1], strides = [1, 1, 1]} : vector<4x8x128xf32> to vector<4x8x1xf32>
    %269 = vector.shape_cast %268 : vector<4x8x1xf32> to vector<4x8x1xf32>
    %270 = vector.broadcast %269 : vector<4x8x1xf32> to vector<4x8x12xf32>
    %cst_94 = arith.constant 0.000000e+00 : f32
    %271 = vector.broadcast %cst_94 : f32 to vector<4x8x128xf32>
    %272 = vector.extract_strided_slice %264 {offsets = [0, 0, 0], sizes = [4, 8, 117], strides = [1, 1, 1]} : vector<4x8x128xf32> to vector<4x8x117xf32>
    %273 = tpu.concatenate %267, %272 in 2 : vector<4x8x11xf32>, vector<4x8x117xf32> -> vector<4x8x128xf32>
    %c1_95 = arith.constant 1 : index
    %c0_96 = arith.constant 0 : index
    %c0_97 = arith.constant 0 : index
    %c0_98 = arith.constant 0 : index
    %274 = vector.load %arg2[%c1_95, %c0_96, %c0_97, %c0_98] : memref<2x24x8x128xf32, #tpu.memory_space<vmem>>, vector<1x1x8x128xf32>
    %275 = vector.shape_cast %274 : vector<1x1x8x128xf32> to vector<8x128xf32>
    %276 = vector.shape_cast %275 : vector<8x128xf32> to vector<1x8x128xf32>
    %277 = vector.broadcast %276 : vector<1x8x128xf32> to vector<4x8x128xf32>
    %278 = arith.mulf %277, %273 : vector<4x8x128xf32>
    %279 = arith.addf %271, %278 : vector<4x8x128xf32>
    %280 = vector.extract_strided_slice %267 {offsets = [0, 0, 0], sizes = [4, 8, 10], strides = [1, 1, 1]} : vector<4x8x11xf32> to vector<4x8x10xf32>
    %281 = vector.extract_strided_slice %264 {offsets = [0, 0, 0], sizes = [4, 8, 118], strides = [1, 1, 1]} : vector<4x8x128xf32> to vector<4x8x118xf32>
    %282 = tpu.concatenate %280, %281 in 2 : vector<4x8x10xf32>, vector<4x8x118xf32> -> vector<4x8x128xf32>
    %c1_99 = arith.constant 1 : index
    %c1_100 = arith.constant 1 : index
    %c0_101 = arith.constant 0 : index
    %c0_102 = arith.constant 0 : index
    %283 = vector.load %arg2[%c1_99, %c1_100, %c0_101, %c0_102] : memref<2x24x8x128xf32, #tpu.memory_space<vmem>>, vector<1x1x8x128xf32>
    %284 = vector.shape_cast %283 : vector<1x1x8x128xf32> to vector<8x128xf32>
    %285 = vector.shape_cast %284 : vector<8x128xf32> to vector<1x8x128xf32>
    %286 = vector.broadcast %285 : vector<1x8x128xf32> to vector<4x8x128xf32>
    %287 = arith.mulf %286, %282 : vector<4x8x128xf32>
    %288 = arith.addf %279, %287 : vector<4x8x128xf32>
    %289 = vector.extract_strided_slice %267 {offsets = [0, 0, 0], sizes = [4, 8, 9], strides = [1, 1, 1]} : vector<4x8x11xf32> to vector<4x8x9xf32>
    %290 = vector.extract_strided_slice %264 {offsets = [0, 0, 0], sizes = [4, 8, 119], strides = [1, 1, 1]} : vector<4x8x128xf32> to vector<4x8x119xf32>
    %291 = tpu.concatenate %289, %290 in 2 : vector<4x8x9xf32>, vector<4x8x119xf32> -> vector<4x8x128xf32>
    %c1_103 = arith.constant 1 : index
    %c2_104 = arith.constant 2 : index
    %c0_105 = arith.constant 0 : index
    %c0_106 = arith.constant 0 : index
    %292 = vector.load %arg2[%c1_103, %c2_104, %c0_105, %c0_106] : memref<2x24x8x128xf32, #tpu.memory_space<vmem>>, vector<1x1x8x128xf32>
    %293 = vector.shape_cast %292 : vector<1x1x8x128xf32> to vector<8x128xf32>
    %294 = vector.shape_cast %293 : vector<8x128xf32> to vector<1x8x128xf32>
    %295 = vector.broadcast %294 : vector<1x8x128xf32> to vector<4x8x128xf32>
    %296 = arith.mulf %295, %291 : vector<4x8x128xf32>
    %297 = arith.addf %288, %296 : vector<4x8x128xf32>
    %298 = vector.extract_strided_slice %267 {offsets = [0, 0, 0], sizes = [4, 8, 8], strides = [1, 1, 1]} : vector<4x8x11xf32> to vector<4x8x8xf32>
    %299 = vector.extract_strided_slice %264 {offsets = [0, 0, 0], sizes = [4, 8, 120], strides = [1, 1, 1]} : vector<4x8x128xf32> to vector<4x8x120xf32>
    %300 = tpu.concatenate %298, %299 in 2 : vector<4x8x8xf32>, vector<4x8x120xf32> -> vector<4x8x128xf32>
    %c1_107 = arith.constant 1 : index
    %c3_108 = arith.constant 3 : index
    %c0_109 = arith.constant 0 : index
    %c0_110 = arith.constant 0 : index
    %301 = vector.load %arg2[%c1_107, %c3_108, %c0_109, %c0_110] : memref<2x24x8x128xf32, #tpu.memory_space<vmem>>, vector<1x1x8x128xf32>
    %302 = vector.shape_cast %301 : vector<1x1x8x128xf32> to vector<8x128xf32>
    %303 = vector.shape_cast %302 : vector<8x128xf32> to vector<1x8x128xf32>
    %304 = vector.broadcast %303 : vector<1x8x128xf32> to vector<4x8x128xf32>
    %305 = arith.mulf %304, %300 : vector<4x8x128xf32>
    %306 = arith.addf %297, %305 : vector<4x8x128xf32>
    %307 = vector.extract_strided_slice %267 {offsets = [0, 0, 0], sizes = [4, 8, 7], strides = [1, 1, 1]} : vector<4x8x11xf32> to vector<4x8x7xf32>
    %308 = vector.extract_strided_slice %264 {offsets = [0, 0, 0], sizes = [4, 8, 121], strides = [1, 1, 1]} : vector<4x8x128xf32> to vector<4x8x121xf32>
    %309 = tpu.concatenate %307, %308 in 2 : vector<4x8x7xf32>, vector<4x8x121xf32> -> vector<4x8x128xf32>
    %c1_111 = arith.constant 1 : index
    %c4_112 = arith.constant 4 : index
    %c0_113 = arith.constant 0 : index
    %c0_114 = arith.constant 0 : index
    %310 = vector.load %arg2[%c1_111, %c4_112, %c0_113, %c0_114] : memref<2x24x8x128xf32, #tpu.memory_space<vmem>>, vector<1x1x8x128xf32>
    %311 = vector.shape_cast %310 : vector<1x1x8x128xf32> to vector<8x128xf32>
    %312 = vector.shape_cast %311 : vector<8x128xf32> to vector<1x8x128xf32>
    %313 = vector.broadcast %312 : vector<1x8x128xf32> to vector<4x8x128xf32>
    %314 = arith.mulf %313, %309 : vector<4x8x128xf32>
    %315 = arith.addf %306, %314 : vector<4x8x128xf32>
    %316 = vector.extract_strided_slice %267 {offsets = [0, 0, 0], sizes = [4, 8, 6], strides = [1, 1, 1]} : vector<4x8x11xf32> to vector<4x8x6xf32>
    %317 = vector.extract_strided_slice %264 {offsets = [0, 0, 0], sizes = [4, 8, 122], strides = [1, 1, 1]} : vector<4x8x128xf32> to vector<4x8x122xf32>
    %318 = tpu.concatenate %316, %317 in 2 : vector<4x8x6xf32>, vector<4x8x122xf32> -> vector<4x8x128xf32>
    %c1_115 = arith.constant 1 : index
    %c5_116 = arith.constant 5 : index
    %c0_117 = arith.constant 0 : index
    %c0_118 = arith.constant 0 : index
    %319 = vector.load %arg2[%c1_115, %c5_116, %c0_117, %c0_118] : memref<2x24x8x128xf32, #tpu.memory_space<vmem>>, vector<1x1x8x128xf32>
    %320 = vector.shape_cast %319 : vector<1x1x8x128xf32> to vector<8x128xf32>
    %321 = vector.shape_cast %320 : vector<8x128xf32> to vector<1x8x128xf32>
    %322 = vector.broadcast %321 : vector<1x8x128xf32> to vector<4x8x128xf32>
    %323 = arith.mulf %322, %318 : vector<4x8x128xf32>
    %324 = arith.addf %315, %323 : vector<4x8x128xf32>
    %325 = vector.extract_strided_slice %267 {offsets = [0, 0, 0], sizes = [4, 8, 5], strides = [1, 1, 1]} : vector<4x8x11xf32> to vector<4x8x5xf32>
    %326 = vector.extract_strided_slice %264 {offsets = [0, 0, 0], sizes = [4, 8, 123], strides = [1, 1, 1]} : vector<4x8x128xf32> to vector<4x8x123xf32>
    %327 = tpu.concatenate %325, %326 in 2 : vector<4x8x5xf32>, vector<4x8x123xf32> -> vector<4x8x128xf32>
    %c1_119 = arith.constant 1 : index
    %c6_120 = arith.constant 6 : index
    %c0_121 = arith.constant 0 : index
    %c0_122 = arith.constant 0 : index
    %328 = vector.load %arg2[%c1_119, %c6_120, %c0_121, %c0_122] : memref<2x24x8x128xf32, #tpu.memory_space<vmem>>, vector<1x1x8x128xf32>
    %329 = vector.shape_cast %328 : vector<1x1x8x128xf32> to vector<8x128xf32>
    %330 = vector.shape_cast %329 : vector<8x128xf32> to vector<1x8x128xf32>
    %331 = vector.broadcast %330 : vector<1x8x128xf32> to vector<4x8x128xf32>
    %332 = arith.mulf %331, %327 : vector<4x8x128xf32>
    %333 = arith.addf %324, %332 : vector<4x8x128xf32>
    %334 = vector.extract_strided_slice %267 {offsets = [0, 0, 0], sizes = [4, 8, 4], strides = [1, 1, 1]} : vector<4x8x11xf32> to vector<4x8x4xf32>
    %335 = vector.extract_strided_slice %264 {offsets = [0, 0, 0], sizes = [4, 8, 124], strides = [1, 1, 1]} : vector<4x8x128xf32> to vector<4x8x124xf32>
    %336 = tpu.concatenate %334, %335 in 2 : vector<4x8x4xf32>, vector<4x8x124xf32> -> vector<4x8x128xf32>
    %c1_123 = arith.constant 1 : index
    %c7_124 = arith.constant 7 : index
    %c0_125 = arith.constant 0 : index
    %c0_126 = arith.constant 0 : index
    %337 = vector.load %arg2[%c1_123, %c7_124, %c0_125, %c0_126] : memref<2x24x8x128xf32, #tpu.memory_space<vmem>>, vector<1x1x8x128xf32>
    %338 = vector.shape_cast %337 : vector<1x1x8x128xf32> to vector<8x128xf32>
    %339 = vector.shape_cast %338 : vector<8x128xf32> to vector<1x8x128xf32>
    %340 = vector.broadcast %339 : vector<1x8x128xf32> to vector<4x8x128xf32>
    %341 = arith.mulf %340, %336 : vector<4x8x128xf32>
    %342 = arith.addf %333, %341 : vector<4x8x128xf32>
    %343 = vector.extract_strided_slice %267 {offsets = [0, 0, 0], sizes = [4, 8, 3], strides = [1, 1, 1]} : vector<4x8x11xf32> to vector<4x8x3xf32>
    %344 = vector.extract_strided_slice %264 {offsets = [0, 0, 0], sizes = [4, 8, 125], strides = [1, 1, 1]} : vector<4x8x128xf32> to vector<4x8x125xf32>
    %345 = tpu.concatenate %343, %344 in 2 : vector<4x8x3xf32>, vector<4x8x125xf32> -> vector<4x8x128xf32>
    %c1_127 = arith.constant 1 : index
    %c8_128 = arith.constant 8 : index
    %c0_129 = arith.constant 0 : index
    %c0_130 = arith.constant 0 : index
    %346 = vector.load %arg2[%c1_127, %c8_128, %c0_129, %c0_130] : memref<2x24x8x128xf32, #tpu.memory_space<vmem>>, vector<1x1x8x128xf32>
    %347 = vector.shape_cast %346 : vector<1x1x8x128xf32> to vector<8x128xf32>
    %348 = vector.shape_cast %347 : vector<8x128xf32> to vector<1x8x128xf32>
    %349 = vector.broadcast %348 : vector<1x8x128xf32> to vector<4x8x128xf32>
    %350 = arith.mulf %349, %345 : vector<4x8x128xf32>
    %351 = arith.addf %342, %350 : vector<4x8x128xf32>
    %352 = vector.extract_strided_slice %267 {offsets = [0, 0, 0], sizes = [4, 8, 2], strides = [1, 1, 1]} : vector<4x8x11xf32> to vector<4x8x2xf32>
    %353 = vector.extract_strided_slice %264 {offsets = [0, 0, 0], sizes = [4, 8, 126], strides = [1, 1, 1]} : vector<4x8x128xf32> to vector<4x8x126xf32>
    %354 = tpu.concatenate %352, %353 in 2 : vector<4x8x2xf32>, vector<4x8x126xf32> -> vector<4x8x128xf32>
    %c1_131 = arith.constant 1 : index
    %c9_132 = arith.constant 9 : index
    %c0_133 = arith.constant 0 : index
    %c0_134 = arith.constant 0 : index
    %355 = vector.load %arg2[%c1_131, %c9_132, %c0_133, %c0_134] : memref<2x24x8x128xf32, #tpu.memory_space<vmem>>, vector<1x1x8x128xf32>
    %356 = vector.shape_cast %355 : vector<1x1x8x128xf32> to vector<8x128xf32>
    %357 = vector.shape_cast %356 : vector<8x128xf32> to vector<1x8x128xf32>
    %358 = vector.broadcast %357 : vector<1x8x128xf32> to vector<4x8x128xf32>
    %359 = arith.mulf %358, %354 : vector<4x8x128xf32>
    %360 = arith.addf %351, %359 : vector<4x8x128xf32>
    %361 = vector.extract_strided_slice %267 {offsets = [0, 0, 0], sizes = [4, 8, 1], strides = [1, 1, 1]} : vector<4x8x11xf32> to vector<4x8x1xf32>
    %362 = vector.extract_strided_slice %264 {offsets = [0, 0, 0], sizes = [4, 8, 127], strides = [1, 1, 1]} : vector<4x8x128xf32> to vector<4x8x127xf32>
    %363 = tpu.concatenate %361, %362 in 2 : vector<4x8x1xf32>, vector<4x8x127xf32> -> vector<4x8x128xf32>
    %c1_135 = arith.constant 1 : index
    %c10_136 = arith.constant 10 : index
    %c0_137 = arith.constant 0 : index
    %c0_138 = arith.constant 0 : index
    %364 = vector.load %arg2[%c1_135, %c10_136, %c0_137, %c0_138] : memref<2x24x8x128xf32, #tpu.memory_space<vmem>>, vector<1x1x8x128xf32>
    %365 = vector.shape_cast %364 : vector<1x1x8x128xf32> to vector<8x128xf32>
    %366 = vector.shape_cast %365 : vector<8x128xf32> to vector<1x8x128xf32>
    %367 = vector.broadcast %366 : vector<1x8x128xf32> to vector<4x8x128xf32>
    %368 = arith.mulf %367, %363 : vector<4x8x128xf32>
    %369 = arith.addf %360, %368 : vector<4x8x128xf32>
    %c1_139 = arith.constant 1 : index
    %c11_140 = arith.constant 11 : index
    %c0_141 = arith.constant 0 : index
    %c0_142 = arith.constant 0 : index
    %370 = vector.load %arg2[%c1_139, %c11_140, %c0_141, %c0_142] : memref<2x24x8x128xf32, #tpu.memory_space<vmem>>, vector<1x1x8x128xf32>
    %371 = vector.shape_cast %370 : vector<1x1x8x128xf32> to vector<8x128xf32>
    %372 = vector.shape_cast %371 : vector<8x128xf32> to vector<1x8x128xf32>
    %373 = vector.broadcast %372 : vector<1x8x128xf32> to vector<4x8x128xf32>
    %374 = arith.mulf %373, %264 : vector<4x8x128xf32>
    %375 = arith.addf %369, %374 : vector<4x8x128xf32>
    %376 = vector.extract_strided_slice %264 {offsets = [0, 0, 1], sizes = [4, 8, 127], strides = [1, 1, 1]} : vector<4x8x128xf32> to vector<4x8x127xf32>
    %377 = vector.extract_strided_slice %270 {offsets = [0, 0, 0], sizes = [4, 8, 1], strides = [1, 1, 1]} : vector<4x8x12xf32> to vector<4x8x1xf32>
    %378 = tpu.concatenate %376, %377 in 2 : vector<4x8x127xf32>, vector<4x8x1xf32> -> vector<4x8x128xf32>
    %c1_143 = arith.constant 1 : index
    %c12_144 = arith.constant 12 : index
    %c0_145 = arith.constant 0 : index
    %c0_146 = arith.constant 0 : index
    %379 = vector.load %arg2[%c1_143, %c12_144, %c0_145, %c0_146] : memref<2x24x8x128xf32, #tpu.memory_space<vmem>>, vector<1x1x8x128xf32>
    %380 = vector.shape_cast %379 : vector<1x1x8x128xf32> to vector<8x128xf32>
    %381 = vector.shape_cast %380 : vector<8x128xf32> to vector<1x8x128xf32>
    %382 = vector.broadcast %381 : vector<1x8x128xf32> to vector<4x8x128xf32>
    %383 = arith.mulf %382, %378 : vector<4x8x128xf32>
    %384 = arith.addf %375, %383 : vector<4x8x128xf32>
    %385 = vector.extract_strided_slice %264 {offsets = [0, 0, 2], sizes = [4, 8, 126], strides = [1, 1, 1]} : vector<4x8x128xf32> to vector<4x8x126xf32>
    %386 = vector.extract_strided_slice %270 {offsets = [0, 0, 0], sizes = [4, 8, 2], strides = [1, 1, 1]} : vector<4x8x12xf32> to vector<4x8x2xf32>
    %387 = tpu.concatenate %385, %386 in 2 : vector<4x8x126xf32>, vector<4x8x2xf32> -> vector<4x8x128xf32>
    %c1_147 = arith.constant 1 : index
    %c13_148 = arith.constant 13 : index
    %c0_149 = arith.constant 0 : index
    %c0_150 = arith.constant 0 : index
    %388 = vector.load %arg2[%c1_147, %c13_148, %c0_149, %c0_150] : memref<2x24x8x128xf32, #tpu.memory_space<vmem>>, vector<1x1x8x128xf32>
    %389 = vector.shape_cast %388 : vector<1x1x8x128xf32> to vector<8x128xf32>
    %390 = vector.shape_cast %389 : vector<8x128xf32> to vector<1x8x128xf32>
    %391 = vector.broadcast %390 : vector<1x8x128xf32> to vector<4x8x128xf32>
    %392 = arith.mulf %391, %387 : vector<4x8x128xf32>
    %393 = arith.addf %384, %392 : vector<4x8x128xf32>
    %394 = vector.extract_strided_slice %264 {offsets = [0, 0, 3], sizes = [4, 8, 125], strides = [1, 1, 1]} : vector<4x8x128xf32> to vector<4x8x125xf32>
    %395 = vector.extract_strided_slice %270 {offsets = [0, 0, 0], sizes = [4, 8, 3], strides = [1, 1, 1]} : vector<4x8x12xf32> to vector<4x8x3xf32>
    %396 = tpu.concatenate %394, %395 in 2 : vector<4x8x125xf32>, vector<4x8x3xf32> -> vector<4x8x128xf32>
    %c1_151 = arith.constant 1 : index
    %c14_152 = arith.constant 14 : index
    %c0_153 = arith.constant 0 : index
    %c0_154 = arith.constant 0 : index
    %397 = vector.load %arg2[%c1_151, %c14_152, %c0_153, %c0_154] : memref<2x24x8x128xf32, #tpu.memory_space<vmem>>, vector<1x1x8x128xf32>
    %398 = vector.shape_cast %397 : vector<1x1x8x128xf32> to vector<8x128xf32>
    %399 = vector.shape_cast %398 : vector<8x128xf32> to vector<1x8x128xf32>
    %400 = vector.broadcast %399 : vector<1x8x128xf32> to vector<4x8x128xf32>
    %401 = arith.mulf %400, %396 : vector<4x8x128xf32>
    %402 = arith.addf %393, %401 : vector<4x8x128xf32>
    %403 = vector.extract_strided_slice %264 {offsets = [0, 0, 4], sizes = [4, 8, 124], strides = [1, 1, 1]} : vector<4x8x128xf32> to vector<4x8x124xf32>
    %404 = vector.extract_strided_slice %270 {offsets = [0, 0, 0], sizes = [4, 8, 4], strides = [1, 1, 1]} : vector<4x8x12xf32> to vector<4x8x4xf32>
    %405 = tpu.concatenate %403, %404 in 2 : vector<4x8x124xf32>, vector<4x8x4xf32> -> vector<4x8x128xf32>
    %c1_155 = arith.constant 1 : index
    %c15_156 = arith.constant 15 : index
    %c0_157 = arith.constant 0 : index
    %c0_158 = arith.constant 0 : index
    %406 = vector.load %arg2[%c1_155, %c15_156, %c0_157, %c0_158] : memref<2x24x8x128xf32, #tpu.memory_space<vmem>>, vector<1x1x8x128xf32>
    %407 = vector.shape_cast %406 : vector<1x1x8x128xf32> to vector<8x128xf32>
    %408 = vector.shape_cast %407 : vector<8x128xf32> to vector<1x8x128xf32>
    %409 = vector.broadcast %408 : vector<1x8x128xf32> to vector<4x8x128xf32>
    %410 = arith.mulf %409, %405 : vector<4x8x128xf32>
    %411 = arith.addf %402, %410 : vector<4x8x128xf32>
    %412 = vector.extract_strided_slice %264 {offsets = [0, 0, 5], sizes = [4, 8, 123], strides = [1, 1, 1]} : vector<4x8x128xf32> to vector<4x8x123xf32>
    %413 = vector.extract_strided_slice %270 {offsets = [0, 0, 0], sizes = [4, 8, 5], strides = [1, 1, 1]} : vector<4x8x12xf32> to vector<4x8x5xf32>
    %414 = tpu.concatenate %412, %413 in 2 : vector<4x8x123xf32>, vector<4x8x5xf32> -> vector<4x8x128xf32>
    %c1_159 = arith.constant 1 : index
    %c16_160 = arith.constant 16 : index
    %c0_161 = arith.constant 0 : index
    %c0_162 = arith.constant 0 : index
    %415 = vector.load %arg2[%c1_159, %c16_160, %c0_161, %c0_162] : memref<2x24x8x128xf32, #tpu.memory_space<vmem>>, vector<1x1x8x128xf32>
    %416 = vector.shape_cast %415 : vector<1x1x8x128xf32> to vector<8x128xf32>
    %417 = vector.shape_cast %416 : vector<8x128xf32> to vector<1x8x128xf32>
    %418 = vector.broadcast %417 : vector<1x8x128xf32> to vector<4x8x128xf32>
    %419 = arith.mulf %418, %414 : vector<4x8x128xf32>
    %420 = arith.addf %411, %419 : vector<4x8x128xf32>
    %421 = vector.extract_strided_slice %264 {offsets = [0, 0, 6], sizes = [4, 8, 122], strides = [1, 1, 1]} : vector<4x8x128xf32> to vector<4x8x122xf32>
    %422 = vector.extract_strided_slice %270 {offsets = [0, 0, 0], sizes = [4, 8, 6], strides = [1, 1, 1]} : vector<4x8x12xf32> to vector<4x8x6xf32>
    %423 = tpu.concatenate %421, %422 in 2 : vector<4x8x122xf32>, vector<4x8x6xf32> -> vector<4x8x128xf32>
    %c1_163 = arith.constant 1 : index
    %c17_164 = arith.constant 17 : index
    %c0_165 = arith.constant 0 : index
    %c0_166 = arith.constant 0 : index
    %424 = vector.load %arg2[%c1_163, %c17_164, %c0_165, %c0_166] : memref<2x24x8x128xf32, #tpu.memory_space<vmem>>, vector<1x1x8x128xf32>
    %425 = vector.shape_cast %424 : vector<1x1x8x128xf32> to vector<8x128xf32>
    %426 = vector.shape_cast %425 : vector<8x128xf32> to vector<1x8x128xf32>
    %427 = vector.broadcast %426 : vector<1x8x128xf32> to vector<4x8x128xf32>
    %428 = arith.mulf %427, %423 : vector<4x8x128xf32>
    %429 = arith.addf %420, %428 : vector<4x8x128xf32>
    %430 = vector.extract_strided_slice %264 {offsets = [0, 0, 7], sizes = [4, 8, 121], strides = [1, 1, 1]} : vector<4x8x128xf32> to vector<4x8x121xf32>
    %431 = vector.extract_strided_slice %270 {offsets = [0, 0, 0], sizes = [4, 8, 7], strides = [1, 1, 1]} : vector<4x8x12xf32> to vector<4x8x7xf32>
    %432 = tpu.concatenate %430, %431 in 2 : vector<4x8x121xf32>, vector<4x8x7xf32> -> vector<4x8x128xf32>
    %c1_167 = arith.constant 1 : index
    %c18_168 = arith.constant 18 : index
    %c0_169 = arith.constant 0 : index
    %c0_170 = arith.constant 0 : index
    %433 = vector.load %arg2[%c1_167, %c18_168, %c0_169, %c0_170] : memref<2x24x8x128xf32, #tpu.memory_space<vmem>>, vector<1x1x8x128xf32>
    %434 = vector.shape_cast %433 : vector<1x1x8x128xf32> to vector<8x128xf32>
    %435 = vector.shape_cast %434 : vector<8x128xf32> to vector<1x8x128xf32>
    %436 = vector.broadcast %435 : vector<1x8x128xf32> to vector<4x8x128xf32>
    %437 = arith.mulf %436, %432 : vector<4x8x128xf32>
    %438 = arith.addf %429, %437 : vector<4x8x128xf32>
    %439 = vector.extract_strided_slice %264 {offsets = [0, 0, 8], sizes = [4, 8, 120], strides = [1, 1, 1]} : vector<4x8x128xf32> to vector<4x8x120xf32>
    %440 = vector.extract_strided_slice %270 {offsets = [0, 0, 0], sizes = [4, 8, 8], strides = [1, 1, 1]} : vector<4x8x12xf32> to vector<4x8x8xf32>
    %441 = tpu.concatenate %439, %440 in 2 : vector<4x8x120xf32>, vector<4x8x8xf32> -> vector<4x8x128xf32>
    %c1_171 = arith.constant 1 : index
    %c19_172 = arith.constant 19 : index
    %c0_173 = arith.constant 0 : index
    %c0_174 = arith.constant 0 : index
    %442 = vector.load %arg2[%c1_171, %c19_172, %c0_173, %c0_174] : memref<2x24x8x128xf32, #tpu.memory_space<vmem>>, vector<1x1x8x128xf32>
    %443 = vector.shape_cast %442 : vector<1x1x8x128xf32> to vector<8x128xf32>
    %444 = vector.shape_cast %443 : vector<8x128xf32> to vector<1x8x128xf32>
    %445 = vector.broadcast %444 : vector<1x8x128xf32> to vector<4x8x128xf32>
    %446 = arith.mulf %445, %441 : vector<4x8x128xf32>
    %447 = arith.addf %438, %446 : vector<4x8x128xf32>
    %448 = vector.extract_strided_slice %264 {offsets = [0, 0, 9], sizes = [4, 8, 119], strides = [1, 1, 1]} : vector<4x8x128xf32> to vector<4x8x119xf32>
    %449 = vector.extract_strided_slice %270 {offsets = [0, 0, 0], sizes = [4, 8, 9], strides = [1, 1, 1]} : vector<4x8x12xf32> to vector<4x8x9xf32>
    %450 = tpu.concatenate %448, %449 in 2 : vector<4x8x119xf32>, vector<4x8x9xf32> -> vector<4x8x128xf32>
    %c1_175 = arith.constant 1 : index
    %c20_176 = arith.constant 20 : index
    %c0_177 = arith.constant 0 : index
    %c0_178 = arith.constant 0 : index
    %451 = vector.load %arg2[%c1_175, %c20_176, %c0_177, %c0_178] : memref<2x24x8x128xf32, #tpu.memory_space<vmem>>, vector<1x1x8x128xf32>
    %452 = vector.shape_cast %451 : vector<1x1x8x128xf32> to vector<8x128xf32>
    %453 = vector.shape_cast %452 : vector<8x128xf32> to vector<1x8x128xf32>
    %454 = vector.broadcast %453 : vector<1x8x128xf32> to vector<4x8x128xf32>
    %455 = arith.mulf %454, %450 : vector<4x8x128xf32>
    %456 = arith.addf %447, %455 : vector<4x8x128xf32>
    %457 = vector.extract_strided_slice %264 {offsets = [0, 0, 10], sizes = [4, 8, 118], strides = [1, 1, 1]} : vector<4x8x128xf32> to vector<4x8x118xf32>
    %458 = vector.extract_strided_slice %270 {offsets = [0, 0, 0], sizes = [4, 8, 10], strides = [1, 1, 1]} : vector<4x8x12xf32> to vector<4x8x10xf32>
    %459 = tpu.concatenate %457, %458 in 2 : vector<4x8x118xf32>, vector<4x8x10xf32> -> vector<4x8x128xf32>
    %c1_179 = arith.constant 1 : index
    %c21_180 = arith.constant 21 : index
    %c0_181 = arith.constant 0 : index
    %c0_182 = arith.constant 0 : index
    %460 = vector.load %arg2[%c1_179, %c21_180, %c0_181, %c0_182] : memref<2x24x8x128xf32, #tpu.memory_space<vmem>>, vector<1x1x8x128xf32>
    %461 = vector.shape_cast %460 : vector<1x1x8x128xf32> to vector<8x128xf32>
    %462 = vector.shape_cast %461 : vector<8x128xf32> to vector<1x8x128xf32>
    %463 = vector.broadcast %462 : vector<1x8x128xf32> to vector<4x8x128xf32>
    %464 = arith.mulf %463, %459 : vector<4x8x128xf32>
    %465 = arith.addf %456, %464 : vector<4x8x128xf32>
    %466 = vector.extract_strided_slice %264 {offsets = [0, 0, 11], sizes = [4, 8, 117], strides = [1, 1, 1]} : vector<4x8x128xf32> to vector<4x8x117xf32>
    %467 = vector.extract_strided_slice %270 {offsets = [0, 0, 0], sizes = [4, 8, 11], strides = [1, 1, 1]} : vector<4x8x12xf32> to vector<4x8x11xf32>
    %468 = tpu.concatenate %466, %467 in 2 : vector<4x8x117xf32>, vector<4x8x11xf32> -> vector<4x8x128xf32>
    %c1_183 = arith.constant 1 : index
    %c22_184 = arith.constant 22 : index
    %c0_185 = arith.constant 0 : index
    %c0_186 = arith.constant 0 : index
    %469 = vector.load %arg2[%c1_183, %c22_184, %c0_185, %c0_186] : memref<2x24x8x128xf32, #tpu.memory_space<vmem>>, vector<1x1x8x128xf32>
    %470 = vector.shape_cast %469 : vector<1x1x8x128xf32> to vector<8x128xf32>
    %471 = vector.shape_cast %470 : vector<8x128xf32> to vector<1x8x128xf32>
    %472 = vector.broadcast %471 : vector<1x8x128xf32> to vector<4x8x128xf32>
    %473 = arith.mulf %472, %468 : vector<4x8x128xf32>
    %474 = arith.addf %465, %473 : vector<4x8x128xf32>
    %475 = vector.extract_strided_slice %264 {offsets = [0, 0, 12], sizes = [4, 8, 116], strides = [1, 1, 1]} : vector<4x8x128xf32> to vector<4x8x116xf32>
    %476 = tpu.concatenate %475, %270 in 2 : vector<4x8x116xf32>, vector<4x8x12xf32> -> vector<4x8x128xf32>
    %c1_187 = arith.constant 1 : index
    %c23_188 = arith.constant 23 : index
    %c0_189 = arith.constant 0 : index
    %c0_190 = arith.constant 0 : index
    %477 = vector.load %arg2[%c1_187, %c23_188, %c0_189, %c0_190] : memref<2x24x8x128xf32, #tpu.memory_space<vmem>>, vector<1x1x8x128xf32>
    %478 = vector.shape_cast %477 : vector<1x1x8x128xf32> to vector<8x128xf32>
    %479 = vector.shape_cast %478 : vector<8x128xf32> to vector<1x8x128xf32>
    %480 = vector.broadcast %479 : vector<1x8x128xf32> to vector<4x8x128xf32>
    %481 = arith.mulf %480, %476 : vector<4x8x128xf32>
    %482 = arith.addf %474, %481 : vector<4x8x128xf32>
    %c1_191 = arith.constant 1 : index
    %c0_192 = arith.constant 0 : index
    %c0_193 = arith.constant 0 : index
    %483 = vector.load %arg3[%c1_191, %c0_192, %c0_193] : memref<2x8x128xf32, #tpu.memory_space<vmem>>, vector<1x8x128xf32>
    %484 = vector.shape_cast %483 : vector<1x8x128xf32> to vector<8x128xf32>
    %485 = vector.shape_cast %484 : vector<8x128xf32> to vector<1x8x128xf32>
    %486 = vector.broadcast %485 : vector<1x8x128xf32> to vector<4x8x128xf32>
    %487 = arith.addf %482, %486 : vector<4x8x128xf32>
    %cst_194 = arith.constant 0.000000e+00 : f32
    %488 = vector.broadcast %cst_194 : f32 to vector<4x8x128xf32>
    %489 = arith.cmpf ogt, %487, %488 : vector<4x8x128xf32>
    %cst_195 = arith.constant 0.000000e+00 : f32
    %490 = vector.broadcast %cst_195 : f32 to vector<4x8x128xf32>
    %491 = arith.minimumf %487, %490 : vector<4x8x128xf32>
    %492 = math.exp %491 : vector<4x8x128xf32>
    %cst_196 = arith.constant 1.000000e+00 : f32
    %493 = vector.broadcast %cst_196 : f32 to vector<4x8x128xf32>
    %494 = arith.subf %492, %493 : vector<4x8x128xf32>
    %495 = arith.select %489, %487, %494 : vector<4x8x128xi1>, vector<4x8x128xf32>
    %496 = arith.addf %495, %264 : vector<4x8x128xf32>
    %c1_197 = arith.constant 1 : index
    %c0_198 = arith.constant 0 : index
    %c0_199 = arith.constant 0 : index
    %497 = vector.load %arg4[%c1_197, %c0_198, %c0_199] : memref<2x8x8xf32, #tpu.memory_space<vmem>>, vector<1x8x8xf32>
    %498 = vector.shape_cast %497 : vector<1x8x8xf32> to vector<8x8xf32>
    %499 = vector.extract_strided_slice %496 {offsets = [0, 0, 0], sizes = [1, 8, 128], strides = [1, 1, 1]} : vector<4x8x128xf32> to vector<1x8x128xf32>
    %500 = vector.shape_cast %499 : vector<1x8x128xf32> to vector<8x128xf32>
    %cst_200 = arith.constant dense<0.000000e+00> : vector<8x128xf32>
    %501 = tpu.matmul %498, %500, %cst_200 {dimension_numbers = #tpu.dot_dimension_numbers<[1], [0], [0], [1], [0, 0, 1, 1], [], []>} : vector<8x8xf32>, vector<8x128xf32>, vector<8x128xf32> -> vector<8x128xf32>
    %502 = vector.extract_strided_slice %496 {offsets = [1, 0, 0], sizes = [1, 8, 128], strides = [1, 1, 1]} : vector<4x8x128xf32> to vector<1x8x128xf32>
    %503 = vector.shape_cast %502 : vector<1x8x128xf32> to vector<8x128xf32>
    %cst_201 = arith.constant dense<0.000000e+00> : vector<8x128xf32>
    %504 = tpu.matmul %498, %503, %cst_201 {dimension_numbers = #tpu.dot_dimension_numbers<[1], [0], [0], [1], [0, 0, 1, 1], [], []>} : vector<8x8xf32>, vector<8x128xf32>, vector<8x128xf32> -> vector<8x128xf32>
    %505 = vector.extract_strided_slice %496 {offsets = [2, 0, 0], sizes = [1, 8, 128], strides = [1, 1, 1]} : vector<4x8x128xf32> to vector<1x8x128xf32>
    %506 = vector.shape_cast %505 : vector<1x8x128xf32> to vector<8x128xf32>
    %cst_202 = arith.constant dense<0.000000e+00> : vector<8x128xf32>
    %507 = tpu.matmul %498, %506, %cst_202 {dimension_numbers = #tpu.dot_dimension_numbers<[1], [0], [0], [1], [0, 0, 1, 1], [], []>} : vector<8x8xf32>, vector<8x128xf32>, vector<8x128xf32> -> vector<8x128xf32>
    %508 = vector.extract_strided_slice %496 {offsets = [3, 0, 0], sizes = [1, 8, 128], strides = [1, 1, 1]} : vector<4x8x128xf32> to vector<1x8x128xf32>
    %509 = vector.shape_cast %508 : vector<1x8x128xf32> to vector<8x128xf32>
    %cst_203 = arith.constant dense<0.000000e+00> : vector<8x128xf32>
    %510 = tpu.matmul %498, %509, %cst_203 {dimension_numbers = #tpu.dot_dimension_numbers<[1], [0], [0], [1], [0, 0, 1, 1], [], []>} : vector<8x8xf32>, vector<8x128xf32>, vector<8x128xf32> -> vector<8x128xf32>
    %511 = vector.shape_cast %501 : vector<8x128xf32> to vector<1x8x128xf32>
    %512 = vector.shape_cast %504 : vector<8x128xf32> to vector<1x8x128xf32>
    %513 = vector.shape_cast %507 : vector<8x128xf32> to vector<1x8x128xf32>
    %514 = vector.shape_cast %510 : vector<8x128xf32> to vector<1x8x128xf32>
    %515 = tpu.concatenate %511, %512, %513, %514 in 0 : vector<1x8x128xf32>, vector<1x8x128xf32>, vector<1x8x128xf32>, vector<1x8x128xf32> -> vector<4x8x128xf32>
    %c1_204 = arith.constant 1 : index
    %c0_205 = arith.constant 0 : index
    %c0_206 = arith.constant 0 : index
    %516 = vector.load %arg5[%c1_204, %c0_205, %c0_206] : memref<2x8x128xf32, #tpu.memory_space<vmem>>, vector<1x8x128xf32>
    %517 = vector.shape_cast %516 : vector<1x8x128xf32> to vector<8x128xf32>
    %518 = vector.shape_cast %517 : vector<8x128xf32> to vector<1x8x128xf32>
    %519 = vector.broadcast %518 : vector<1x8x128xf32> to vector<4x8x128xf32>
    %520 = arith.addf %515, %519 : vector<4x8x128xf32>
    %cst_207 = arith.constant 0.000000e+00 : f32
    %521 = vector.broadcast %cst_207 : f32 to vector<4x8x128xf32>
    %522 = arith.cmpf ogt, %520, %521 : vector<4x8x128xf32>
    %cst_208 = arith.constant 0.000000e+00 : f32
    %523 = vector.broadcast %cst_208 : f32 to vector<4x8x128xf32>
    %524 = arith.minimumf %520, %523 : vector<4x8x128xf32>
    %525 = math.exp %524 : vector<4x8x128xf32>
    %cst_209 = arith.constant 1.000000e+00 : f32
    %526 = vector.broadcast %cst_209 : f32 to vector<4x8x128xf32>
    %527 = arith.subf %525, %526 : vector<4x8x128xf32>
    %528 = arith.select %522, %520, %527 : vector<4x8x128xi1>, vector<4x8x128xf32>
    %c0_210 = arith.constant 0 : index
    %c0_211 = arith.constant 0 : index
    %c0_212 = arith.constant 0 : index
    %529 = vector.load %arg6[%c0_210, %c0_211, %c0_212] : memref<4x8x128xf32, #tpu.memory_space<vmem>>, vector<4x8x128xf32>
    tpu.vector_store %arg6[%c0_210, %c0_211, %c0_212], %528 {strides = array<i32>} : memref<4x8x128xf32, #tpu.memory_space<vmem>>, vector<4x8x128xf32>,
    return
  }
  func.func @transform_0(%arg0: i32) -> (i32, i32, i32) {
    %c0_i32 = arith.constant 0 : i32
    %c0_i32_0 = arith.constant 0 : i32
    %c0_i32_1 = arith.constant 0 : i32
    return %arg0, %c0_i32, %c0_i32_0 : i32, i32, i32
  }
  func.func @transform_1(%arg0: i32) -> (i32, i32, i32, i32) {
    %c0_i32 = arith.constant 0 : i32
    %c0_i32_0 = arith.constant 0 : i32
    %c0_i32_1 = arith.constant 0 : i32
    %c0_i32_2 = arith.constant 0 : i32
    %c0_i32_3 = arith.constant 0 : i32
    return %c0_i32, %c0_i32_0, %c0_i32_1, %c0_i32_2 : i32, i32, i32, i32
  }
  func.func @transform_2(%arg0: i32) -> (i32, i32, i32) {
    %c0_i32 = arith.constant 0 : i32
    %c0_i32_0 = arith.constant 0 : i32
    %c0_i32_1 = arith.constant 0 : i32
    %c0_i32_2 = arith.constant 0 : i32
    return %c0_i32, %c0_i32_0, %c0_i32_1 : i32, i32, i32
  }
  func.func @transform_3(%arg0: i32) -> (i32, i32, i32) {
    %c0_i32 = arith.constant 0 : i32
    %c0_i32_0 = arith.constant 0 : i32
    %c0_i32_1 = arith.constant 0 : i32
    %c0_i32_2 = arith.constant 0 : i32
    return %c0_i32, %c0_i32_0, %c0_i32_1 : i32, i32, i32
  }
  func.func @transform_4(%arg0: i32) -> (i32, i32, i32) {
    %c0_i32 = arith.constant 0 : i32
    %c0_i32_0 = arith.constant 0 : i32
    %c0_i32_1 = arith.constant 0 : i32
    %c0_i32_2 = arith.constant 0 : i32
    return %c0_i32, %c0_i32_0, %c0_i32_1 : i32, i32, i32
  }
  func.func @transform_5(%arg0: i32) -> (i32, i32, i32) {
    %c0_i32 = arith.constant 0 : i32
    %c0_i32_0 = arith.constant 0 : i32
    %c0_i32_1 = arith.constant 0 : i32
    return %arg0, %c0_i32, %c0_i32_0 : i32, i32, i32
  }
}

</mosaic_0001>

<bundles_post_ra>
// kernel: tpu_custom_call.1
= control target key start
LH: loop header
LB: loop body
LE: loop exit
PB: predicated region body
PF: predicated region fallthrough
CT: control target
= control target key end

     0   :  { %s4385_s0 = inlined_call_operand.hbm [shape: f32[8,8,128], index: 0, kind: input, shape index: {}, may-alias: {0,5}]   ;;  %s4386_s1 = inlined_call_operand.hbm [shape: f32[2,24,8,128], index: 1, kind: input, shape index: {}]   ;;  %s4387_s2 = inlined_call_operand.vmem [shape: f32[2,8,128], index: 2, kind: input, shape index: {}]   ;;  %s4388_s3 = inlined_call_operand.vmem [shape: f32[2,8,8], index: 3, kind: input, shape index: {}]   ;;  %s4389_s4 = inlined_call_operand.vmem [shape: f32[2,8,128], index: 4, kind: input, shape index: {}]   ;;  %s4390_s5 = inlined_call_operand.hbm [shape: f32[8,8,128], index: 5, kind: output, shape index: {}, may-alias: {0,5}]  }
   0x1   :  { %4455 = sst [smem:[#allocation29_spill]] %s4385_s0 }
   0x2   :  { %4456 = sst [smem:[#allocation30_spill]] %s4386_s1 }
   0x3   :  { %10 = vsyncpa [#allocation3], 0 }
   0x4   :  { %12 = vsyncpa [#allocation3 + $0x1], 0 }
   0x5   :  { %13 = vsyncpa [#allocation6], 0 }
   0x6   :  { %14 = vsyncpa [#allocation4], 0 }
   0x7   :  { %16 = vsyncpa [#allocation4 + $0x1], 0  ;;  %s2796_s18 = smov 0   ;;  %s2798_s19 = smov 0  }
   0x8   :  { %s2800_s20 = smov 0   ;;  %s2802_s21 = smov 0  }
   0x9 LB: > { %s2817_s22 = sadd.s32 4294967295, %s2731_s21   ;;  %s2370_s23 = sadd.s32 4294967294, %s2731_s21   ;;  %s2731_s21 = sphi %s2802_s21, %s4577_s21   ;;  %s2727_s20 = sphi %s2800_s20, %s4576_s20   ;;  %s2723_s19 = sphi %s2798_s19, %s4575_s19   ;;  %s2719_s18 = sphi %s2796_s18, %s4574_s18  }
   0xa   : > { %p42_p0 = scmp.ne.s32.totalorder %s2723_s19, %s2719_s18  ;;  %p4391_p1 = scmp.eq.s32.totalorder %s2817_s22, 0 }
   0xb   : > { %p156_p3 = scmp.eq.s32.totalorder %s2370_s23, 1  ;;  %p2371_p5 = scmp.ge.s32.totalorder %s2731_s21, 1 }
   0xc   : > { %p2826_p4 = por %p4391_p1, %p42_p0  ;;  %p163_p7 = scmp.lt.s32.totalorder %s2731_s21, 3 }
   0xd   : > { %p2831_p6 = por %p156_p3, %p42_p0  ;;  %s2733_s27 = smov [#allocation5]  }
   0xe   : > { %s4457_s24 = scalar_select %p2826_p4, 1, 0 }
   0xf   : > { %s4458_s25 = scalar_select %p2831_p6, 1, 0 }
  0x10   : > { %p2836_p8 = pnand %p2371_p5, %p163_p7  ;;  %s175_s28 = sshll.u32 %s2733_s27, 4  ;;  %s2840_s28 = int_to_ptr.vmem [resolvable:$true] %s175_s28 }
  0x11   : > { %s2852_s30 = sadd.s32 1, %s2731_s21   ;;  %s29_s6 = sadd.s32 1, %s2727_s20 }
  0x12   : > { %s4459_s26 = scalar_select %p2836_p8, 1, 0 }
  0x13   : > { %p2479_p9 = pneg %p2836_p8  ;;  %s26_s7 = ssub.s32 %s2731_s21, %s2852_s30 }
  0x14   : > { %s4461_s1 = sld [smem:[#allocation30_spill]] }
  0x15   : > { %p2847_p11 = pnand %p2479_p9, %p4391_p1 }
  0x17   : > { %p2605_p13 = pneg %p2847_p11 }
  0x1a   : > { %s2603_s10 = scalar_lea.hbm %s4461_s1, 6144 }
  0x1b   : > { %p2604_p12 = scmp.ne.s32.totalorder %s4461_s1, %s2603_s10  ;;  %p2610_p5 = scmp.lt.u32.totalorder %s2603_s10, %s4461_s1 }
  0x1d   : > { %p2606_p0 = pnand %p2605_p13, %p2604_p12 }
  0x1f   : > { %p2607_p3 = pneg %p2606_p0 }
  0x21   : > { %p2612_p7 = pnand %p2610_p5, %p2607_p3 }
  0x23   : > { %2615 = shalt.err (!%p2612_p7)
}
  0x24   : > { %s2616_s15 = scalar_lea.vmem %s2840_s28, 6144  ;;  %p2624_p2 = scmp.lt.s32.totalorder %s2840_s28, %s2840_s28 }
  0x25   : > { %p2617_p9 = scmp.ne.s32.totalorder %s2840_s28, %s2616_s15  ;;  %p2625_p6 = scmp.lt.s32.totalorder %s2616_s15, %s2616_s15 }
  0x27   : > { %p2619_p10 = pnand %p2617_p9, %p2605_p13  ;;  %p2626_p4 = por %p2625_p6, %p2624_p2 }
  0x29   : > { %p2620_p1 = pneg %p2619_p10 }
  0x2b   : > { %p2627_p8 = pnand %p2626_p4, %p2620_p1 }
  0x2d   : > { %2630 = shalt.err (!%p2627_p8)
}
  0x2e   : > { %s2734_s16 = smov 128   ;;  %s2735_s17 = smov 8  }
  0x2f   : > { %2482 = dma.hbm_to_vmem [thread:$0]  (!%p2847_p11), %s4461_s1, 6144, %s2840_s28, [#allocation6], %s2734_s16, %s2734_s16, %s2735_s17  }
  0x30   : > { %p27_p1 = scmp.eq.s32.totalorder %s26_s7, 0  ;;  %p36_p2 = scmp.ne.s32.totalorder %s2727_s20, %s2723_s19 }
  0x31   : > { %p37_p4 = scmp.eq.s32.totalorder %s2731_s21, 0  ;;  %p2492_p6 = scmp.lt.s32.totalorder %s2731_s21, 2 }
  0x32   : > { %s2886_s8 = scalar_select %p27_p1, %s2727_s20, %s29_s6  }
  0x33   : > { %p38_p8 = por %p37_p4, %p36_p2  ;;  %p4462_p10 = scmp.eq.s32.totalorder %s2817_s22, 1 }
  0x34   : > { %s198_s29 = sand.u32 1, %s2727_s20   ;;  %s2413_s10 = sshll.u32 %s2731_s21, 9 }
  0x35   : > { %p2890_p12 = por %p4462_p10, %p36_p2  ;;  %s2374_s11 = sshll.u32 %s198_s29, 5 }
  0x36   : > { %s4464_s0 = sld [smem:[#allocation29_spill]]  ;;  %s202_s28 = scalar_lea.vmem [#allocation2], %s2374_s11 }
  0x37   : > { %s209_s6 = sshll.u32 %s202_s28, 4  ;;  %p2901_p11 = pnand %p2492_p6, %p38_p8  ;;  %s2905_s6 = int_to_ptr.vmem [resolvable:$true] %s209_s6 }
  0x38   : > { %s2907_s15 = scalar_lea.sflag [#allocation3], %s198_s29 }
  0x39   : > { %p2633_p0 = pneg %p2901_p11 }
  0x3c   : > { %s2899_s14 = scalar_lea.hbm %s4464_s0, %s2413_s10  ;;  %s2636_s11 = scalar_lea.hbm %s4464_s0, 1024 }
  0x3d   : > { %s2631_s23 = scalar_lea.hbm %s2899_s14, 512  ;;  %p2637_p7 = scmp.lt.u32.totalorder %s2899_s14, %s4464_s0 }
  0x3e   : > { %p2632_p13 = scmp.ne.s32.totalorder %s2899_s14, %s2631_s23  ;;  %p2638_p9 = scmp.lt.u32.totalorder %s2636_s11, %s2631_s23 }
  0x3f   : > { %p2640_p2 = scmp.lt.u32.totalorder %s2631_s23, %s2899_s14 }
  0x40   : > { %p2634_p3 = pnand %p2633_p0, %p2632_p13  ;;  %p2639_p1 = por %p2638_p9, %p2637_p7 }
  0x42   : > { %p2635_p5 = pneg %p2634_p3  ;;  %p2641_p4 = por %p2640_p2, %p2639_p1 }
  0x44   : > { %p2642_p6 = pnand %p2641_p4, %p2635_p5 }
  0x46   : > { %2645 = shalt.err (!%p2642_p6)
}
  0x47   : > { %s2646_s29 = scalar_lea.vmem %s2905_s6, 512  ;;  %s2736_s28 = smov [#allocation2]  }
  0x48   : > { %p2647_p8 = scmp.ne.s32.totalorder %s2905_s6, %s2646_s29  ;;  %s2651_s27 = sshll.u32 %s2736_s28, 4  ;;  %s2652_s27 = int_to_ptr.vmem [resolvable:$false] %s2651_s27 }
  0x49   : > { %s2653_s10 = scalar_lea.vmem %s2652_s27, 1024  ;;  %p2654_p3 = scmp.lt.s32.totalorder %s2905_s6, %s2652_s27 }
  0x4a   : > { %p2649_p10 = pnand %p2647_p8, %p2633_p0  ;;  %p2655_p7 = scmp.lt.s32.totalorder %s2653_s10, %s2646_s29 }
  0x4c   : > { %p2650_p13 = pneg %p2649_p10  ;;  %p2656_p9 = por %p2655_p7, %p2654_p3 }
  0x4e   : > { %p2657_p1 = pnand %p2656_p9, %p2650_p13 }
  0x50   : > { %2660 = shalt.err (!%p2657_p1)
}
  0x51   : > { %2486 = dma.hbm_to_vmem [thread:$0]  (!%p2901_p11), %s2899_s14, 512, %s2905_s6, %s2907_s15, %s2734_s16, %s2734_s16, %s2735_s17  }
  0x52   : > { %p4466_p0 = scmp.ne.s32.totalorder %s4459_s26, 0 }
  0x54   : > { %221 = sbr.rel (%p4466_p0) target bundleno = 1279 (0x4ff), region = 40 }
  0x5b   : > { %s2941_s23 = sand.u32 1, %s2723_s19   ;;  %p4467_p5 = scmp.ne.s32.totalorder %s4457_s24, 0 }
  0x5c   : > { %s4394_s11 = sshll.u32 %s2941_s23, 5  ;;  %s224_s12 = scalar_lea.sflag [#allocation3], %s2941_s23 }
  0x5d   : > { %s2947_s7 = scalar_lea.vmem [#allocation2], %s4394_s11 }
  0x5e   : > { %2706 = dma.done.wait (%p4467_p5), %s224_s12, 512  }
  0x5f   : > { %2708 = vsyncadd (%p4467_p5), %s224_s12, 4294966784  ;;  %p4468_p11 = scmp.eq.s32.totalorder %s2817_s22, 0 }
  0x61   : > { %2710 = dma.done.wait (%p4468_p11), [#allocation6], 6144   ;;  %p4469_p2 = pmov %p4468_p11 }
  0x62   : > { %v4413_v0 = vmov 0   ;;  %v4414_v1 = vmov 127   ;;  %v2960_v2 = vld [vmem:[%s2947_s7 + $0x10] sm:$0xff]  ;;  %v2963_v3 = vld [vmem:[%s2947_s7] sm:$0xff]  ;;  %s2739_s24 = smov 11   ;;  %v2969_v4 = vld [vmem:[%s2947_s7 + $0x18] sm:$0xff] }
  0x63   : > { %2712 = vsyncadd (%p4469_p2), [#allocation6], 4294961152  ;;  %2558 = vset.pattern.permute.xlu1 %v4413_v0  ;;  %2559 = vset.pattern.permute.xlu0 %v4414_v1  ;;  %s2740_s26 = smov 10   ;;  %v2975_v5 = vld [vmem:[%s2947_s7 + $0x8] sm:$0xff]  ;;  %s2741_s16 = smov 9   ;;  %v4416_v48 = vmov 0.0  }
  0x64   : > { %276 = vperm.xlu1 %2558, %v2960_v2   ;;  %300 = vrot.lane.b32.xlu0 %v2963_v3, %s2739_s24  ;;  %s4450_s17 = smov 8   ;;  %s4448_s14 = smov 7   ;;  %vm2763_vm0 = vmmov 0   ;;  %vm312_vm1 = vcmask 89088   ;;  %vm338_vm2 = vcmask 80896   ;;  %vm365_vm3 = vcmask 72704  }
  0x65   : > { %s4446_s6 = smov 6   ;;  %s4444_s15 = smov 5   ;;  %2431 = vmatprep.subr.mxu0 %v4416_v48  ;;  %2436 = vmatprep.subr.mxu1 %v4416_v48  ;;  %vm392_vm4 = vcmask 64512   ;;  %vm419_vm5 = vcmask 56320   ;;  %vm446_vm6 = vcmask 48128   ;;  %vm4454_vm7 = vcmask 39936  }
  0x66   : > { %s4442_s13 = smov 4   ;;  %s4440_s29 = smov 3   ;;  %2433 = vmatprep.mubr.msk.f32.mxu0 %vm2763_vm0, %v4416_v48  ;;  %2438 = vmatprep.mubr.msk.f32.mxu1 %vm2763_vm0, %v4416_v48  ;;  %vm4428_vm8 = vcmask 31744   ;;  %vm4424_vm9 = vcmask 23552   ;;  %vm4423_vm10 = vcmask 15360   ;;  %vm4422_vm11 = vcmask 7168  }
  0x67   : > { %s4438_s28 = smov 2   ;;  %s4436_s27 = smov 1   ;;  %vm4425_vm12 = vcmask 1039360   ;;  %vm4426_vm13 = vcmask 1031168   ;;  %vm4427_vm14 = vcmask 1022976   ;;  %vm699_vm15 = vcmask 1014784  }
  0x68   : > { %281 = vperm.xlu1 %2558, %v2969_v4   ;;  %326 = vrot.lane.b32.xlu0 %v2963_v3, %s2740_s26  ;;  %s4395_s10 = smov 127   ;;  %s4397_s12 = smov 126  }
  0x69   : > { %s4399_s11 = smov 125   ;;  %s4521_s0 = smov 7  }
  0x6a   : > { %s4523_s1 = smov 5  }
  0x6c   : > { %302 = vrot.lane.b32.xlu1 %v2975_v5, %s2739_s24  ;;  %353 = vrot.lane.b32.xlu0 %v2963_v3, %s2741_s16 }
  0x6d   : > { %2560 = vset.pattern.permute.xlu1 %v4414_v1 }
  0x70   : > { %328 = vrot.lane.b32.xlu1 %v2975_v5, %s2740_s26  ;;  %304 = vrot.lane.b32.xlu0 %v2960_v2, %s2739_s24 }
  0x74   : > { %355 = vrot.lane.b32.xlu1 %v2975_v5, %s2741_s16  ;;  %330 = vrot.lane.b32.xlu0 %v2960_v2, %s2740_s26 }
  0x78   : > { %306 = vrot.lane.b32.xlu1 %v2969_v4, %s2739_s24  ;;  %380 = vrot.lane.b32.xlu0 %v2963_v3, %s4450_s17 }
  0x7c   : > { %332 = vrot.lane.b32.xlu1 %v2969_v4, %s2740_s26  ;;  %357 = vrot.lane.b32.xlu0 %v2960_v2, %s2741_s16 }
  0x80   : > { %382 = vrot.lane.b32.xlu1 %v2975_v5, %s4450_s17  ;;  %407 = vrot.lane.b32.xlu0 %v2963_v3, %s4448_s14 }
  0x84   : > { %359 = vrot.lane.b32.xlu1 %v2969_v4, %s2741_s16  ;;  %384 = vrot.lane.b32.xlu0 %v2960_v2, %s4450_s17 }
  0x88   : > { %409 = vrot.lane.b32.xlu1 %v2975_v5, %s4448_s14  ;;  %434 = vrot.lane.b32.xlu0 %v2963_v3, %s4446_s6 }
  0x8c   : > { %386 = vrot.lane.b32.xlu1 %v2969_v4, %s4450_s17  ;;  %411 = vrot.lane.b32.xlu0 %v2960_v2, %s4448_s14 }
  0x90   : > { %436 = vrot.lane.b32.xlu1 %v2975_v5, %s4446_s6  ;;  %461 = vrot.lane.b32.xlu0 %v2963_v3, %s4444_s15 }
  0x94   : > { %413 = vrot.lane.b32.xlu1 %v2969_v4, %s4448_s14  ;;  %438 = vrot.lane.b32.xlu0 %v2960_v2, %s4446_s6 }
  0x98   : > { %463 = vrot.lane.b32.xlu1 %v2975_v5, %s4444_s15  ;;  %488 = vrot.lane.b32.xlu0 %v2963_v3, %s4442_s13 }
  0x9c   : > { %440 = vrot.lane.b32.xlu1 %v2969_v4, %s4446_s6  ;;  %465 = vrot.lane.b32.xlu0 %v2960_v2, %s4444_s15 }
  0xa0   : > { %490 = vrot.lane.b32.xlu1 %v2975_v5, %s4442_s13  ;;  %515 = vrot.lane.b32.xlu0 %v2963_v3, %s4440_s29 }
  0xa4   : > { %467 = vrot.lane.b32.xlu1 %v2969_v4, %s4444_s15  ;;  %492 = vrot.lane.b32.xlu0 %v2960_v2, %s4442_s13 }
  0xa8   : > { %517 = vrot.lane.b32.xlu1 %v2975_v5, %s4440_s29  ;;  %542 = vrot.lane.b32.xlu0 %v2963_v3, %s4438_s28 }
  0xac   : > { %494 = vrot.lane.b32.xlu1 %v2969_v4, %s4442_s13  ;;  %285 = vperm.xlu0 %2559, %v2963_v3  }
  0xb0   : > { %544 = vrot.lane.b32.xlu1 %v2975_v5, %s4438_s28  ;;  %521 = vrot.lane.b32.xlu0 %v2969_v4, %s4440_s29 }
  0xb4   : > { %289 = vperm.xlu1 %2560, %v2975_v5   ;;  %571 = vrot.lane.b32.xlu0 %v2975_v5, %s4436_s27 }
  0xb8   : > { %519 = vrot.lane.b32.xlu1 %v2960_v2, %s4440_s29  ;;  %548 = vrot.lane.b32.xlu0 %v2969_v4, %s4438_s28 }
  0xbc   : > { %569 = vrot.lane.b32.xlu1 %v2963_v3, %s4436_s27  ;;  %297 = vperm.xlu0 %2559, %v2969_v4  }
  0xc0   : > { %546 = vrot.lane.b32.xlu1 %v2960_v2, %s4438_s28  ;;  %2561 = vset.pattern.permute.xlu0 %v4413_v0 }
  0xc1   : > { %266 = vperm.xlu0 %2561, %v2963_v3  }
  0xc4   : > { %293 = vperm.xlu1 %2560, %v2960_v2  }
  0xc5   : > { %271 = vperm.xlu0 %2561, %v2975_v5  }
  0xc8   : > { %573 = vrot.lane.b32.xlu1 %v2960_v2, %s4436_s27 }
  0xc9   : > { %575 = vrot.lane.b32.xlu0 %v2969_v4, %s4436_s27  ;;  %2562 = vset.pattern.permute.xlu1 %v4413_v0 }
  0xcc   : > { %606 = vrot.lane.b32.xlu1 %v2963_v3, %s4395_s10 }
  0xcd   : > { %608 = vrot.lane.b32.xlu0 %v2975_v5, %s4395_s10 }
  0xd0   : > { %633 = vrot.lane.b32.xlu1 %v2963_v3, %s4397_s12 }
  0xd1   : > { %635 = vrot.lane.b32.xlu0 %v2975_v5, %s4397_s12 }
  0xd4   : > { %610 = vrot.lane.b32.xlu1 %v2960_v2, %s4395_s10 }
  0xd5   : > { %612 = vrot.lane.b32.xlu0 %v2969_v4, %s4395_s10  ;;  %s4401_s10 = smov 124  }
  0xd6   : > { %v3082_v6 = vpop.permute.xlu0 %300 }
  0xd8   : > { %660 = vrot.lane.b32.xlu1 %v2963_v3, %s4399_s11 }
  0xd9   : > { %662 = vrot.lane.b32.xlu0 %v2975_v5, %s4399_s11 }
  0xda   : > { %v3088_v7 = vpop.permute.xlu0 %326 }
  0xdc   : > { %637 = vrot.lane.b32.xlu1 %v2960_v2, %s4397_s12 }
  0xdd   : > { %639 = vrot.lane.b32.xlu0 %v2969_v4, %s4397_s12  ;;  %s4403_s12 = smov 123  }
  0xde   : > { %v3094_v8 = vpop.permute.xlu0 %353 }
  0xe0   : > { %687 = vrot.lane.b32.xlu1 %v2963_v3, %s4401_s10 }
  0xe1   : > { %689 = vrot.lane.b32.xlu0 %v2975_v5, %s4401_s10 }
  0xe2   : > { %v3100_v9 = vpop.permute.xlu0 %304 }
  0xe3   : > { %v3102_v10 = vpop.permute.xlu1 %276 }
  0xe4   : > { %664 = vrot.lane.b32.xlu1 %v2960_v2, %s4399_s11 }
  0xe5   : > { %666 = vrot.lane.b32.xlu0 %v2969_v4, %s4399_s11  ;;  %s4405_s11 = smov 122  }
  0xe6   : > { %v3108_v11 = vpop.permute.xlu0 %330 }
  0xe7   : > { %v3110_v12 = vpop.permute.xlu1 %281 }
  0xe8   : > { %714 = vrot.lane.b32.xlu1 %v2963_v3, %s4403_s12 }
  0xe9   : > { %716 = vrot.lane.b32.xlu0 %v2975_v5, %s4403_s12 }
  0xea   : > { %v3116_v13 = vpop.permute.xlu0 %380 }
  0xeb   : > { %v3118_v14 = vpop.permute.xlu1 %302 }
  0xec   : > { %691 = vrot.lane.b32.xlu1 %v2960_v2, %s4401_s10 }
  0xed   : > { %693 = vrot.lane.b32.xlu0 %v2969_v4, %s4401_s10  ;;  %s4407_s10 = smov 121  }
  0xee   : > { %v3124_v15 = vpop.permute.xlu0 %357 }
  0xef   : > { %v3126_v16 = vpop.permute.xlu1 %328 }
  0xf0   : > { %741 = vrot.lane.b32.xlu1 %v2963_v3, %s4405_s11 }
  0xf1   : > { %743 = vrot.lane.b32.xlu0 %v2975_v5, %s4405_s11 }
  0xf2   : > { %v3132_v17 = vpop.permute.xlu0 %407 }
  0xf3   : > { %v3134_v18 = vpop.permute.xlu1 %355 }
  0xf4   : > { %718 = vrot.lane.b32.xlu1 %v2960_v2, %s4403_s12 }
  0xf5   : > { %720 = vrot.lane.b32.xlu0 %v2969_v4, %s4403_s12  ;;  %s4409_s12 = smov 120  }
  0xf6   : > { %v3140_v19 = vpop.permute.xlu0 %384 }
  0xf7   : > { %v3142_v20 = vpop.permute.xlu1 %306 }
  0xf8   : > { %768 = vrot.lane.b32.xlu1 %v2963_v3, %s4407_s10 }
  0xf9   : > { %770 = vrot.lane.b32.xlu0 %v2975_v5, %s4407_s10 }
  0xfa   : > { %v3148_v21 = vpop.permute.xlu0 %434 }
  0xfb   : > { %v3150_v22 = vpop.permute.xlu1 %332 }
  0xfc   : > { %745 = vrot.lane.b32.xlu1 %v2960_v2, %s4405_s11 }
  0xfd   : > { %747 = vrot.lane.b32.xlu0 %v2969_v4, %s4405_s11  ;;  %s4411_s11 = smov 119  }
  0xfe   : > { %v3156_v23 = vpop.permute.xlu0 %411 }
  0xff   : > { %v3158_v24 = vpop.permute.xlu1 %382 }
 0x100   : > { %795 = vrot.lane.b32.xlu1 %v2963_v3, %s4409_s12 }
 0x101   : > { %797 = vrot.lane.b32.xlu0 %v2975_v5, %s4409_s12 }
 0x102   : > { %v3168_v26 = vpop.permute.xlu0 %461 }
 0x103   : > { %v3164_v25 = vpop.permute.xlu1 %359 }
 0x104   : > { %772 = vrot.lane.b32.xlu1 %v2960_v2, %s4407_s10 }
 0x105   : > { %774 = vrot.lane.b32.xlu0 %v2969_v4, %s4407_s10  ;;  %s4452_s10 = smov 118  }
 0x106   : > { %v3178_v28 = vpop.permute.xlu0 %438 }
 0x107   : > { %v3172_v27 = vpop.permute.xlu1 %409 }
 0x108   : > { %822 = vrot.lane.b32.xlu1 %v2963_v3, %s4411_s11 }
 0x109   : > { %824 = vrot.lane.b32.xlu0 %v2975_v5, %s4411_s11 }
 0x10a   : > { %v3190_v31 = vpop.permute.xlu0 %488 }
 0x10b   : > { %v3180_v29 = vpop.permute.xlu1 %386 }
 0x10c   : > { %799 = vrot.lane.b32.xlu1 %v2960_v2, %s4409_s12 }
 0x10d   : > { %801 = vrot.lane.b32.xlu0 %v2969_v4, %s4409_s12  ;;  %s4432_s12 = smov 117  }
 0x10e   : > { %v3200_v33 = vpop.permute.xlu0 %465 }
 0x10f   : > { %v3186_v30 = vpop.permute.xlu1 %436 }
 0x110   : > { %849 = vrot.lane.b32.xlu1 %v2963_v3, %s4452_s10 }
 0x111   : > { %851 = vrot.lane.b32.xlu0 %v2975_v5, %s4452_s10 }
 0x112   : > { %v3212_v36 = vpop.permute.xlu0 %515 }
 0x113   : > { %v3194_v32 = vpop.permute.xlu1 %413 }
 0x114   : > { %826 = vrot.lane.b32.xlu1 %v2960_v2, %s4411_s11 }
 0x115   : > { %828 = vrot.lane.b32.xlu0 %v2969_v4, %s4411_s11  ;;  %s4430_s11 = smov 116  }
 0x116   : > { %v3222_v38 = vpop.permute.xlu0 %492 }
 0x117   : > { %v3202_v34 = vpop.permute.xlu1 %463 }
 0x118   : > { %876 = vrot.lane.b32.xlu1 %v2963_v3, %s4432_s12 }
 0x119   : > { %878 = vrot.lane.b32.xlu0 %v2975_v5, %s4432_s12 }
 0x11a   : > { %v3230_v40 = vpop.permute.xlu0 %542 }
 0x11b   : > { %v3208_v35 = vpop.permute.xlu1 %440 }
 0x11c   : > { %853 = vrot.lane.b32.xlu1 %v2960_v2, %s4452_s10 }
 0x11d   : > { %855 = vrot.lane.b32.xlu0 %v2969_v4, %s4452_s10 }
 0x11f   : > { %v3216_v37 = vpop.permute.xlu1 %490 }
 0x120   : > { %903 = vrot.lane.b32.xlu1 %v2963_v3, %s4430_s11 }
 0x121   : > { %905 = vrot.lane.b32.xlu0 %v2975_v5, %s4430_s11 }
 0x123   : > { %v3224_v39 = vpop.permute.xlu1 %467 }
 0x124   : > { %880 = vrot.lane.b32.xlu1 %v2960_v2, %s4432_s12 }
 0x125   : > { %882 = vrot.lane.b32.xlu0 %v2969_v4, %s4432_s12  ;;  %s4511_s12 = smov 125  }
 0x127   : > { %v3232_v41 = vpop.permute.xlu1 %517 }
 0x128   : > { %907 = vrot.lane.b32.xlu1 %v2960_v2, %s4430_s11 }
 0x129   : > { %909 = vrot.lane.b32.xlu0 %v2969_v4, %s4430_s11  ;;  %s4510_s11 = smov 126  }
 0x12b   : > { %v3238_v42 = vpop.permute.xlu1 %494  ;;  %v3240_v43 = vpop.permute.xlu0 %285 }
 0x12c   : > { %4470 = vst [vmem:[#allocation11_spill] sm:$0xff] %v3240_v43 }
 0x12f   : > { %v3242_v44 = vpop.permute.xlu1 %544  ;;  %v3244_v45 = vpop.permute.xlu0 %521 }
 0x133   : > { %v3246_v46 = vpop.permute.xlu1 %289  ;;  %v3248_v47 = vpop.permute.xlu0 %571 }
 0x134   : > { %4471 = vst [vmem:[#allocation12_spill] sm:$0xff] %v3246_v46 }
 0x137   : > { %v3252_v49 = vpop.permute.xlu1 %519  ;;  %v3254_v50 = vpop.permute.xlu0 %548 }
 0x13b   : > { %v3256_v51 = vpop.permute.xlu1 %569  ;;  %v3258_v52 = vpop.permute.xlu0 %297 }
 0x13c   : > { %4472 = vst [vmem:[#allocation13_spill] sm:$0xff] %v3258_v52  ;;  %v3296_v52 = vld [vmem:[#allocation5] sm:$0xff] }
 0x13f   : > { %v3264_v53 = vpop.permute.xlu1 %546 }
 0x140   : > { %v3266_v54 = vpop.permute.xlu0 %266 }
 0x141   : > { %v313_v1 = vsel %vm312_vm1, %v3266_v54, %v3082_v6  ;;  %v339_v48 = vsel %vm338_vm2, %v3266_v54, %v3088_v7 }
 0x143   : > { %v3268_v55 = vpop.permute.xlu1 %293 }
 0x144   : > { %4473 = vst [vmem:[#allocation14_spill] sm:$0xff] %v3268_v55  ;;  %v3270_v56 = vpop.permute.xlu0 %271  ;;  %v3298_v55 = vld [vmem:[#allocation5 + $0x8] sm:$0xff] }
 0x145   : > { %v314_v63 = vsel %vm312_vm1, %v3270_v56, %v3118_v14  ;;  %v340_v0 = vsel %vm338_vm2, %v3270_v56, %v3126_v16  ;;  %v318_v16 = vmul.f32 %v3296_v52, %v313_v1  ;;  %v345_v6 = vmul.f32 %v3298_v55, %v339_v48 }
 0x146   : > { %v319_v14 = vmul.f32 %v3296_v52, %v314_v63  ;;  %v346_v43 = vmul.f32 %v3298_v55, %v340_v0  ;;  %v367_v7 = vsel %vm365_vm3, %v3270_v56, %v3134_v18  ;;  %v3318_v0 = vld [vmem:[#allocation5 + $0x10] sm:$0xff]  ;;  %v394_v18 = vsel %vm392_vm4, %v3270_v56, %v3158_v24 }
 0x147   : > { %v3272_v57 = vpop.permute.xlu1 %573  ;;  %v373_v1 = vmul.f32 %v3318_v0, %v367_v7  ;;  %v421_v24 = vsel %vm419_vm5, %v3270_v56, %v3172_v27  ;;  %v448_v27 = vsel %vm446_vm6, %v3270_v56, %v3186_v30 }
 0x148   : > { %v3274_v58 = vpop.permute.xlu0 %575  ;;  %v350_v63 = vadd.f32 %v346_v43, %v319_v14 }
 0x14a   : > { %v377_v43 = vadd.f32 %v373_v1, %v350_v63 }
 0x14b   : > { %v3276_v59 = vpop.permute.xlu1 %606 }
 0x14c   : > { %4474 = vst [vmem:[#allocation15_spill] sm:$0xff] %v3276_v59  ;;  %v3278_v60 = vpop.permute.xlu0 %608 }
 0x14f   : > { %v3280_v61 = vpop.permute.xlu1 %633 }
 0x150   : > { %4475 = vst [vmem:[#allocation16_spill] sm:$0xff] %v3280_v61  ;;  %v3282_v62 = vpop.permute.xlu0 %635 }
 0x151   : > { %4476 = vst [vmem:[#allocation17_spill] sm:$0xff] %v3282_v62 }
 0x153   : > { %v3300_v61 = vpop.permute.xlu1 %610 }
 0x154   : > { %4477 = vst [vmem:[#allocation18_spill] sm:$0xff] %v3300_v61  ;;  %v3304_v62 = vpop.permute.xlu0 %612  ;;  %v366_v61 = vsel %vm365_vm3, %v3266_v54, %v3094_v8  ;;  %v393_v8 = vsel %vm392_vm4, %v3266_v54, %v3116_v13  ;;  %v420_v13 = vsel %vm419_vm5, %v3266_v54, %v3132_v17  ;;  %v447_v17 = vsel %vm446_vm6, %v3266_v54, %v3148_v21 }
 0x155   : > { %4478 = vst [vmem:[#allocation19_spill] sm:$0xff] %v3304_v62  ;;  %v349_v62 = vadd.f32 %v345_v6, %v318_v16  ;;  %v372_v48 = vmul.f32 %v3318_v0, %v366_v61 }
 0x157   : > { %v3311_v46 = vpop.permute.xlu1 %660  ;;  %v376_v16 = vadd.f32 %v372_v48, %v349_v62 }
 0x158   : > { %4479 = vst [vmem:[#allocation20_spill] sm:$0xff] %v3311_v46  ;;  %v3316_v59 = vpop.permute.xlu0 %662 }
 0x159   : > { %4480 = vst [vmem:[#allocation21_spill] sm:$0xff] %v3316_v59  ;;  %v3332_v59 = vld [vmem:[#allocation5 + $0x18] sm:$0xff] }
 0x15a   : > { %v400_v6 = vmul.f32 %v3332_v59, %v394_v18  ;;  %v399_v61 = vmul.f32 %v3332_v59, %v393_v8 }
 0x15b   : > { %v3325_v46 = vpop.permute.xlu1 %637 }
 0x15c   : > { %v3330_v14 = vpop.permute.xlu0 %639  ;;  %v404_v63 = vadd.f32 %v400_v6, %v377_v43  ;;  %v403_v62 = vadd.f32 %v399_v61, %v376_v16 }
 0x15d   : > { %4481 = vst [vmem:[#allocation22_spill] sm:$0xff] %v3330_v14  ;;  %v3346_v14 = vld [vmem:[#allocation5 + $0x20] sm:$0xff] }
 0x15e   : > { %v427_v48 = vmul.f32 %v3346_v14, %v421_v24  ;;  %v426_v18 = vmul.f32 %v3346_v14, %v420_v13  ;;  %v341_v24 = vsel %vm338_vm2, %v3102_v10, %v3108_v11  ;;  %v475_v13 = vsel %vm4454_vm7, %v3270_v56, %v3202_v34  ;;  %v3380_v11 = vld [vmem:[#allocation5 + $0x30] sm:$0xff] }
 0x15f   : > { %v3339_v7 = vpop.permute.xlu1 %687  ;;  %v347_v34 = vmul.f32 %v3298_v55, %v341_v24  ;;  %v502_v24 = vsel %vm4428_vm8, %v3270_v56, %v3216_v37  ;;  %v316_v37 = vsel %vm312_vm1, %v3110_v12, %v3142_v20  ;;  %v396_v20 = vsel %vm392_vm4, %v3110_v12, %v3180_v29 }
 0x160   : > { %v3344_v1 = vpop.permute.xlu0 %689  ;;  %v431_v43 = vadd.f32 %v427_v48, %v404_v63  ;;  %v430_v16 = vadd.f32 %v426_v18, %v403_v62  ;;  %v474_v63 = vsel %vm4454_vm7, %v3266_v54, %v3168_v26  ;;  %v315_v18 = vsel %vm312_vm1, %v3102_v10, %v3100_v9  ;;  %v3386_v26 = vld [vmem:[#allocation5 + $0x58] sm:$0xff] }
 0x161   : > { %4482 = vst [vmem:[#allocation23_spill] sm:$0xff] %v3344_v1  ;;  %v3360_v1 = vld [vmem:[#allocation5 + $0x28] sm:$0xff]  ;;  %v342_v9 = vsel %vm338_vm2, %v3110_v12, %v3150_v22  ;;  %v501_v22 = vsel %vm4428_vm8, %v3266_v54, %v3190_v31  ;;  %v422_v31 = vsel %vm419_vm5, %v3102_v10, %v3156_v23 }
 0x162   : > { %v454_v61 = vmul.f32 %v3360_v1, %v448_v27  ;;  %v453_v30 = vmul.f32 %v3360_v1, %v447_v17  ;;  %v368_v17 = vsel %vm365_vm3, %v3102_v10, %v3124_v15 }
 0x163   : > { %v3353_v8 = vpop.permute.xlu1 %664 }
 0x164   : > { %4483 = vst [vmem:[#allocation24_spill] sm:$0xff] %v3353_v8  ;;  %v3358_v6 = vpop.permute.xlu0 %666  ;;  %v458_v62 = vadd.f32 %v454_v61, %v431_v43  ;;  %v457_v27 = vadd.f32 %v453_v30, %v430_v16  ;;  %v481_v43 = vmul.f32 %v3380_v11, %v475_v13  ;;  %v480_v61 = vmul.f32 %v3380_v11, %v474_v63 }
 0x165   : > { %4484 = vst [vmem:[#allocation25_spill] sm:$0xff] %v3358_v6  ;;  %v3395_v16 = vmul.f32 %v3386_v26, %v2963_v3  ;;  %v320_v30 = vmul.f32 %v3296_v52, %v315_v18  ;;  %v395_v13 = vsel %vm392_vm4, %v3102_v10, %v3140_v19  ;;  %v369_v18 = vsel %vm365_vm3, %v3110_v12, %v3164_v25 }
 0x166   : > { %v485_v63 = vadd.f32 %v481_v43, %v458_v62  ;;  %v484_v19 = vadd.f32 %v480_v61, %v457_v27  ;;  %v348_v8 = vmul.f32 %v3298_v55, %v342_v9  ;;  %v529_v27 = vsel %vm4424_vm9, %v3270_v56, %v3232_v41 }
 0x167   : > { %v3370_v21 = vpop.permute.xlu1 %714  ;;  %v351_v6 = vadd.f32 %v347_v34, %v320_v30  ;;  %v321_v55 = vmul.f32 %v3296_v52, %v316_v37  ;;  %v375_v23 = vmul.f32 %v3318_v0, %v369_v18  ;;  %v528_v43 = vsel %vm4424_vm9, %v3266_v54, %v3212_v36  ;;  %v533_v30 = vld [vmem:[#allocation5 + $0x40] sm:$0xff] }
 0x168   : > { %4485 = vst [vmem:[#allocation26_spill] sm:$0xff] %v3370_v21  ;;  %v3375_v48 = vpop.permute.xlu0 %716  ;;  %v374_v21 = vmul.f32 %v3318_v0, %v368_v17  ;;  %v401_v17 = vmul.f32 %v3332_v59, %v395_v13  ;;  %v3445_v41 = vmul.f32 %v3386_v26, %v2975_v5  ;;  %v402_v52 = vmul.f32 %v3332_v59, %v396_v20 }
 0x169   : > { %4486 = vst [vmem:[#allocation27_spill] sm:$0xff] %v3375_v48  ;;  %v423_v0 = vsel %vm419_vm5, %v3110_v12, %v3194_v32  ;;  %v535_v36 = vmul.f32 %v533_v30, %v529_v27  ;;  %v556_v37 = vsel %vm4423_vm10, %v3270_v56, %v3242_v44  ;;  %v450_v59 = vsel %vm446_vm6, %v3110_v12, %v3208_v35  ;;  %v560_v56 = vld [vmem:[#allocation5 + $0x48] sm:$0xff] }
 0x16a   : > { %v378_v29 = vadd.f32 %v374_v21, %v351_v6  ;;  %v449_v6 = vsel %vm446_vm6, %v3102_v10, %v3178_v28  ;;  %v534_v21 = vmul.f32 %v533_v30, %v528_v43  ;;  %v555_v32 = vsel %vm4423_vm10, %v3266_v54, %v3230_v40 }
 0x16b   : > { %v3400_v15 = vpop.permute.xlu1 %691  ;;  %v429_v44 = vmul.f32 %v3346_v14, %v423_v0  ;;  %v455_v20 = vmul.f32 %v3360_v1, %v449_v6  ;;  %v477_v40 = vsel %vm4454_vm7, %v3110_v12, %v3224_v39  ;;  %v562_v54 = vmul.f32 %v560_v56, %v556_v37 }
 0x16c   : > { %4487 = vst [vmem:[#allocation28_spill] sm:$0xff] %v3400_v15  ;;  %v3409_v48 = vpop.permute.xlu0 %693  ;;  %v3418_v15 = vld [vmem:[#allocation5 + $0x38] sm:$0xff]  ;;  %v456_v27 = vmul.f32 %v3360_v1, %v450_v59  ;;  %v504_v39 = vsel %vm4428_vm8, %v3110_v12, %v3238_v42  ;;  %v531_v42 = vsel %vm4424_vm9, %v3110_v12, %v3244_v45  ;;  %v558_v37 = vsel %vm4423_vm10, %v3110_v12, %v3254_v50 }
 0x16d   : > { %v508_v62 = vmul.f32 %v3418_v15, %v502_v24  ;;  %v507_v25 = vmul.f32 %v3418_v15, %v501_v22  ;;  %v428_v24 = vmul.f32 %v3346_v14, %v422_v31  ;;  %v352_v22 = vadd.f32 %v348_v8, %v321_v55 }
 0x16e   : > { %v583_v14 = vsel %vm4422_vm11, %v2975_v5, %v3248_v47  ;;  %v561_v55 = vmul.f32 %v560_v56, %v555_v32  ;;  %v530_v47 = vsel %vm4424_vm9, %v3102_v10, %v3252_v49  ;;  %v537_v32 = vmul.f32 %v533_v30, %v531_v42 }
 0x16f   : > { %v3433_v34 = vpop.permute.xlu1 %741  ;;  %v512_v9 = vadd.f32 %v508_v62, %v485_v63  ;;  %v511_v13 = vadd.f32 %v507_v25, %v484_v19  ;;  %v405_v63 = vadd.f32 %v401_v17, %v378_v29  ;;  %v379_v8 = vadd.f32 %v375_v23, %v352_v22 }
 0x170   : > { %v3440_v61 = vpop.permute.xlu0 %743  ;;  %v476_v62 = vsel %vm4454_vm7, %v3102_v10, %v3200_v33  ;;  %v503_v25 = vsel %vm4428_vm8, %v3102_v10, %v3222_v38  ;;  %v587_v33 = vld [vmem:[#allocation5 + $0x50] sm:$0xff]  ;;  %v582_v38 = vsel %vm4422_vm11, %v2963_v3, %v3256_v51  ;;  %v620_v12 = vsel %vm4425_vm12, %v3278_v60, %v2975_v5 }
 0x171   : > { %v539_v19 = vadd.f32 %v535_v36, %v512_v9  ;;  %v432_v28 = vadd.f32 %v428_v24, %v405_v63  ;;  %v538_v17 = vadd.f32 %v534_v21, %v511_v13  ;;  %v406_v35 = vadd.f32 %v402_v52, %v379_v8 }
 0x172   : > { %v482_v43 = vmul.f32 %v3380_v11, %v476_v62  ;;  %v483_v24 = vmul.f32 %v3380_v11, %v477_v40  ;;  %v509_v52 = vmul.f32 %v3418_v15, %v503_v25  ;;  %v589_v0 = vmul.f32 %v587_v33, %v583_v14 }
 0x173   : > { %v3457_v18 = vpop.permute.xlu1 %718  ;;  %v566_v9 = vadd.f32 %v562_v54, %v539_v19  ;;  %v433_v29 = vadd.f32 %v429_v44, %v406_v35  ;;  %v565_v13 = vadd.f32 %v561_v55, %v538_v17  ;;  %v459_v22 = vadd.f32 %v455_v20, %v432_v28  ;;  %v624_v20 = vld [vmem:[#allocation5 + $0x60] sm:$0xff] }
 0x174   : > { %v3465_v31 = vpop.permute.xlu0 %720  ;;  %v510_v36 = vmul.f32 %v3418_v15, %v504_v39  ;;  %v588_v63 = vmul.f32 %v587_v33, %v582_v38  ;;  %v557_v11 = vsel %vm4423_vm10, %v3102_v10, %v3264_v53  ;;  %v536_v21 = vmul.f32 %v533_v30, %v530_v47  ;;  %v4489_v39 = vld [vmem:[#allocation12_spill] sm:$0xff]  ;;  %v4492_v47 = vld [vmem:[#allocation11_spill] sm:$0xff] }
 0x175   : > { %v460_v51 = vadd.f32 %v456_v27, %v433_v29  ;;  %v486_v49 = vadd.f32 %v482_v43, %v459_v22  ;;  %v593_v8 = vadd.f32 %v589_v0, %v566_v9  ;;  %v584_v15 = vsel %vm4422_vm11, %v2960_v2, %v3272_v57  ;;  %v4488_v57 = vld [vmem:[#allocation15_spill] sm:$0xff] }
 0x176   : > { %v592_v19 = vadd.f32 %v588_v63, %v565_v13  ;;  %v563_v10 = vmul.f32 %v560_v56, %v557_v11  ;;  %v585_v53 = vsel %vm4422_vm11, %v2969_v4, %v3274_v58  ;;  %v564_v44 = vmul.f32 %v560_v56, %v558_v37  ;;  %v4493_v13 = vld [vmem:[#allocation16_spill] sm:$0xff]  ;;  %v4495_v63 = vld [vmem:[#allocation14_spill] sm:$0xff] }
 0x177   : > { %v3482_v23 = vpop.permute.xlu1 %768  ;;  %v487_v45 = vadd.f32 %v483_v24, %v460_v51  ;;  %v513_v28 = vadd.f32 %v509_v52, %v486_v49  ;;  %v590_v17 = vmul.f32 %v587_v33, %v584_v15  ;;  %v619_v35 = vsel %vm4425_vm12, %v4488_v57, %v2963_v3  ;;  %v651_v3 = vld [vmem:[#allocation5 + $0x68] sm:$0xff]  ;;  %v4500_v57 = vld [vmem:[#allocation23_spill] sm:$0xff] }
 0x178   : > { %v3491_v1 = vpop.permute.xlu0 %770  ;;  %v603_v40 = vadd.f32 %v3445_v41, %v593_v8  ;;  %v591_v56 = vmul.f32 %v587_v33, %v585_v53  ;;  %v602_v25 = vadd.f32 %v3395_v16, %v592_v19  ;;  %v600_v5 = vmul.f32 %v3386_v26, %v2960_v2  ;;  %v4490_v41 = vld [vmem:[#allocation17_spill] sm:$0xff]  ;;  %v4491_v33 = vld [vmem:[#allocation18_spill] sm:$0xff]  ;;  %v4496_v37 = vld [vmem:[#allocation20_spill] sm:$0xff] }
 0x179   : > { %v514_v62 = vadd.f32 %v510_v36, %v487_v45  ;;  %v540_v30 = vadd.f32 %v536_v21, %v513_v28  ;;  %v626_v27 = vmul.f32 %v624_v20, %v620_v12  ;;  %v601_v14 = vmul.f32 %v3386_v26, %v2969_v4  ;;  %v4494_v36 = vld [vmem:[#allocation19_spill] sm:$0xff]  ;;  %v678_v21 = vld [vmem:[#allocation5 + $0x70] sm:$0xff] }
 0x17a   : > { %v625_v43 = vmul.f32 %v624_v20, %v619_v35  ;;  %v647_v38 = vsel %vm4426_vm13, %v4490_v41, %v4489_v39  ;;  %v621_v16 = vsel %vm4425_vm12, %v4491_v33, %v2960_v2  ;;  %v646_v26 = vsel %vm4426_vm13, %v4493_v13, %v4492_v47  ;;  %v4497_v45 = vld [vmem:[#allocation21_spill] sm:$0xff]  ;;  %v732_v33 = vld [vmem:[#allocation5 + $0x80] sm:$0xff] }
 0x17b   : > { %v3505_v6 = vpop.permute.xlu1 %745  ;;  %v541_v58 = vadd.f32 %v537_v32, %v514_v62  ;;  %v567_v60 = vadd.f32 %v563_v10, %v540_v30  ;;  %v630_v24 = vadd.f32 %v626_v27, %v603_v40  ;;  %vm4429_vm11 = vcmask 1006592   ;;  %v4499_v10 = vld [vmem:[#allocation22_spill] sm:$0xff]  ;;  %v4501_v27 = vld [vmem:[#allocation24_spill] sm:$0xff] }
 0x17c   : > { %v3510_v59 = vpop.permute.xlu0 %747  ;;  %v629_v42 = vadd.f32 %v625_v43, %v602_v25  ;;  %vm753_vm10 = vcmask 998400   ;;  %v653_v0 = vmul.f32 %v651_v3, %v647_v38  ;;  %v627_v51 = vmul.f32 %v624_v20, %v621_v16 }
 0x17d   : > { %v568_v55 = vadd.f32 %v564_v44, %v541_v58  ;;  %v594_v29 = vadd.f32 %v590_v17, %v567_v60  ;;  %v622_v2 = vsel %vm4425_vm12, %v4494_v36, %v2969_v4  ;;  %v648_v11 = vsel %vm4426_vm13, %v3325_v46, %v4495_v63  ;;  %v4498_v4 = vld [vmem:[#allocation13_spill] sm:$0xff]  ;;  %v705_v46 = vld [vmem:[#allocation5 + $0x78] sm:$0xff] }
 0x17e   : > { %v652_v49 = vmul.f32 %v651_v3, %v646_v26  ;;  %v673_v8 = vsel %vm4427_vm14, %v4496_v37, %v4492_v47  ;;  %v674_v32 = vsel %vm4427_vm14, %v4497_v45, %v4489_v39  ;;  %vm780_vm9 = vcmask 990208  }
 0x17f   : > { %v3521_v50 = vpop.permute.xlu1 %795  ;;  %v595_v52 = vadd.f32 %v591_v56, %v568_v55  ;;  %v657_v19 = vadd.f32 %v653_v0, %v630_v24  ;;  %v604_v28 = vadd.f32 %v600_v5, %v594_v29  ;;  %v649_v53 = vsel %vm4426_vm13, %v4499_v10, %v4498_v4  ;;  %v4502_v55 = vld [vmem:[#allocation25_spill] sm:$0xff] }
 0x180   : > { %v3527_v54 = vpop.permute.xlu0 %797  ;;  %v700_v62 = vsel %vm699_vm15, %v3339_v7, %v4492_v47  ;;  %v656_v12 = vadd.f32 %v652_v49, %v629_v42  ;;  %v628_v30 = vmul.f32 %v624_v20, %v622_v2  ;;  %v654_v17 = vmul.f32 %v651_v3, %v648_v11  ;;  %v4505_v42 = vld [vmem:[#allocation28_spill] sm:$0xff] }
 0x181   : > { %v701_v35 = vsel %vm699_vm15, %v4500_v57, %v4489_v39  ;;  %vm807_vm12 = vcmask 982016   ;;  %v631_v40 = vadd.f32 %v627_v51, %v604_v28  ;;  %v605_v58 = vadd.f32 %v601_v14, %v595_v52  ;;  %v4503_v14 = vld [vmem:[#allocation26_spill] sm:$0xff]  ;;  %v759_v11 = vld [vmem:[#allocation5 + $0x88] sm:$0xff] }
 0x182   : > { %v679_v56 = vmul.f32 %v678_v21, %v673_v8  ;;  %v680_v25 = vmul.f32 %v678_v21, %v674_v32  ;;  %v655_v5 = vmul.f32 %v651_v3, %v649_v53  ;;  %v706_v60 = vmul.f32 %v705_v46, %v700_v62  ;;  %v4504_v3 = vld [vmem:[#allocation27_spill] sm:$0xff] }
 0x183   : > { %v3540_v9 = vpop.permute.xlu1 %772  ;;  %v675_v7 = vsel %vm4427_vm14, %v4501_v27, %v4495_v63  ;;  %v676_v20 = vsel %vm4427_vm14, %v4502_v55, %v4498_v4  ;;  %vm834_vm13 = vcmask 973824   ;;  %v707_v38 = vmul.f32 %v705_v46, %v701_v35  ;;  %v813_v27 = vld [vmem:[#allocation5 + $0x98] sm:$0xff] }
 0x184   : > { %v3545_v22 = vpop.permute.xlu0 %774  ;;  %v684_v41 = vadd.f32 %v680_v25, %v657_v19  ;;  %v727_v16 = vsel %vm4429_vm11, %v4503_v14, %v4492_v47  ;;  %v728_v29 = vsel %vm4429_vm11, %v4504_v3, %v4489_v39  ;;  %v632_v13 = vadd.f32 %v628_v30, %v605_v58  ;;  %v786_v30 = vld [vmem:[#allocation5 + $0x90] sm:$0xff]  ;;  %v840_v14 = vld [vmem:[#allocation5 + $0xa0] sm:$0xff] }
 0x185   : > { %v683_v26 = vadd.f32 %v679_v56, %v656_v12  ;;  %v658_v52 = vadd.f32 %v654_v17, %v631_v40  ;;  %v702_v0 = vsel %vm699_vm15, %v4505_v42, %v4495_v63  ;;  %vm861_vm14 = vcmask 965632  }
 0x186   : > { %v681_v51 = vmul.f32 %v678_v21, %v675_v7  ;;  %v682_v36 = vmul.f32 %v678_v21, %v676_v20  ;;  %v703_v2 = vsel %vm699_vm15, %v3409_v48, %v4498_v4  ;;  %v754_v49 = vsel %vm753_vm10, %v3433_v34, %v4492_v47 }
 0x187   : > { %v3559_v15 = vpop.permute.xlu1 %822  ;;  %v659_v37 = vadd.f32 %v655_v5, %v632_v13  ;;  %v733_v8 = vmul.f32 %v732_v33, %v727_v16  ;;  %v734_v45 = vmul.f32 %v732_v33, %v728_v29  ;;  %v755_v32 = vsel %vm753_vm10, %v3440_v61, %v4489_v39 }
 0x188   : > { %v3567_v44 = vpop.permute.xlu0 %824  ;;  %vm4435_vm8 = vcmask 957440   ;;  %v710_v28 = vadd.f32 %v706_v60, %v683_v26  ;;  %v711_v21 = vadd.f32 %v707_v38, %v684_v41  ;;  %v708_v10 = vmul.f32 %v705_v46, %v702_v0 }
 0x189   : > { %v729_v48 = vsel %vm4429_vm11, %v3457_v18, %v4495_v63  ;;  %v709_v62 = vmul.f32 %v705_v46, %v703_v2  ;;  %v760_v12 = vmul.f32 %v759_v11, %v754_v49  ;;  %v730_v34 = vsel %vm4429_vm11, %v3465_v31, %v4498_v4 }
 0x18a   : > { %v781_v61 = vsel %vm780_vm9, %v3482_v23, %v4492_v47  ;;  %v685_v17 = vadd.f32 %v681_v51, %v658_v52  ;;  %v686_v57 = vadd.f32 %v682_v36, %v659_v37  ;;  %v761_v35 = vmul.f32 %v759_v11, %v755_v32 }
 0x18b   : > { %v3578_v43 = vpop.permute.xlu1 %799  ;;  %v782_v40 = vsel %vm780_vm9, %v3491_v1, %v4489_v39  ;;  %v737_v18 = vadd.f32 %v733_v8, %v710_v28  ;;  %v738_v58 = vadd.f32 %v734_v45, %v711_v21  ;;  %v735_v46 = vmul.f32 %v732_v33, %v729_v48  ;;  %v894_v45 = vld [vmem:[#allocation5 + $0xb0] sm:$0xff] }
 0x18c   : > { %v3586_v24 = vpop.permute.xlu0 %801  ;;  %v756_v56 = vsel %vm753_vm10, %v3505_v6, %v4495_v63  ;;  %v712_v25 = vadd.f32 %v708_v10, %v685_v17  ;;  %v736_v5 = vmul.f32 %v732_v33, %v730_v34  ;;  %v787_v60 = vmul.f32 %v786_v30, %v781_v61 }
 0x18d   : > { %v808_v23 = vsel %vm807_vm12, %v3521_v50, %v4492_v47  ;;  %v713_v55 = vadd.f32 %v709_v62, %v686_v57  ;;  %v764_v20 = vadd.f32 %v760_v12, %v737_v18  ;;  %v788_v1 = vmul.f32 %v786_v30, %v782_v40 }
 0x18e   : > { %v809_v41 = vsel %vm807_vm12, %v3527_v54, %v4489_v39  ;;  %vm4434_vm11 = vcmask 949248   ;;  %v765_v38 = vadd.f32 %v761_v35, %v738_v58  ;;  %v762_v6 = vmul.f32 %v759_v11, %v756_v56  ;;  %v921_v58 = vld [vmem:[#allocation5 + $0xb8] sm:$0xff] }
 0x18f   : > { %v850_v19 = vpop.permute.xlu1 %849  ;;  %v757_v33 = vsel %vm753_vm10, %v3510_v59, %v4498_v4  ;;  %v835_v50 = vsel %vm834_vm13, %v3559_v15, %v4492_v47  ;;  %v739_v16 = vadd.f32 %v735_v46, %v712_v25  ;;  %v814_v3 = vmul.f32 %v813_v27, %v808_v23  ;;  %v867_v59 = vld [vmem:[#allocation5 + $0xa8] sm:$0xff] }
 0x190   : > { %v852_v53 = vpop.permute.xlu0 %851  ;;  %v783_v29 = vsel %vm780_vm9, %v3540_v9, %v4495_v63  ;;  %v836_v54 = vsel %vm834_vm13, %v3567_v44, %v4489_v39  ;;  %v740_v26 = vadd.f32 %v736_v5, %v713_v55  ;;  %v791_v52 = vadd.f32 %v787_v60, %v764_v20 }
 0x191   : > { %v815_v42 = vmul.f32 %v813_v27, %v809_v41  ;;  %v862_v0 = vsel %vm861_vm14, %v850_v19, %v4492_v47  ;;  %v792_v15 = vadd.f32 %v788_v1, %v765_v38  ;;  %v763_v36 = vmul.f32 %v759_v11, %v757_v33 }
 0x192   : > { %v841_v2 = vmul.f32 %v840_v14, %v835_v50  ;;  %v863_v49 = vsel %vm861_vm14, %v852_v53, %v4489_v39  ;;  %v766_v9 = vadd.f32 %v762_v6, %v739_v16  ;;  %v789_v37 = vmul.f32 %v786_v30, %v783_v29  ;;  %v930_v6 = vld [vmem:[%s4387_s2] sm:$0xff] }
 0x193   : > { %v827_v31 = vpop.permute.xlu1 %826  ;;  %v842_v8 = vmul.f32 %v840_v14, %v836_v54  ;;  %v818_v32 = vadd.f32 %v814_v3, %v791_v52  ;;  %v784_v28 = vsel %vm780_vm9, %v3545_v22, %v4498_v4  ;;  %v868_v19 = vmul.f32 %v867_v59, %v862_v0 }
 0x194   : > { %v829_v7 = vpop.permute.xlu0 %828  ;;  %v819_v10 = vadd.f32 %v815_v42, %v792_v15  ;;  %v810_v48 = vsel %vm807_vm12, %v3578_v43, %v4495_v63  ;;  %v811_v53 = vsel %vm807_vm12, %v3586_v24, %v4498_v4  ;;  %v869_v62 = vmul.f32 %v867_v59, %v863_v49 }
 0x195   : > { %v767_v34 = vadd.f32 %v763_v36, %v740_v26  ;;  %v845_v61 = vadd.f32 %v841_v2, %v818_v32  ;;  %v837_v22 = vsel %vm834_vm13, %v827_v31, %v4495_v63  ;;  %v793_v57 = vadd.f32 %v789_v37, %v766_v9 }
 0x196   : > { %v790_v35 = vmul.f32 %v786_v30, %v784_v28  ;;  %v846_v40 = vadd.f32 %v842_v8, %v819_v10  ;;  %v816_v46 = vmul.f32 %v813_v27, %v810_v48  ;;  %v817_v56 = vmul.f32 %v813_v27, %v811_v53 }
 0x197   : > { %v877_v13 = vpop.permute.xlu1 %876  ;;  %v872_v43 = vadd.f32 %v868_v19, %v845_v61  ;;  %v838_v25 = vsel %vm834_vm13, %v829_v7, %v4498_v4  ;;  %v843_v60 = vmul.f32 %v840_v14, %v837_v22 }
 0x198   : > { %v879_v51 = vpop.permute.xlu0 %878  ;;  %v889_v44 = vsel %vm4435_vm8, %v877_v13, %v4492_v47  ;;  %v873_v5 = vadd.f32 %v869_v62, %v846_v40  ;;  %v794_v41 = vadd.f32 %v790_v35, %v767_v34  ;;  %v844_v7 = vmul.f32 %v840_v14, %v838_v25 }
 0x199   : > { %v890_v11 = vsel %vm4435_vm8, %v879_v51, %v4489_v39  ;;  %v895_v17 = vmul.f32 %v894_v45, %v889_v44  ;;  %v820_v50 = vadd.f32 %v816_v46, %v793_v57  ;;  %v963_v46 = vld [vmem:[%s4388_s3] sm:$0xff] }
 0x19a   : > { %v896_v18 = vmul.f32 %v894_v45, %v890_v11  ;;  %v821_v29 = vadd.f32 %v817_v56, %v794_v41 }
 0x19b   : > { %v854_v21 = vpop.permute.xlu1 %853  ;;  %v899_v30 = vadd.f32 %v895_v17, %v872_v43  ;;  %v2600_v43 = vld [vmem:[%s2947_s7 + $0x8] sm:$0xff] }
 0x19c   : > { %v856_v12 = vpop.permute.xlu0 %855  ;;  %v864_v23 = vsel %vm861_vm14, %v854_v21, %v4495_v63  ;;  %v900_v38 = vadd.f32 %v896_v18, %v873_v5  ;;  %v848_v51 = vadd.f32 %v844_v7, %v821_v29  ;;  %v2599_v18 = vld [vmem:[%s2947_s7] sm:$0xff]  ;;  %v4506_v5 = vmov 0.0  }
 0x19d   : > { %v865_v20 = vsel %vm861_vm14, %v856_v12, %v4498_v4  ;;  %v870_v16 = vmul.f32 %v867_v59, %v864_v23  ;;  %v1247_v7 = vld [vmem:[%s4389_s4] sm:$0xff] }
 0x19e   : > { %v871_v54 = vmul.f32 %v867_v59, %v865_v20 }
 0x19f   : > { %v904_v24 = vpop.permute.xlu1 %903 }
 0x1a0   : > { %v916_v31 = vsel %vm4434_vm11, %v904_v24, %v4492_v47  ;;  %v906_v55 = vpop.permute.xlu0 %905  ;;  %v875_v37 = vadd.f32 %v871_v54, %v848_v51 }
 0x1a1   : > { %v922_v1 = vmul.f32 %v921_v58, %v916_v31  ;;  %v917_v27 = vsel %vm4434_vm11, %v906_v55, %v4489_v39  ;;  %v847_v39 = vadd.f32 %v843_v60, %v820_v50 }
 0x1a2   : > { %v923_v33 = vmul.f32 %v921_v58, %v917_v27  ;;  %v2602_v27 = vld [vmem:[%s2947_s7 + $0x18] sm:$0xff] }
 0x1a3   : > { %v926_v47 = vadd.f32 %v922_v1, %v899_v30  ;;  %v881_v3 = vpop.permute.xlu1 %880  ;;  %v874_v2 = vadd.f32 %v870_v16, %v847_v39  ;;  %v2601_v30 = vld [vmem:[%s2947_s7 + $0x10] sm:$0xff]  ;;  %s4509_s7 = smov 127  }
 0x1a4   : > { %v927_v13 = vadd.f32 %v923_v33, %v900_v38  ;;  %v891_v26 = vsel %vm4435_vm8, %v881_v3, %v4495_v63  ;;  %v883_v52 = vpop.permute.xlu0 %882 }
 0x1a5   : > { %v931_v42 = vadd.f32 %v930_v6, %v926_v47  ;;  %v897_v14 = vmul.f32 %v894_v45, %v891_v26  ;;  %v892_v0 = vsel %vm4435_vm8, %v883_v52, %v4498_v4 }
 0x1a6   : > { %v932_v15 = vadd.f32 %v930_v6, %v927_v13  ;;  %v898_v36 = vmul.f32 %v894_v45, %v892_v0 }
 0x1a7   : > { %v908_v49 = vpop.permute.xlu1 %907  ;;  %v939_v9 = vmin.f32 %v931_v42, 0.0  ;;  %v901_v32 = vadd.f32 %v897_v14, %v874_v2 }
 0x1a8   : > { %v918_v59 = vsel %vm4434_vm11, %v908_v49, %v4495_v63  ;;  %v910_v8 = vpop.permute.xlu0 %909  ;;  %v940_v44 = vmin.f32 %v932_v15, 0.0  ;;  %v902_v21 = vadd.f32 %v898_v36, %v875_v37  ;;  %vm936_vm8 = vcmp.gt.f32.partialorder %v932_v15, 0.0 }
 0x1a9   : > { %v924_v28 = vmul.f32 %v921_v58, %v918_v59  ;;  %v919_v19 = vsel %vm4434_vm11, %v910_v8, %v4498_v4  ;;  %v943_v11 = vmul.f32 1.442695, %v939_v9  ;;  %vm935_vm11 = vcmp.gt.f32.partialorder %v931_v42, 0.0 }
 0x1aa   : > { %v925_v10 = vmul.f32 %v921_v58, %v919_v19  ;;  %v945_v48 = vmul.f32 1.442695, %v940_v44  ;;  %v4507_v37 = vmov 127   ;;  %v4508_v59 = vmov 0  }
 0x1ab   : > { %v928_v53 = vadd.f32 %v924_v28, %v901_v32  ;;  %2567 = vpow2.f32 %v943_v11 }
 0x1ac   : > { %v929_v45 = vadd.f32 %v925_v10, %v902_v21  ;;  %2569 = vpow2.f32 %v945_v48 }
 0x1ad   : > { %v933_v62 = vadd.f32 %v930_v6, %v928_v53 }
 0x1ae   : > { %v934_v12 = vadd.f32 %v930_v6, %v929_v45 }
 0x1af   : > { %v941_v34 = vmin.f32 %v933_v62, 0.0 }
 0x1b0   : > { %v942_v63 = vmin.f32 %v934_v12, 0.0 }
 0x1b1   : > { %v947_v61 = vmul.f32 1.442695, %v941_v34 }
 0x1b2   : > { %v949_v22 = vmul.f32 1.442695, %v942_v63 }
 0x1b3   : > { %2571 = vpow2.f32 %v947_v61 }
 0x1b4   : > { %2573 = vpow2.f32 %v949_v22 }
 0x1b5   : > { %v2568_v17 = vpop.eup %2567 }
 0x1b6   : > { %v2570_v4 = vpop.eup %2569  ;;  %v2381_v57 = vadd.f32 -1.0, %v2568_v17 }
 0x1b7   : > { %v2382_v35 = vadd.f32 -1.0, %v2570_v4 }
 0x1b8   : > { %v955_v40 = vsel %vm935_vm11, %v931_v42, %v2381_v57  ;;  %vm938_vm11 = vcmp.gt.f32.partialorder %v934_v12, 0.0 }
 0x1b9   : > { %v959_v58 = vadd.f32 %v2599_v18, %v955_v40  ;;  %v956_v56 = vsel %vm936_vm8, %v932_v15, %v2382_v35  ;;  %vm937_vm8 = vcmp.gt.f32.partialorder %v933_v62, 0.0 }
 0x1ba   : > { %v960_v25 = vadd.f32 %v2600_v43, %v956_v56 }
 0x1bb   : > { %2432 = vmatpush3.msra.mxu0 %v959_v58 }
 0x1bc   : > { %2434 = vmatmul.mubr.msk.f32.vlgmr.msra.gmra.mrb[0].mxu0 %vm392_vm4, %v963_v46  ;;  %2437 = vmatpush3.msra.mxu1 %v960_v25 }
 0x1bd   : > { %v2572_v24 = vpop.eup %2571  ;;  %2439 = vmatmul.mubr.msk.f32.vlgmr.msra.gmra.mrb[0].mxu1 %vm392_vm4, %v963_v46  ;;  %2441 = vmatprep.subr.mxu0 %v4506_v5 }
 0x1be   : > { %v2574_v60 = vpop.eup %2573  ;;  %v2383_v23 = vadd.f32 -1.0, %v2572_v24  ;;  %2446 = vmatprep.subr.mxu1 %v4506_v5  ;;  %2443 = vmatprep.mubr.msk.f32.mxu0 %vm2763_vm0, %v4506_v5 }
 0x1bf   : > { %v2384_v31 = vadd.f32 -1.0, %v2574_v60  ;;  %2448 = vmatprep.mubr.msk.f32.mxu1 %vm2763_vm0, %v4506_v5 }
 0x1c0   : > { %v957_v55 = vsel %vm937_vm8, %v933_v62, %v2383_v23 }
 0x1c1   : > { %v961_v20 = vadd.f32 %v2601_v30, %v957_v55  ;;  %v958_v1 = vsel %vm938_vm11, %v934_v12, %v2384_v31  ;;  %v3905_v30 = vld [vmem:[#allocation5 + $0xc8] sm:$0xff] }
 0x1c2   : > { %v962_v41 = vadd.f32 %v2602_v27, %v958_v1 }
 0x1c3   : > { %2442 = vmatpush3.msra.mxu0 %v961_v20 }
 0x1c4   : > { %2447 = vmatpush3.msra.mxu1 %v962_v41  ;;  %2444 = vmatmul.mubr.msk.f32.vlgmr.msra.gmra.mrb[2].mxu0 %vm392_vm4, %v963_v46  ;;  %v3917_v41 = vld [vmem:[#allocation5 + $0xc0] sm:$0xff] }
 0x1c5   : > { %2449 = vmatmul.mubr.msk.f32.vlgmr.msra.gmra.mrb[2].mxu1 %vm392_vm4, %v963_v46  ;;  %2451 = vmatprep.subr.mxu0 %v4506_v5 }
 0x1c6   : > { %2456 = vmatprep.subr.mxu1 %v4506_v5  ;;  %2453 = vmatprep.mubr.msk.f32.mxu0 %vm2763_vm0, %v4506_v5 }
 0x1c7   : > { %2458 = vmatprep.mubr.msk.f32.mxu1 %vm2763_vm0, %v4506_v5 }
 0x28f   : > { %v1033_v38 = vpop.f32.mrb[0].mxu0 }
 0x290   : > { %v1248_v6 = vadd.f32 %v1247_v7, %v1033_v38  ;;  %v2435_v33 = vpop.f32.mrb[1].mxu0  ;;  %v1103_v50 = vpop.f32.mrb[0].mxu1  ;;  %v3921_v38 = vld [vmem:[#allocation5 + $0xd0] sm:$0xff] }
 0x291   : > { %v1249_v16 = vadd.f32 %v1247_v7, %v1103_v50  ;;  %v2440_v47 = vpop.f32.mrb[1].mxu1 }
 0x292   : > { %v1256_v3 = vmin.f32 %v1248_v6, 0.0  ;;  %vm1252_vm8 = vcmp.gt.f32.partialorder %v1248_v6, 0.0 }
 0x293   : > { %v1257_v29 = vmin.f32 %v1249_v16, 0.0  ;;  %vm1253_vm11 = vcmp.gt.f32.partialorder %v1249_v16, 0.0 }
 0x294   : > { %v1260_v54 = vmul.f32 1.442695, %v1256_v3 }
 0x295   : > { %v1262_v13 = vmul.f32 1.442695, %v1257_v29  ;;  %v3933_v29 = vld [vmem:[#allocation5 + $0xd8] sm:$0xff] }
 0x296   : > { %2575 = vpow2.f32 %v1260_v54 }
 0x297   : > { %2577 = vpow2.f32 %v1262_v13  ;;  %v1173_v26 = vpop.f32.mrb[2].mxu0 }
 0x298   : > { %v3699_v52 = vadd.f32 %v1247_v7, %v1173_v26  ;;  %v1243_v39 = vpop.f32.mrb[2].mxu1  ;;  %v2445_v42 = vpop.f32.mrb[3].mxu0 }
 0x299   : > { %v3701_v14 = vadd.f32 %v1247_v7, %v1243_v39  ;;  %v2450_v0 = vpop.f32.mrb[3].mxu1 }
 0x29a   : > { %v1258_v8 = vmin.f32 %v3699_v52, 0.0  ;;  %v3949_v0 = vld [vmem:[#allocation5 + $0xe0] sm:$0xff] }
 0x29b   : > { %v1259_v32 = vmin.f32 %v3701_v14, 0.0 }
 0x29c   : > { %v1264_v44 = vmul.f32 1.442695, %v1258_v8 }
 0x29d   : > { %v1266_v28 = vmul.f32 1.442695, %v1259_v32 }
 0x29e   : > { %2579 = vpow2.f32 %v1264_v44  ;;  %v3959_v44 = vld [vmem:[#allocation5 + $0xe8] sm:$0xff] }
 0x29f   : > { %2581 = vpow2.f32 %v1266_v28 }
 0x2a0   : > { %v2576_v51 = vpop.eup %2575 }
 0x2a1   : > { %v2578_v15 = vpop.eup %2577  ;;  %v2389_v36 = vadd.f32 -1.0, %v2576_v51 }
 0x2a2   : > { %v2390_v2 = vadd.f32 -1.0, %v2578_v15 }
 0x2a3   : > { %v3703_v49 = vsel %vm1252_vm8, %v1248_v6, %v2389_v36  ;;  %vm1254_vm8 = vcmp.gt.f32.partialorder %v3699_v52, 0.0 }
 0x2a4   : > { %v3705_v9 = vsel %vm1253_vm11, %v1249_v16, %v2390_v2  ;;  %1278 = vperm.xlu1 %2562, %v3703_v49   ;;  %vm1255_vm11 = vcmp.gt.f32.partialorder %v3701_v14, 0.0 }
 0x2a5   : > { %1283 = vperm.xlu0 %2561, %v3705_v9  }
 0x2a8   : > { %1314 = vrot.lane.b32.xlu1 %v3705_v9, %s2739_s24  ;;  %v2580_v19 = vpop.eup %2579 }
 0x2a9   : > { %1312 = vrot.lane.b32.xlu0 %v3703_v49, %s2739_s24  ;;  %2564 = vset.pattern.permute.xlu1 %v4507_v37  ;;  %v2391_v11 = vadd.f32 -1.0, %v2580_v19  ;;  %v2582_v21 = vpop.eup %2581 }
 0x2aa   : > { %2563 = vset.pattern.permute.xlu0 %v4507_v37  ;;  %v2392_v48 = vadd.f32 -1.0, %v2582_v21 }
 0x2ab   : > { %v3810_v10 = vsel %vm1254_vm8, %v3699_v52, %v2391_v11  ;;  %vm4528_vm8 = vcmask 31744  }
 0x2ac   : > { %1340 = vrot.lane.b32.xlu1 %v3705_v9, %s2740_s26  ;;  %v3817_v53 = vsel %vm1255_vm11, %v3701_v14, %v2392_v48  ;;  %vm4529_vm11 = vmmov %vm4528_vm8 }
 0x2ad   : > { %1338 = vrot.lane.b32.xlu0 %v3703_v49, %s2740_s26 }
 0x2b0   : > { %1366 = vrot.lane.b32.xlu1 %v3705_v9, %s2741_s16 }
 0x2b1   : > { %1364 = vrot.lane.b32.xlu0 %v3703_v49, %s2741_s16 }
 0x2b4   : > { %1392 = vrot.lane.b32.xlu1 %v3705_v9, %s4450_s17 }
 0x2b5   : > { %1390 = vrot.lane.b32.xlu0 %v3703_v49, %s4450_s17  ;;  %s4519_s17 = smov 116  }
 0x2b8   : > { %1418 = vrot.lane.b32.xlu1 %v3705_v9, %s4448_s14 }
 0x2b9   : > { %1416 = vrot.lane.b32.xlu0 %v3703_v49, %s4448_s14  ;;  %s4518_s14 = smov 117  }
 0x2bc   : > { %1444 = vrot.lane.b32.xlu1 %v3705_v9, %s4446_s6 }
 0x2bd   : > { %1442 = vrot.lane.b32.xlu0 %v3703_v49, %s4446_s6  ;;  %s4517_s6 = smov 119  }
 0x2c0   : > { %1470 = vrot.lane.b32.xlu1 %v3705_v9, %s4444_s15 }
 0x2c1   : > { %1468 = vrot.lane.b32.xlu0 %v3703_v49, %s4444_s15  ;;  %s4516_s15 = smov 120  }
 0x2c4   : > { %1496 = vrot.lane.b32.xlu1 %v3705_v9, %s4442_s13 }
 0x2c5   : > { %1494 = vrot.lane.b32.xlu0 %v3703_v49, %s4442_s13  ;;  %s4515_s13 = smov 121  }
 0x2c8   : > { %1522 = vrot.lane.b32.xlu1 %v3705_v9, %s4440_s29 }
 0x2c9   : > { %1520 = vrot.lane.b32.xlu0 %v3703_v49, %s4440_s29  ;;  %s4514_s29 = smov 122  }
 0x2cc   : > { %1548 = vrot.lane.b32.xlu1 %v3705_v9, %s4438_s28 }
 0x2cd   : > { %1546 = vrot.lane.b32.xlu0 %v3703_v49, %s4438_s28  ;;  %s4513_s28 = smov 123  }
 0x2d0   : > { %1301 = vperm.xlu1 %2564, %v3705_v9  }
 0x2d1   : > { %1297 = vperm.xlu0 %2563, %v3703_v49  }
 0x2d4   : > { %1572 = vrot.lane.b32.xlu1 %v3703_v49, %s4436_s27 }
 0x2d5   : > { %1574 = vrot.lane.b32.xlu0 %v3705_v9, %s4436_s27  ;;  %2565 = vset.pattern.permute.xlu1 %v4508_v59  ;;  %s4512_s27 = smov 124  }
 0x2d8   : > { %1608 = vrot.lane.b32.xlu1 %v3703_v49, %s4509_s7 }
 0x2d9   : > { %1610 = vrot.lane.b32.xlu0 %v3705_v9, %s4509_s7 }
 0x2dc   : > { %1634 = vrot.lane.b32.xlu1 %v3703_v49, %s4510_s11 }
 0x2dd   : > { %1636 = vrot.lane.b32.xlu0 %v3705_v9, %s4510_s11 }
 0x2e0   : > { %1660 = vrot.lane.b32.xlu1 %v3703_v49, %s4511_s12 }
 0x2e1   : > { %1662 = vrot.lane.b32.xlu0 %v3705_v9, %s4511_s12 }
 0x2e4   : > { %1686 = vrot.lane.b32.xlu1 %v3703_v49, %s4512_s27 }
 0x2e5   : > { %1688 = vrot.lane.b32.xlu0 %v3705_v9, %s4512_s27 }
 0x2e8   : > { %1712 = vrot.lane.b32.xlu1 %v3703_v49, %s4513_s28 }
 0x2e9   : > { %1714 = vrot.lane.b32.xlu0 %v3705_v9, %s4513_s28 }
 0x2ec   : > { %1738 = vrot.lane.b32.xlu1 %v3703_v49, %s4514_s29 }
 0x2ed   : > { %1740 = vrot.lane.b32.xlu0 %v3705_v9, %s4514_s29 }
 0x2f0   : > { %1764 = vrot.lane.b32.xlu1 %v3703_v49, %s4515_s13 }
 0x2f1   : > { %1766 = vrot.lane.b32.xlu0 %v3705_v9, %s4515_s13 }
 0x2f4   : > { %1790 = vrot.lane.b32.xlu1 %v3703_v49, %s4516_s15 }
 0x2f5   : > { %1792 = vrot.lane.b32.xlu0 %v3705_v9, %s4516_s15 }
 0x2f8   : > { %1816 = vrot.lane.b32.xlu1 %v3703_v49, %s4517_s6 }
 0x2f9   : > { %1818 = vrot.lane.b32.xlu0 %v3705_v9, %s4517_s6 }
 0x2fc   : > { %1842 = vrot.lane.b32.xlu1 %v3703_v49, %s4452_s10 }
 0x2fd   : > { %1844 = vrot.lane.b32.xlu0 %v3705_v9, %s4452_s10  ;;  %s4520_s10 = smov 8  }
 0x300   : > { %1868 = vrot.lane.b32.xlu1 %v3703_v49, %s4518_s14 }
 0x301   : > { %1870 = vrot.lane.b32.xlu0 %v3705_v9, %s4518_s14 }
 0x304   : > { %1894 = vrot.lane.b32.xlu1 %v3703_v49, %s4519_s17 }
 0x305   : > { %1896 = vrot.lane.b32.xlu0 %v3705_v9, %s4519_s17 }
 0x308   : > { %1288 = vperm.xlu1 %2565, %v3810_v10  }
 0x309   : > { %1316 = vrot.lane.b32.xlu0 %v3810_v10, %s2739_s24 }
 0x30c   : > { %1293 = vperm.xlu1 %2565, %v3817_v53  }
 0x30d   : > { %1342 = vrot.lane.b32.xlu0 %v3810_v10, %s2740_s26 }
 0x310   : > { %1318 = vrot.lane.b32.xlu1 %v3817_v53, %s2739_s24  ;;  %s4522_s24 = smov 6  }
 0x311   : > { %1368 = vrot.lane.b32.xlu0 %v3810_v10, %s2741_s16  ;;  %2566 = vset.pattern.permute.xlu1 %v4507_v37 }
 0x314   : > { %1344 = vrot.lane.b32.xlu1 %v3817_v53, %s2740_s26  ;;  %s4524_s26 = smov 4  }
 0x315   : > { %1394 = vrot.lane.b32.xlu0 %v3810_v10, %s4520_s10 }
 0x318   : > { %1370 = vrot.lane.b32.xlu1 %v3817_v53, %s2741_s16  ;;  %s4525_s16 = smov 3  }
 0x319   : > { %1420 = vrot.lane.b32.xlu0 %v3810_v10, %s4521_s0 }
 0x31c   : > { %1396 = vrot.lane.b32.xlu1 %v3817_v53, %s4520_s10 }
 0x31d   : > { %1446 = vrot.lane.b32.xlu0 %v3810_v10, %s4522_s24 }
 0x320   : > { %1422 = vrot.lane.b32.xlu1 %v3817_v53, %s4521_s0  ;;  %s4526_s0 = smov 2  }
 0x321   : > { %1472 = vrot.lane.b32.xlu0 %v3810_v10, %s4523_s1 }
 0x323   : > { %v3843_v45 = vpop.permute.xlu1 %1278 }
 0x324   : > { %v3845_v62 = vpop.permute.xlu0 %1283  ;;  %1448 = vrot.lane.b32.xlu1 %v3817_v53, %s4522_s24 }
 0x325   : > { %1498 = vrot.lane.b32.xlu0 %v3810_v10, %s4524_s26 }
 0x327   : > { %v1315_v12 = vpop.permute.xlu1 %1314 }
 0x328   : > { %v1313_v34 = vpop.permute.xlu0 %1312  ;;  %1474 = vrot.lane.b32.xlu1 %v3817_v53, %s4523_s1  ;;  %s4527_s1 = smov 1   ;;  %v1325_v33 = vsel %vm312_vm1, %v3845_v62, %v1315_v12 }
 0x329   : > { %1526 = vrot.lane.b32.xlu0 %v3817_v53, %s4525_s16  ;;  %v1324_v7 = vsel %vm312_vm1, %v3843_v45, %v1313_v34  ;;  %v1331_v42 = vmul.f32 %v3917_v41, %v1325_v33  ;;  %v3973_v34 = vld [vmem:[#allocation5 + $0xf0] sm:$0xff] }
 0x32a   : > { %v1330_v26 = vmul.f32 %v3917_v41, %v1324_v7 }
 0x32b   : > { %v1341_v63 = vpop.permute.xlu1 %1340 }
 0x32c   : > { %v1339_v61 = vpop.permute.xlu0 %1338  ;;  %1500 = vrot.lane.b32.xlu1 %v3817_v53, %s4524_s26  ;;  %v1351_v27 = vsel %vm338_vm2, %v3845_v62, %v1341_v63 }
 0x32d   : > { %1552 = vrot.lane.b32.xlu0 %v3817_v53, %s4526_s0  ;;  %v1350_v20 = vsel %vm338_vm2, %v3843_v45, %v1339_v61  ;;  %v1357_v3 = vmul.f32 %v3905_v30, %v1351_v27 }
 0x32e   : > { %v1356_v50 = vmul.f32 %v3905_v30, %v1350_v20 }
 0x32f   : > { %v1367_v22 = vpop.permute.xlu1 %1366  ;;  %v1361_v59 = vadd.f32 %v1357_v3, %v1331_v42 }
 0x330   : > { %v1365_v17 = vpop.permute.xlu0 %1364  ;;  %1524 = vrot.lane.b32.xlu1 %v3810_v10, %s4525_s16  ;;  %v1377_v16 = vsel %vm365_vm3, %v3845_v62, %v1367_v22  ;;  %v1360_v15 = vadd.f32 %v1356_v50, %v1330_v26  ;;  %v4006_v26 = vld [vmem:[#allocation5 + $0x108] sm:$0xff] }
 0x331   : > { %1309 = vperm.xlu0 %2563, %v3817_v53   ;;  %v1376_v6 = vsel %vm365_vm3, %v3843_v45, %v1365_v17  ;;  %v1383_v14 = vmul.f32 %v3921_v38, %v1377_v16 }
 0x332   : > { %v1382_v52 = vmul.f32 %v3921_v38, %v1376_v6  ;;  %v3996_v6 = vld [vmem:[#allocation5 + $0x100] sm:$0xff] }
 0x333   : > { %v1393_v4 = vpop.permute.xlu1 %1392  ;;  %v1387_v48 = vadd.f32 %v1383_v14, %v1361_v59 }
 0x334   : > { %v1391_v57 = vpop.permute.xlu0 %1390  ;;  %1550 = vrot.lane.b32.xlu1 %v3810_v10, %s4526_s0  ;;  %v1403_v39 = vsel %vm392_vm4, %v3845_v62, %v1393_v4  ;;  %v1386_v19 = vadd.f32 %v1382_v52, %v1360_v15  ;;  %v4020_v15 = vld [vmem:[#allocation5 + $0x110] sm:$0xff]  ;;  %s2274_s0 = scalar_lea.sflag [#allocation4], %s2941_s23 }
 0x335   : > { %1578 = vrot.lane.b32.xlu0 %v3817_v53, %s4527_s1  ;;  %v1402_v54 = vsel %vm392_vm4, %v3843_v45, %v1391_v57  ;;  %v1409_v8 = vmul.f32 %v3933_v29, %v1403_v39 }
 0x336   : > { %v1408_v36 = vmul.f32 %v3933_v29, %v1402_v54 }
 0x337   : > { %v1419_v35 = vpop.permute.xlu1 %1418  ;;  %v1413_v57 = vadd.f32 %v1409_v8, %v1387_v48 }
 0x338   : > { %v1417_v40 = vpop.permute.xlu0 %1416  ;;  %1305 = vperm.xlu1 %2566, %v3810_v10   ;;  %v1429_v2 = vsel %vm419_vm5, %v3845_v62, %v1419_v35  ;;  %v1412_v61 = vadd.f32 %v1408_v36, %v1386_v19 }
 0x339   : > { %1614 = vrot.lane.b32.xlu0 %v3817_v53, %s4509_s7  ;;  %v1428_v51 = vsel %vm419_vm5, %v3843_v45, %v1417_v40  ;;  %v1435_v12 = vmul.f32 %v3949_v0, %v1429_v2  ;;  %v3982_v40 = vld [vmem:[#allocation5 + $0xf8] sm:$0xff] }
 0x33a   : > { %v1434_v11 = vmul.f32 %v3949_v0, %v1428_v51 }
 0x33b   : > { %v1445_v18 = vpop.permute.xlu1 %1444  ;;  %v1439_v27 = vadd.f32 %v1435_v12, %v1413_v57  ;;  %v4036_v12 = vld [vmem:[#allocation5 + $0x118] sm:$0xff] }
 0x33c   : > { %v1443_v58 = vpop.permute.xlu0 %1442  ;;  %1576 = vrot.lane.b32.xlu1 %v3810_v10, %s4527_s1  ;;  %v1455_v21 = vsel %vm446_vm6, %v3845_v62, %v1445_v18 }
 0x33d   : > { %1640 = vrot.lane.b32.xlu0 %v3817_v53, %s4510_s11  ;;  %v1454_v32 = vsel %vm446_vm6, %v3843_v45, %v1443_v58  ;;  %v1461_v35 = vmul.f32 %v3959_v44, %v1455_v21 }
 0x33e   : > { %v1460_v22 = vmul.f32 %v3959_v44, %v1454_v32 }
 0x33f   : > { %v3873_v46 = vpop.permute.xlu1 %1470  ;;  %v1465_v3 = vadd.f32 %v1461_v35, %v1439_v27  ;;  %v1600_v35 = vmul.f32 %v4036_v12, %v3703_v49 }
 0x340   : > { %v1469_v56 = vpop.permute.xlu0 %1468  ;;  %1612 = vrot.lane.b32.xlu1 %v3810_v10, %s4509_s7  ;;  %v1481_v17 = vsel %vm4454_vm7, %v3845_v62, %v3873_v46 }
 0x341   : > { %1666 = vrot.lane.b32.xlu0 %v3817_v53, %s4511_s12  ;;  %v1480_v63 = vsel %vm4454_vm7, %v3843_v45, %v1469_v56  ;;  %v1438_v56 = vadd.f32 %v1434_v11, %v1412_v61  ;;  %v1487_v7 = vmul.f32 %v3973_v34, %v1481_v17  ;;  %v4040_v17 = vld [vmem:[#allocation5 + $0x120] sm:$0xff] }
 0x342   : > { %v1486_v20 = vmul.f32 %v3973_v34, %v1480_v63 }
 0x343   : > { %v3879_v43 = vpop.permute.xlu1 %1496  ;;  %v1464_v33 = vadd.f32 %v1460_v22, %v1438_v56  ;;  %v1491_v14 = vadd.f32 %v1487_v7, %v1465_v3 }
 0x344   : > { %v3881_v25 = vpop.permute.xlu0 %1494  ;;  %1638 = vrot.lane.b32.xlu1 %v3810_v10, %s4510_s11  ;;  %v1507_v46 = vsel %vm4529_vm11, %v3845_v62, %v3879_v43  ;;  %vm4533_vm11 = vcmask 15360  }
 0x345   : > { %1692 = vrot.lane.b32.xlu0 %v3817_v53, %s4512_s27  ;;  %v1506_v18 = vsel %vm4528_vm8, %v3843_v45, %v3881_v25  ;;  %vm4531_vm8 = vcmask 23552   ;;  %v1513_v54 = vmul.f32 %v3982_v40, %v1507_v46  ;;  %v4052_v46 = vld [vmem:[#allocation5 + $0x128] sm:$0xff] }
 0x346   : > { %v1512_v50 = vmul.f32 %v3982_v40, %v1506_v18  ;;  %vm4532_vm7 = vmmov %vm4531_vm8 }
 0x347   : > { %v3887_v24 = vpop.permute.xlu1 %1522 }
 0x348   : > { %v3889_v60 = vpop.permute.xlu0 %1520  ;;  %1664 = vrot.lane.b32.xlu1 %v3810_v10, %s4511_s12  ;;  %v1533_v16 = vsel %vm4532_vm7, %v3845_v62, %v3887_v24  ;;  %vm4534_vm7 = vmmov %vm4533_vm11  ;;  %s2414_s12 = sshll.u32 %s2817_s22, 9  ;;  %s2764_s22 = smov [#allocation7]  }
 0x349   : > { %1718 = vrot.lane.b32.xlu0 %v3817_v53, %s4513_s28  ;;  %v1532_v25 = vsel %vm4531_vm8, %v3843_v45, %v3889_v60  ;;  %v1490_v60 = vadd.f32 %v1486_v20, %v1464_v33  ;;  %v1539_v51 = vmul.f32 %v3996_v6, %v1533_v16  ;;  %vm4535_vm8 = vcmask 7168   ;;  %v4062_v16 = vld [vmem:[#allocation5 + $0x130] sm:$0xff]  ;;  %s4340_s16 = scalar_lea.hbm %s4390_s5, %s2414_s12 }
 0x34a   : > { %v1538_v42 = vmul.f32 %v3996_v6, %v1532_v25  ;;  %v1601_v20 = vmul.f32 %v4036_v12, %v3705_v9 }
 0x34b   : > { %v3895_v23 = vpop.permute.xlu1 %1548 }
 0x34c   : > { %v3897_v31 = vpop.permute.xlu0 %1546  ;;  %1690 = vrot.lane.b32.xlu1 %v3810_v10, %s4512_s27  ;;  %v1559_v24 = vsel %vm4534_vm7, %v3845_v62, %v3895_v23  ;;  %v1517_v23 = vadd.f32 %v1513_v54, %v1491_v14  ;;  %vm4537_vm7 = vcmask 1039360   ;;  %s4571_s27 = sshll.u32 %s2941_s23, 5 }
 0x34d   : > { %1744 = vrot.lane.b32.xlu0 %v3817_v53, %s4514_s29  ;;  %v1558_v52 = vsel %vm4533_vm11, %v3843_v45, %v3897_v31  ;;  %v1516_v31 = vadd.f32 %v1512_v50, %v1490_v60  ;;  %vm4536_vm11 = vmmov %vm4535_vm8  ;;  %v1565_v59 = vmul.f32 %v4006_v26, %v1559_v24  ;;  %s257_s7 = scalar_lea.vmem [#allocation7], %s4571_s27 }
 0x34e   : > { %v1564_v36 = vmul.f32 %v4006_v26, %v1558_v52  ;;  %s2287_s11 = sshll.u32 %s257_s7, 4  ;;  %s4335_s11 = int_to_ptr.vmem [resolvable:$true] %s2287_s11 }
 0x34f   : > { %v3903_v55 = vpop.permute.xlu1 %1301  ;;  %v1542_v32 = vadd.f32 %v1538_v42, %v1516_v31  ;;  %v4070_v42 = vld [vmem:[#allocation5 + $0x138] sm:$0xff]  ;;  %s2661_s1 = scalar_lea.vmem %s4335_s11, 512 }
 0x350   : > { %v3909_v1 = vpop.permute.xlu0 %1297  ;;  %1716 = vrot.lane.b32.xlu1 %v3810_v10, %s4513_s28  ;;  %p2662_p4 = scmp.ne.s32.totalorder %s4335_s11, %s2661_s1 }
 0x351   : > { %1770 = vrot.lane.b32.xlu0 %v3817_v53, %s4515_s13  ;;  %v1568_v21 = vadd.f32 %v1564_v36, %v1542_v32  ;;  %v4078_v36 = vld [vmem:[#allocation5 + $0x140] sm:$0xff] }
 0x352   : > { %p2663_p6 = pnand %p2662_p4, %p2890_p12 }
 0x353   : > { %v3930_v47 = vpop.permute.xlu1 %1572 }
 0x354   : > { %v3937_v13 = vpop.permute.xlu0 %1574  ;;  %1742 = vrot.lane.b32.xlu1 %v3810_v10, %s4514_s29  ;;  %v1584_v45 = vsel %vm4535_vm8, %v3703_v49, %v3930_v47  ;;  %v1543_v47 = vadd.f32 %v1539_v51, %v1517_v23  ;;  %vm4538_vm8 = vmmov %vm4537_vm7  ;;  %p2664_p8 = pneg %p2663_p6 }
 0x355   : > { %1796 = vrot.lane.b32.xlu0 %v3817_v53, %s4516_s15  ;;  %v1585_v2 = vsel %vm4536_vm11, %v3705_v9, %v3937_v13  ;;  %v1590_v19 = vmul.f32 %v4020_v15, %v1584_v45  ;;  %vm4539_vm11 = vcmask 1031168  }
 0x356   : > { %v1591_v11 = vmul.f32 %v4020_v15, %v1585_v2  ;;  %v1569_v13 = vadd.f32 %v1565_v59, %v1543_v47  ;;  %v4086_v47 = vld [vmem:[#allocation5 + $0x148] sm:$0xff] }
 0x357   : > { %v3956_v37 = vpop.permute.xlu1 %1608  ;;  %v1594_v61 = vadd.f32 %v1590_v19, %v1568_v21 }
 0x358   : > { %v3963_v28 = vpop.permute.xlu0 %1610  ;;  %1768 = vrot.lane.b32.xlu1 %v3810_v10, %s4515_s13  ;;  %s4530_s13 = smov 118   ;;  %v1595_v22 = vadd.f32 %v1591_v11, %v1569_v13  ;;  %v1620_v57 = vsel %vm4537_vm7, %v3956_v37, %v3703_v49  ;;  %vm4540_vm7 = vmmov %vm4539_vm11 }
 0x359   : > { %1822 = vrot.lane.b32.xlu0 %v3817_v53, %s4517_s6  ;;  %v1621_v18 = vsel %vm4538_vm8, %v3963_v28, %v3705_v9  ;;  %v1604_v37 = vadd.f32 %v1600_v35, %v1594_v61  ;;  %v1626_v25 = vmul.f32 %v4040_v17, %v1620_v57  ;;  %vm4541_vm8 = vcmask 1022976  }
 0x35a   : > { %v1605_v28 = vadd.f32 %v1601_v20, %v1595_v22  ;;  %v1627_v50 = vmul.f32 %v4040_v17, %v1621_v18 }
 0x35b   : > { %v1635_v4 = vpop.permute.xlu1 %1634  ;;  %v1630_v14 = vadd.f32 %v1626_v25, %v1604_v37  ;;  %v4102_v25 = vld [vmem:[#allocation5 + $0x158] sm:$0xff] }
 0x35c   : > { %v1637_v58 = vpop.permute.xlu0 %1636  ;;  %1794 = vrot.lane.b32.xlu1 %v3810_v10, %s4516_s15  ;;  %v1646_v27 = vsel %vm4539_vm11, %v1635_v4, %v3909_v1  ;;  %vm4542_vm11 = vmmov %vm4541_vm8  ;;  %v1631_v45 = vadd.f32 %v1627_v50, %v1605_v28 }
 0x35d   : > { %1848 = vrot.lane.b32.xlu0 %v3817_v53, %s4530_s13  ;;  %v1647_v33 = vsel %vm4540_vm7, %v1637_v58, %v3903_v55  ;;  %v1652_v4 = vmul.f32 %v4052_v46, %v1646_v27  ;;  %vm4543_vm7 = vcmask 1006592  }
 0x35e   : > { %v1653_v60 = vmul.f32 %v4052_v46, %v1647_v33 }
 0x35f   : > { %v1661_v43 = vpop.permute.xlu1 %1660  ;;  %v1656_v2 = vadd.f32 %v1652_v4, %v1630_v14 }
 0x360   : > { %v1663_v39 = vpop.permute.xlu0 %1662  ;;  %1820 = vrot.lane.b32.xlu1 %v3810_v10, %s4517_s6  ;;  %v1672_v3 = vsel %vm4541_vm8, %v1661_v43, %v3909_v1  ;;  %vm4544_vm8 = vmmov %vm4543_vm7  ;;  %v1657_v32 = vadd.f32 %v1653_v60, %v1631_v45 }
 0x361   : > { %1874 = vrot.lane.b32.xlu0 %v3817_v53, %s4518_s14  ;;  %v1673_v54 = vsel %vm4542_vm11, %v1663_v39, %v3903_v55  ;;  %v1678_v51 = vmul.f32 %v4062_v16, %v1672_v3  ;;  %vm4545_vm11 = vcmask 957440  }
 0x362   : > { %v1679_v31 = vmul.f32 %v4062_v16, %v1673_v54 }
 0x363   : > { %v1687_v62 = vpop.permute.xlu1 %1686  ;;  %v1682_v21 = vadd.f32 %v1678_v51, %v1656_v2 }
 0x364   : > { %v1689_v8 = vpop.permute.xlu0 %1688  ;;  %1846 = vrot.lane.b32.xlu1 %v3810_v10, %s4530_s13  ;;  %v1698_v58 = vsel %vm699_vm15, %v1687_v62, %v3909_v1  ;;  %v1683_v61 = vadd.f32 %v1679_v31, %v1657_v32  ;;  %v4118_v31 = vld [vmem:[#allocation5 + $0x168] sm:$0xff]  ;;  %s2665_s13 = sshll.u32 %s2764_s22, 4  ;;  %s2666_s13 = int_to_ptr.vmem [resolvable:$false] %s2665_s13 }
 0x365   : > { %1900 = vrot.lane.b32.xlu0 %v3817_v53, %s4519_s17  ;;  %v1699_v43 = vsel %vm699_vm15, %v1689_v8, %v3903_v55  ;;  %v1704_v23 = vmul.f32 %v4070_v42, %v1698_v58  ;;  %p2668_p10 = scmp.lt.s32.totalorder %s4335_s11, %s2666_s13 }
 0x366   : > { %v1705_v19 = vmul.f32 %v4070_v42, %v1699_v43 }
 0x367   : > { %v1713_v48 = vpop.permute.xlu1 %1712  ;;  %v1708_v35 = vadd.f32 %v1704_v23, %v1682_v21 }
 0x368   : > { %v1715_v63 = vpop.permute.xlu0 %1714  ;;  %1872 = vrot.lane.b32.xlu1 %v3810_v10, %s4518_s14  ;;  %v1724_v39 = vsel %vm4543_vm7, %v1713_v48, %v3909_v1  ;;  %v1709_v27 = vadd.f32 %v1705_v19, %v1683_v61  ;;  %vm4546_vm7 = vmmov %vm4545_vm11 }
 0x369   : > { %v1725_v62 = vsel %vm4544_vm8, %v1715_v63, %v3903_v55  ;;  %v1730_v13 = vmul.f32 %v4078_v36, %v1724_v39  ;;  %v4094_v63 = vld [vmem:[#allocation5 + $0x150] sm:$0xff]  ;;  %vm4547_vm8 = vcmask 949248  }
 0x36a   : > { %v1731_v22 = vmul.f32 %v4078_v36, %v1725_v62 }
 0x36b   : > { %v1739_v56 = vpop.permute.xlu1 %1738  ;;  %v1734_v28 = vadd.f32 %v1730_v13, %v1708_v35 }
 0x36c   : > { %v1741_v7 = vpop.permute.xlu0 %1740  ;;  %1898 = vrot.lane.b32.xlu1 %v3810_v10, %s4519_s17  ;;  %v1750_v8 = vsel %vm753_vm10, %v1739_v56, %v3909_v1  ;;  %v1735_v4 = vadd.f32 %v1731_v22, %v1709_v27  ;;  %s2667_s17 = scalar_lea.vmem %s2666_s13, 1024 }
 0x36d   : > { %v1751_v48 = vsel %vm753_vm10, %v1741_v7, %v3903_v55  ;;  %v1756_v18 = vmul.f32 %v4086_v47, %v1750_v8  ;;  %v4126_v8 = vld [vmem:[#allocation5 + $0x170] sm:$0xff]  ;;  %p2669_p13 = scmp.lt.s32.totalorder %s2667_s17, %s2661_s1 }
 0x36e   : > { %v1757_v37 = vmul.f32 %v4086_v47, %v1751_v48 }
 0x36f   : > { %v1765_v52 = vpop.permute.xlu1 %1764  ;;  %v1760_v58 = vadd.f32 %v1756_v18, %v1734_v28  ;;  %p2670_p3 = por %p2669_p13, %p2668_p10 }
 0x370   : > { %v1767_v24 = vpop.permute.xlu0 %1766  ;;  %v1776_v57 = vsel %vm780_vm9, %v1765_v52, %v3909_v1  ;;  %v4110_v52 = vld [vmem:[#allocation5 + $0x160] sm:$0xff]  ;;  %v1761_v43 = vadd.f32 %v1757_v37, %v1735_v4  ;;  %v4136_v37 = vld [vmem:[#allocation5 + $0x178] sm:$0xff] }
 0x371   : > { %v1777_v56 = vsel %vm780_vm9, %v1767_v24, %v3903_v55  ;;  %v1782_v50 = vmul.f32 %v4094_v63, %v1776_v57  ;;  %p2671_p7 = pnand %p2670_p3, %p2664_p8 }
 0x372   : > { %v1783_v54 = vmul.f32 %v4094_v63, %v1777_v56 }
 0x373   : > { %v1791_v59 = vpop.permute.xlu1 %1790  ;;  %v1786_v23 = vadd.f32 %v1782_v50, %v1760_v58 }
 0x374   : > { %v1793_v11 = vpop.permute.xlu0 %1792  ;;  %v1802_v7 = vsel %vm807_vm12, %v1791_v59, %v3909_v1  ;;  %v1787_v32 = vadd.f32 %v1783_v54, %v1761_v43 }
 0x375   : > { %v1803_v3 = vsel %vm807_vm12, %v1793_v11, %v3903_v55  ;;  %v1808_v24 = vmul.f32 %v4102_v25, %v1802_v7 }
 0x376   : > { %v1809_v45 = vmul.f32 %v4102_v25, %v1803_v3 }
 0x377   : > { %v1817_v20 = vpop.permute.xlu1 %1816  ;;  %v1812_v11 = vadd.f32 %v1808_v24, %v1786_v23  ;;  %v4146_v24 = vld [vmem:[%s4387_s2 + $0x8] sm:$0xff] }
 0x378   : > { %v1819_v33 = vpop.permute.xlu0 %1818  ;;  %v1828_v60 = vsel %vm834_vm13, %v1817_v20, %v3909_v1  ;;  %v1813_v48 = vadd.f32 %v1809_v45, %v1787_v32 }
 0x379   : > { %v1829_v14 = vsel %vm834_vm13, %v1819_v33, %v3903_v55  ;;  %v1834_v62 = vmul.f32 %v4110_v52, %v1828_v60 }
 0x37a   : > { %v1835_v19 = vmul.f32 %v4110_v52, %v1829_v14 }
 0x37b   : > { %v1843_v51 = vpop.permute.xlu1 %1842  ;;  %v1838_v35 = vadd.f32 %v1834_v62, %v1812_v11 }
 0x37c   : > { %v1854_v39 = vsel %vm861_vm14, %v1843_v51, %v3909_v1  ;;  %v1845_v2 = vpop.permute.xlu0 %1844  ;;  %v1839_v20 = vadd.f32 %v1835_v19, %v1813_v48 }
 0x37d   : > { %v1855_v59 = vsel %vm861_vm14, %v1845_v2, %v3903_v55  ;;  %v1860_v21 = vmul.f32 %v4118_v31, %v1854_v39 }
 0x37e   : > { %v1861_v61 = vmul.f32 %v4118_v31, %v1855_v59 }
 0x37f   : > { %v1869_v13 = vpop.permute.xlu1 %1868  ;;  %v1864_v7 = vadd.f32 %v1860_v21, %v1838_v35 }
 0x380   : > { %v1880_v22 = vsel %vm4545_vm11, %v1869_v13, %v3909_v1  ;;  %v1871_v57 = vpop.permute.xlu0 %1870  ;;  %v1865_v28 = vadd.f32 %v1861_v61, %v1839_v20  ;;  %vm4548_vm11 = vmmov %vm4547_vm8 }
 0x381   : > { %v1886_v18 = vmul.f32 %v4126_v8, %v1880_v22  ;;  %v1881_v56 = vsel %vm4546_vm7, %v1871_v57, %v3903_v55 }
 0x382   : > { %v1887_v27 = vmul.f32 %v4126_v8, %v1881_v56 }
 0x383   : > { %v1895_v33 = vpop.permute.xlu1 %1894  ;;  %v1890_v4 = vadd.f32 %v1886_v18, %v1864_v7 }
 0x384   : > { %v1906_v50 = vsel %vm4547_vm8, %v1895_v33, %v3909_v1  ;;  %v1897_v3 = vpop.permute.xlu0 %1896  ;;  %v1891_v58 = vadd.f32 %v1887_v27, %v1865_v28 }
 0x385   : > { %v1912_v54 = vmul.f32 %v4136_v37, %v1906_v50  ;;  %v1907_v60 = vsel %vm4548_vm11, %v1897_v3, %v3903_v55  ;;  %v4159_v50 = vld [vmem:[%s4388_s3 + $0x8] sm:$0xff]  ;;  %vm4555_vm11 = vcmask 7168  }
 0x386   : > { %v1913_v14 = vmul.f32 %v4136_v37, %v1907_v60 }
 0x387   : > { %v1916_v51 = vadd.f32 %v1912_v54, %v1890_v4  ;;  %v4149_v43 = vpop.permute.xlu1 %1288 }
 0x388   : > { %v1917_v45 = vadd.f32 %v1913_v14, %v1891_v58  ;;  %v1317_v1 = vpop.permute.xlu0 %1316 }
 0x389   : > { %v1922_v39 = vadd.f32 %v4146_v24, %v1916_v51  ;;  %v1326_v14 = vsel %vm312_vm1, %v4149_v43, %v1317_v1 }
 0x38a   : > { %v1923_v2 = vadd.f32 %v4146_v24, %v1917_v45 }
 0x38b   : > { %v1930_v23 = vmin.f32 %v1922_v39, 0.0  ;;  %v4153_v62 = vpop.permute.xlu1 %1293  ;;  %vm1926_vm7 = vcmp.gt.f32.partialorder %v1922_v39, 0.0 }
 0x38c   : > { %v1931_v55 = vmin.f32 %v1923_v2, 0.0  ;;  %v1343_v59 = vpop.permute.xlu0 %1342  ;;  %vm1927_vm8 = vcmp.gt.f32.partialorder %v1923_v2, 0.0 }
 0x38d   : > { %v1934_v32 = vmul.f32 1.442695, %v1930_v23  ;;  %v1352_v60 = vsel %vm338_vm2, %v4149_v43, %v1343_v59  ;;  %v1332_v23 = vmul.f32 %v3917_v41, %v1326_v14 }
 0x38e   : > { %v1936_v19 = vmul.f32 1.442695, %v1931_v55 }
 0x38f   : > { %2583 = vpow2.f32 %v1934_v32  ;;  %v1319_v11 = vpop.permute.xlu1 %1318 }
 0x390   : > { %2585 = vpow2.f32 %v1936_v19  ;;  %v1369_v21 = vpop.permute.xlu0 %1368 }
 0x391   : > { %v1378_v51 = vsel %vm365_vm3, %v4149_v43, %v1369_v21 }
 0x393   : > { %v1345_v13 = vpop.permute.xlu1 %1344 }
 0x394   : > { %v1395_v48 = vpop.permute.xlu0 %1394  ;;  %v1353_v19 = vsel %vm338_vm2, %v4153_v62, %v1345_v13  ;;  %vm4551_vm2 = vcmask 23552  }
 0x397   : > { %v1371_v61 = vpop.permute.xlu1 %1370 }
 0x398   : > { %v1421_v22 = vpop.permute.xlu0 %1420 }
 0x399   : > { %v2584_v57 = vpop.eup %2583  ;;  %v1430_v59 = vsel %vm419_vm5, %v4149_v43, %v1421_v22 }
 0x39a   : > { %v2586_v35 = vpop.eup %2585  ;;  %v2394_v18 = vadd.f32 -1.0, %v2584_v57  ;;  %v1436_v22 = vmul.f32 %v3949_v0, %v1430_v59 }
 0x39b   : > { %v1397_v56 = vpop.permute.xlu1 %1396  ;;  %v2395_v20 = vadd.f32 -1.0, %v2586_v35 }
 0x39c   : > { %v1447_v27 = vpop.permute.xlu0 %1446  ;;  %v1946_v7 = vsel %vm1926_vm7, %v1922_v39, %v2394_v18  ;;  %v1358_v39 = vmul.f32 %v3905_v30, %v1352_v60  ;;  %v1379_v18 = vsel %vm365_vm3, %v4153_v62, %v1371_v61  ;;  %vm4552_vm3 = vcmask 15360   ;;  %vm4556_vm7 = vmmov %vm4551_vm2 }
 0x39d   : > { %v1950_v33 = vadd.f32 %v1946_v7, %v3703_v49  ;;  %v1947_v28 = vsel %vm1927_vm8, %v1923_v2, %v2395_v20  ;;  %v1404_v2 = vsel %vm392_vm4, %v4149_v43, %v1395_v48  ;;  %v1456_v57 = vsel %vm446_vm6, %v4149_v43, %v1447_v27  ;;  %vm4557_vm8 = vmmov %vm4552_vm3 }
 0x39e   : > { %v1951_v3 = vadd.f32 %v1947_v28, %v3705_v9  ;;  %v1362_v1 = vadd.f32 %v1358_v39, %v1332_v23  ;;  %v1410_v21 = vmul.f32 %v3933_v29, %v1404_v2  ;;  %v1327_v48 = vsel %vm312_vm1, %v4153_v62, %v1319_v11 }
 0x39f   : > { %2452 = vmatpush3.msra.mxu0 %v1950_v33  ;;  %v1423_v4 = vpop.permute.xlu1 %1422  ;;  %v1359_v7 = vmul.f32 %v3905_v30, %v1353_v19  ;;  %v1405_v27 = vsel %vm392_vm4, %v4153_v62, %v1397_v56  ;;  %v1462_v11 = vmul.f32 %v3959_v44, %v1456_v57  ;;  %v1385_v61 = vmul.f32 %v3921_v38, %v1379_v18 }
 0x3a0   : > { %2457 = vmatpush3.msra.mxu1 %v1951_v3  ;;  %v1473_v54 = vpop.permute.xlu0 %1472  ;;  %2454 = vmatmul.mubr.msk.f32.vlgmr.msra.gmra.mrb[4].mxu0 %vm392_vm4, %v4159_v50  ;;  %v1333_v3 = vmul.f32 %v3917_v41, %v1327_v48  ;;  %vm4550_vm1 = vcmask 31744   ;;  %v1431_v30 = vsel %vm419_vm5, %v4153_v62, %v1423_v4  ;;  %v1411_v2 = vmul.f32 %v3933_v29, %v1405_v27 }
 0x3a1   : > { %2459 = vmatmul.mubr.msk.f32.vlgmr.msra.gmra.mrb[4].mxu1 %vm392_vm4, %v4159_v50  ;;  %2466 = vmatprep.subr.mxu1 %v4506_v5  ;;  %v1437_v59 = vmul.f32 %v3949_v0, %v1431_v30 }
 0x3a2   : > { %2468 = vmatprep.mubr.msk.f32.mxu1 %vm2763_vm0, %v4506_v5  ;;  %2461 = vmatprep.subr.mxu0 %v4506_v5  ;;  %v1363_v39 = vadd.f32 %v1359_v7, %v1333_v3 }
 0x3a3   : > { %v1449_v49 = vpop.permute.xlu1 %1448  ;;  %2463 = vmatprep.mubr.msk.f32.mxu0 %vm2763_vm0, %v4506_v5  ;;  %v1384_v5 = vmul.f32 %v3921_v38, %v1378_v51  ;;  %vm4549_vm0 = vcmask 39936  }
 0x3a4   : > { %v1499_v9 = vpop.permute.xlu0 %1498  ;;  %v1482_v13 = vsel %vm4549_vm0, %v4149_v43, %v1473_v54  ;;  %v1457_v38 = vsel %vm446_vm6, %v4153_v62, %v1449_v49  ;;  %vm4553_vm5 = vmmov %vm4549_vm0 }
 0x3a5   : > { %v1388_v35 = vadd.f32 %v1384_v5, %v1362_v1  ;;  %v1508_v60 = vsel %vm4550_vm1, %v4149_v43, %v1499_v9  ;;  %v1488_v54 = vmul.f32 %v3973_v34, %v1482_v13  ;;  %v1389_v5 = vadd.f32 %v1385_v61, %v1363_v39  ;;  %vm4554_vm6 = vmmov %vm4550_vm1 }
 0x3a6   : > { %v1514_v9 = vmul.f32 %v3982_v40, %v1508_v60  ;;  %v1463_v48 = vmul.f32 %v3959_v44, %v1457_v38  ;;  %vm4558_vm0 = vmmov %vm4555_vm11  ;;  %vm4559_vm1 = vcmask 1039360  }
 0x3a7   : > { %v1475_v58 = vpop.permute.xlu1 %1474  ;;  %v1414_v28 = vadd.f32 %v1410_v21, %v1388_v35  ;;  %v1415_v57 = vadd.f32 %v1411_v2, %v1389_v5 }
 0x3a8   : > { %v1527_v45 = vpop.permute.xlu0 %1526  ;;  %v1483_v29 = vsel %vm4553_vm5, %v4153_v62, %v1475_v58  ;;  %vm4562_vm5 = vmmov %vm4559_vm1 }
 0x3a9   : > { %v1440_v14 = vadd.f32 %v1436_v22, %v1414_v28  ;;  %v1441_v22 = vadd.f32 %v1437_v59, %v1415_v57 }
 0x3ab   : > { %v1501_v55 = vpop.permute.xlu1 %1500  ;;  %v1466_v41 = vadd.f32 %v1462_v11, %v1440_v14  ;;  %v1467_v58 = vadd.f32 %v1463_v48, %v1441_v22 }
 0x3ac   : > { %v4185_v32 = vpop.permute.xlu0 %1552  ;;  %v1509_v18 = vsel %vm4554_vm6, %v4153_v62, %v1501_v55  ;;  %v1535_v55 = vsel %vm4556_vm7, %v4153_v62, %v1527_v45  ;;  %vm4563_vm6 = vcmask 1006592  }
 0x3ad   : > { %v1492_v1 = vadd.f32 %v1488_v54, %v1466_v41  ;;  %v1515_v13 = vmul.f32 %v3982_v40, %v1509_v18  ;;  %v1541_v40 = vmul.f32 %v3996_v6, %v1535_v55 }
 0x3af   : > { %v1525_v20 = vpop.permute.xlu1 %1524  ;;  %v1518_v35 = vadd.f32 %v1514_v9, %v1492_v1 }
 0x3b0   : > { %v4200_v33 = vpop.permute.xlu0 %1309  ;;  %v1534_v56 = vsel %vm4551_vm2, %v4149_v43, %v1525_v20  ;;  %vm4560_vm2 = vcmask 1031168  }
 0x3b1   : > { %v1540_v19 = vmul.f32 %v3996_v6, %v1534_v56 }
 0x3b3   : > { %v1551_v51 = vpop.permute.xlu1 %1550  ;;  %v1544_v20 = vadd.f32 %v1540_v19, %v1518_v35 }
 0x3b4   : > { %v1579_v23 = vpop.permute.xlu0 %1578  ;;  %v1560_v4 = vsel %vm4552_vm3, %v4149_v43, %v1551_v51  ;;  %v1489_v43 = vmul.f32 %v3973_v34, %v1483_v29  ;;  %v1602_v34 = vmul.f32 %v4036_v12, %v3810_v10  ;;  %v1561_v51 = vsel %vm4557_vm8, %v4153_v62, %v4185_v32  ;;  %vm4566_vm8 = vmmov %vm4563_vm6 }
 0x3b5   : > { %v1566_v0 = vmul.f32 %v4006_v26, %v1560_v4  ;;  %v1587_v39 = vsel %vm4558_vm0, %v3817_v53, %v1579_v23  ;;  %v1567_v41 = vmul.f32 %v4006_v26, %v1561_v51  ;;  %v1603_v62 = vmul.f32 %v4036_v12, %v3817_v53 }
 0x3b6   : > { %v1493_v3 = vadd.f32 %v1489_v43, %v1467_v58  ;;  %v1593_v38 = vmul.f32 %v4020_v15, %v1587_v39  ;;  %vm4561_vm3 = vcmask 1022976  }
 0x3b7   : > { %v4224_v21 = vpop.permute.xlu1 %1305  ;;  %v1570_v44 = vadd.f32 %v1566_v0, %v1544_v20  ;;  %vm4565_vm7 = vmmov %vm4561_vm3 }
 0x3b8   : > { %v1615_v49 = vpop.permute.xlu0 %1614  ;;  %v1519_v14 = vadd.f32 %v1515_v13, %v1493_v3 }
 0x3b9   : > { %v1623_v6 = vsel %vm4559_vm1, %v1615_v49, %v3817_v53 }
 0x3ba   : > { %v1545_v56 = vadd.f32 %v1541_v40, %v1519_v14  ;;  %v1629_v26 = vmul.f32 %v4040_v17, %v1623_v6 }
 0x3bb   : > { %v1577_v7 = vpop.permute.xlu1 %1576 }
 0x3bc   : > { %v1586_v28 = vsel %vm4555_vm11, %v3810_v10, %v1577_v7  ;;  %v1641_v27 = vpop.permute.xlu0 %1640  ;;  %v1571_v5 = vadd.f32 %v1567_v41, %v1545_v56  ;;  %vm4564_vm11 = vmmov %vm4560_vm2 }
 0x3bd   : > { %v1592_v11 = vmul.f32 %v4020_v15, %v1586_v28  ;;  %v1649_v23 = vsel %vm4560_vm2, %v1641_v27, %v4200_v33 }
 0x3be   : > { %v1597_v4 = vadd.f32 %v1593_v38, %v1571_v5  ;;  %v1655_v57 = vmul.f32 %v4052_v46, %v1649_v23 }
 0x3bf   : > { %v1596_v61 = vadd.f32 %v1592_v11, %v1570_v44  ;;  %v1613_v60 = vpop.permute.xlu1 %1612 }
 0x3c0   : > { %v1667_v30 = vpop.permute.xlu0 %1666  ;;  %v1607_v29 = vadd.f32 %v1603_v62, %v1597_v4  ;;  %v1622_v12 = vsel %vm4562_vm5, %v1613_v60, %v3810_v10 }
 0x3c1   : > { %v1606_v54 = vadd.f32 %v1602_v34, %v1596_v61  ;;  %v1675_v15 = vsel %vm4561_vm3, %v1667_v30, %v4200_v33  ;;  %v1628_v13 = vmul.f32 %v4040_v17, %v1622_v12 }
 0x3c2   : > { %v1633_v35 = vadd.f32 %v1629_v26, %v1607_v29  ;;  %v1681_v18 = vmul.f32 %v4062_v16, %v1675_v15 }
 0x3c3   : > { %v1639_v2 = vpop.permute.xlu1 %1638  ;;  %v1632_v30 = vadd.f32 %v1628_v13, %v1606_v54 }
 0x3c4   : > { %v1693_v45 = vpop.permute.xlu0 %1692  ;;  %v1659_v43 = vadd.f32 %v1655_v57, %v1633_v35  ;;  %v1648_v20 = vsel %vm4564_vm11, %v1639_v2, %v4224_v21 }
 0x3c5   : > { %v1701_v49 = vsel %vm699_vm15, %v1693_v45, %v4200_v33  ;;  %v1654_v3 = vmul.f32 %v4052_v46, %v1648_v20 }
 0x3c6   : > { %v1707_v7 = vmul.f32 %v4070_v42, %v1701_v49  ;;  %v1685_v27 = vadd.f32 %v1681_v18, %v1659_v43 }
 0x3c7   : > { %v1665_v9 = vpop.permute.xlu1 %1664  ;;  %v1658_v56 = vadd.f32 %v1654_v3, %v1632_v30 }
 0x3c8   : > { %v1719_v59 = vpop.permute.xlu0 %1718  ;;  %v1674_v44 = vsel %vm4565_vm7, %v1665_v9, %v4224_v21  ;;  %v1711_v60 = vadd.f32 %v1707_v7, %v1685_v27 }
 0x3c9   : > { %v1727_v0 = vsel %vm4563_vm6, %v1719_v59, %v4200_v33  ;;  %v1680_v40 = vmul.f32 %v4062_v16, %v1674_v44 }
 0x3ca   : > { %v1733_v11 = vmul.f32 %v4078_v36, %v1727_v0 }
 0x3cb   : > { %v1691_v1 = vpop.permute.xlu1 %1690  ;;  %v1684_v59 = vadd.f32 %v1680_v40, %v1658_v56 }
 0x3cc   : > { %v1745_v32 = vpop.permute.xlu0 %1744  ;;  %v1700_v34 = vsel %vm699_vm15, %v1691_v1, %v4224_v21  ;;  %v1737_v39 = vadd.f32 %v1733_v11, %v1711_v60 }
 0x3cd   : > { %v1753_v28 = vsel %vm753_vm10, %v1745_v32, %v4200_v33  ;;  %v1706_v45 = vmul.f32 %v4070_v42, %v1700_v34 }
 0x3ce   : > { %v1759_v17 = vmul.f32 %v4086_v47, %v1753_v28 }
 0x3cf   : > { %v1717_v19 = vpop.permute.xlu1 %1716  ;;  %v1710_v32 = vadd.f32 %v1706_v45, %v1684_v59 }
 0x3d0   : > { %v1771_v48 = vpop.permute.xlu0 %1770  ;;  %v1726_v46 = vsel %vm4566_vm8, %v1717_v19, %v4224_v21  ;;  %v1763_v9 = vadd.f32 %v1759_v17, %v1737_v39 }
 0x3d1   : > { %v1779_v55 = vsel %vm780_vm9, %v1771_v48, %v4200_v33  ;;  %v1732_v4 = vmul.f32 %v4078_v36, %v1726_v46 }
 0x3d2   : > { %v1785_v2 = vmul.f32 %v4094_v63, %v1779_v55 }
 0x3d3   : > { %v1743_v22 = vpop.permute.xlu1 %1742  ;;  %v1736_v57 = vadd.f32 %v1732_v4, %v1710_v32 }
 0x3d4   : > { %v1797_v58 = vpop.permute.xlu0 %1796  ;;  %v1752_v16 = vsel %vm753_vm10, %v1743_v22, %v4224_v21  ;;  %v1789_v1 = vadd.f32 %v1785_v2, %v1763_v9  ;;  %vm4567_vm10 = vcmask 957440  }
 0x3d5   : > { %v1805_v51 = vsel %vm807_vm12, %v1797_v58, %v4200_v33  ;;  %v1758_v23 = vmul.f32 %v4086_v47, %v1752_v16 }
 0x3d6   : > { %v1811_v54 = vmul.f32 %v4102_v25, %v1805_v51 }
 0x3d7   : > { %v1769_v61 = vpop.permute.xlu1 %1768  ;;  %v1762_v18 = vadd.f32 %v1758_v23, %v1736_v57 }
 0x3d8   : > { %v1823_v14 = vpop.permute.xlu0 %1822  ;;  %v1778_v42 = vsel %vm780_vm9, %v1769_v61, %v4224_v21  ;;  %v1815_v26 = vadd.f32 %v1811_v54, %v1789_v1  ;;  %vm4568_vm9 = vcmask 949248  }
 0x3d9   : > { %v1831_v41 = vsel %vm834_vm13, %v1823_v14, %v4200_v33  ;;  %v1784_v48 = vmul.f32 %v4094_v63, %v1778_v42 }
 0x3da   : > { %v1837_v62 = vmul.f32 %v4110_v52, %v1831_v41 }
 0x3db   : > { %v1795_v38 = vpop.permute.xlu1 %1794  ;;  %v1788_v58 = vadd.f32 %v1784_v48, %v1762_v18 }
 0x3dc   : > { %v1849_v5 = vpop.permute.xlu0 %1848  ;;  %v1804_v15 = vsel %vm807_vm12, %v1795_v38, %v4224_v21  ;;  %v1841_v35 = vadd.f32 %v1837_v62, %v1815_v26  ;;  %vm4569_vm12 = vmmov %vm4567_vm10 }
 0x3dd   : > { %v1857_v6 = vsel %vm861_vm14, %v1849_v5, %v4200_v33  ;;  %v1810_v0 = vmul.f32 %v4102_v25, %v1804_v15 }
 0x3de   : > { %v1863_v19 = vmul.f32 %v4118_v31, %v1857_v6 }
 0x3df   : > { %v1821_v29 = vpop.permute.xlu1 %1820  ;;  %v1814_v44 = vadd.f32 %v1810_v0, %v1788_v58 }
 0x3e0   : > { %v1875_v36 = vpop.permute.xlu0 %1874  ;;  %v1830_v12 = vsel %vm834_vm13, %v1821_v29, %v4224_v21  ;;  %v1867_v43 = vadd.f32 %v1863_v19, %v1841_v35  ;;  %vm4570_vm13 = vmmov %vm4568_vm9 }
 0x3e1   : > { %v1883_v49 = vsel %vm4567_vm10, %v1875_v36, %v4200_v33  ;;  %v1836_v63 = vmul.f32 %v4110_v52, %v1830_v12 }
 0x3e2   : > { %v1889_v47 = vmul.f32 %v4126_v8, %v1883_v49 }
 0x3e3   : > { %v1847_v22 = vpop.permute.xlu1 %1846  ;;  %v1840_v61 = vadd.f32 %v1836_v63, %v1814_v44 }
 0x3e4   : > { %v1856_v20 = vsel %vm861_vm14, %v1847_v22, %v4224_v21  ;;  %v1901_v7 = vpop.permute.xlu0 %1900  ;;  %v1893_v28 = vadd.f32 %v1889_v47, %v1867_v43 }
 0x3e5   : > { %v1909_v13 = vsel %vm4568_vm9, %v1901_v7, %v4200_v33  ;;  %v1862_v11 = vmul.f32 %v4118_v31, %v1856_v20 }
 0x3e6   : > { %v1915_v27 = vmul.f32 %v4136_v37, %v1909_v13 }
 0x3e7   : > { %v1873_v3 = vpop.permute.xlu1 %1872  ;;  %v1866_v52 = vadd.f32 %v1862_v11, %v1840_v61 }
 0x3e8   : > { %v1919_v25 = vadd.f32 %v1915_v27, %v1893_v28  ;;  %v1882_v55 = vsel %vm4569_vm12, %v1873_v3, %v4224_v21 }
 0x3e9   : > { %v1888_v60 = vmul.f32 %v4126_v8, %v1882_v55 }
 0x3ea   : > { %v1925_v34 = vadd.f32 %v4146_v24, %v1919_v25 }
 0x3eb   : > { %v1899_v17 = vpop.permute.xlu1 %1898  ;;  %v1892_v30 = vadd.f32 %v1888_v60, %v1866_v52 }
 0x3ec   : > { %v1933_v14 = vmin.f32 %v1925_v34, 0.0  ;;  %v1908_v33 = vsel %vm4570_vm13, %v1899_v17, %v4224_v21  ;;  %vm1929_vm14 = vcmp.gt.f32.partialorder %v1925_v34, 0.0 }
 0x3ed   : > { %v1914_v40 = vmul.f32 %v4136_v37, %v1908_v33 }
 0x3ee   : > { %v1940_v31 = vmul.f32 1.442695, %v1933_v14 }
 0x3ef   : > { %v1918_v51 = vadd.f32 %v1914_v40, %v1892_v30 }
 0x3f0   : > { %2587 = vpow2.f32 %v1940_v31 }
 0x3f1   : > { %v1924_v39 = vadd.f32 %v4146_v24, %v1918_v51  ;;  %v2403_v24 = vld [vmem:[%s4389_s4 + $0x8] sm:$0xff] }
 0x3f3   : > { %v1932_v46 = vmin.f32 %v1924_v39, 0.0  ;;  %vm1928_vm15 = vcmp.gt.f32.partialorder %v1924_v39, 0.0 }
 0x3f5   : > { %v1938_v2 = vmul.f32 1.442695, %v1932_v46 }
 0x3f7   : > { %2589 = vpow2.f32 %v1938_v2 }
 0x3fa   : > { %v2588_v8 = vpop.eup %2587 }
 0x3fb   : > { %v2397_v56 = vadd.f32 -1.0, %v2588_v8 }
 0x3fd   : > { %v1949_v45 = vsel %vm1929_vm14, %v1925_v34, %v2397_v56 }
 0x3fe   : > { %v1953_v41 = vadd.f32 %v1949_v45, %v3817_v53 }
 0x400   : > { %2467 = vmatpush3.msra.mxu1 %v1953_v41 }
 0x401   : > { %v2590_v38 = vpop.eup %2589  ;;  %2469 = vmatmul.mubr.msk.f32.vlgmr.msra.gmra.mrb[6].mxu1 %vm392_vm4, %v4159_v50 }
 0x402   : > { %v2396_v37 = vadd.f32 -1.0, %v2590_v38 }
 0x404   : > { %v1948_v21 = vsel %vm1928_vm15, %v1924_v39, %v2396_v37 }
 0x405   : > { %v1952_v9 = vadd.f32 %v1948_v21, %v3810_v10 }
 0x407   : > { %2462 = vmatpush3.msra.mxu0 %v1952_v9 }
 0x408   : > { %2464 = vmatmul.mubr.msk.f32.vlgmr.msra.gmra.mrb[6].mxu0 %vm392_vm4, %v4159_v50 }
 0x473   : > { %v2025_v16 = vpop.f32.mrb[4].mxu0 }
 0x474   : > { %v2241_v53 = vadd.f32 %v2403_v24, %v2025_v16  ;;  %v2095_v54 = vpop.f32.mrb[4].mxu1  ;;  %v2455_v5 = vpop.f32.mrb[5].mxu0 }
 0x475   : > { %v2242_v59 = vadd.f32 %v2403_v24, %v2095_v54  ;;  %v2460_v4 = vpop.f32.mrb[5].mxu1 }
 0x476   : > { %v2249_v6 = vmin.f32 %v2241_v53, 0.0  ;;  %vm2245_vm0 = vcmp.gt.f32.partialorder %v2241_v53, 0.0 }
 0x477   : > { %v2250_v1 = vmin.f32 %v2242_v59, 0.0  ;;  %vm2246_vm4 = vcmp.gt.f32.partialorder %v2242_v59, 0.0 }
 0x478   : > { %v2253_v42 = vmul.f32 1.442695, %v2249_v6 }
 0x479   : > { %v2255_v62 = vmul.f32 1.442695, %v2250_v1 }
 0x47a   : > { %2591 = vpow2.f32 %v2253_v42 }
 0x47b   : > { %2593 = vpow2.f32 %v2255_v62 }
 0x484   : > { %v2592_v10 = vpop.eup %2591 }
 0x485   : > { %v2594_v50 = vpop.eup %2593  ;;  %v2404_v32 = vadd.f32 -1.0, %v2592_v10 }
 0x486   : > { %v2405_v23 = vadd.f32 -1.0, %v2594_v50 }
 0x487   : > { %v2265_v29 = vsel %vm2245_vm0, %v2241_v53, %v2404_v32 }
 0x488   : > { %2269 = vst [vmem:[%s257_s7] sm:$0xff] %v2265_v29  ;;  %v2266_v26 = vsel %vm2246_vm4, %v2242_v59, %v2405_v23 }
 0x489   : > { %2270 = vst [vmem:[%s257_s7 + $0x8] sm:$0xff] %v2266_v26 }
 0x4d4   : > { %v2235_v15 = vpop.f32.mrb[6].mxu1 }
 0x4d5   : > { %v2244_v19 = vadd.f32 %v2403_v24, %v2235_v15  ;;  %v2470_v36 = vpop.f32.mrb[7].mxu1 }
 0x4d7   : > { %v2252_v57 = vmin.f32 %v2244_v19, 0.0  ;;  %vm2248_vm1 = vcmp.gt.f32.partialorder %v2244_v19, 0.0 }
 0x4d9   : > { %v2259_v48 = vmul.f32 1.442695, %v2252_v57 }
 0x4db   : > { %2595 = vpow2.f32 %v2259_v48  ;;  %v2165_v49 = vpop.f32.mrb[6].mxu0 }
 0x4dc   : > { %v2243_v35 = vadd.f32 %v2403_v24, %v2165_v49  ;;  %v2465_v12 = vpop.f32.mrb[7].mxu0 }
 0x4de   : > { %v2251_v47 = vmin.f32 %v2243_v35, 0.0  ;;  %vm2247_vm2 = vcmp.gt.f32.partialorder %v2243_v35, 0.0 }
 0x4e0   : > { %v2257_v18 = vmul.f32 1.442695, %v2251_v47 }
 0x4e2   : > { %2597 = vpow2.f32 %v2257_v18 }
 0x4e5   : > { %v2596_v0 = vpop.eup %2595 }
 0x4e6   : > { %v2407_v22 = vadd.f32 -1.0, %v2596_v0 }
 0x4e8   : > { %v2268_v43 = vsel %vm2248_vm1, %v2244_v19, %v2407_v22 }
 0x4e9   : > { %2272 = vst [vmem:[%s257_s7 + $0x18] sm:$0xff] %v2268_v43 }
 0x4ec   : > { %v2598_v20 = vpop.eup %2597 }
 0x4ed   : > { %v2406_v7 = vadd.f32 -1.0, %v2598_v20 }
 0x4ef   : > { %v2267_v58 = vsel %vm2247_vm2, %v2243_v35, %v2406_v7 }
 0x4f0   : > { %2271 = vst [vmem:[%s257_s7 + $0x10] sm:$0xff] %v2267_v58 }
 0x4f1   : > { %2674 = shalt.err (!%p2671_p7)
}
 0x4f2   : > { %s2675_s14 = scalar_lea.hbm %s4340_s16, 512  ;;  %s2679_s29 = scalar_lea.hbm %s4390_s5, 1024 }
 0x4f3   : > { %p2676_p9 = scmp.ne.s32.totalorder %s4340_s16, %s2675_s14  ;;  %p2680_p5 = scmp.lt.u32.totalorder %s4340_s16, %s4390_s5 }
 0x4f4   : > { %p2681_p11 = scmp.lt.u32.totalorder %s2679_s29, %s2675_s14  ;;  %p2683_p4 = scmp.lt.u32.totalorder %s2675_s14, %s4340_s16 }
 0x4f5   : > { %p2677_p1 = pnand %p2676_p9, %p2890_p12 }
 0x4f6   : > { %p2682_p2 = por %p2681_p11, %p2680_p5 }
 0x4f7   : > { %p2678_p0 = pneg %p2677_p1 }
 0x4f8   : > { %p2684_p6 = por %p2683_p4, %p2682_p2 }
 0x4fa   : > { %p2685_p8 = pnand %p2684_p6, %p2678_p0 }
 0x4fc   : > { %2688 = shalt.err (!%p2685_p8)
}
 0x4fd   : > { %s2765_s7 = smov 128  }
 0x4fe   : > { %2477 = dma.vmem_to_hbm [thread:$0]  (%p2890_p12), %s4335_s11, 512, %s4340_s16, %s2274_s0, %s2765_s7, %s2765_s7, %s4520_s10  }
 0x4ff PF: > { %s2302_s12 = sand.u32 1, %s2719_s18   ;;  %p4572_p10 = scmp.ne.s32.totalorder %s4458_s25, 0 }
 0x500   : > { %p4573_p13 = scmp.ge.s32.totalorder %s2731_s21, 2  ;;  %s2303_s24 = scalar_lea.sflag [#allocation4], %s2302_s12 }
 0x502   : > { %p2488_p3 = pnand %p4573_p13, %p4572_p10 }
 0x504   : > { %2714 = dma.done.wait (!%p2488_p3), %s2303_s24, 512  }
 0x505   : > { %2716 = vsyncadd (!%p2488_p3), %s2303_s24, 4294966784  ;;  %p19_p7 = scmp.ge.s32.totalorder %s2852_s30, 4   ;;  %s4574_s18 = smov %s2723_s19 }
 0x506   : > { %s4575_s19 = smov %s2727_s20  ;;  %s4576_s20 = smov %s2886_s8 }
 0x507   : > { %s4577_s21 = smov %s2852_s30  ;;  %21 = sbr.rel (!%p19_p7) target bundleno = 9 (0x9), region = 139 }
 0x50e   :  { %2308 = vsyncpa [#allocation3], 1 }
 0x50f   :  { %2310 = vsyncpa [#allocation3 + $0x1], 1 }
 0x510   :  { %2311 = vsyncpa [#allocation6], 1 }
 0x511   :  { %2312 = vsyncpa [#allocation4], 1 }
 0x512   :  { %2314 = vsyncpa [#allocation4 + $0x1], 1 }

</bundles_post_ra>
